<compile_context>
chip_gen: v6e
topology: v6e:2x2x1
jax: 0.10.0
libtpu: 0.0.40
codegen_flags: <defaults>
</compile_context>

<pallas_src>
import jax
import jax.numpy as jnp
from jax.experimental import pallas as pl
from jax.experimental.pallas import tpu as pltpu


def _gru_kernel(x_ref, wih_ref, whh_ref, bx_ref, bhn_ref, wout_ref, bout_ref,
                out_ref, xp_ref, h_ref):
    """Single-invocation GRU forward.

    x_ref    : (S*B, E)  time-flattened embedded inputs
    wih_ref  : (E, 3H)   fused input->hidden weights, gate order [r | z | n]
    whh_ref  : (H, 3H)   fused hidden->hidden weights
    bx_ref   : (1, 3H)   b_ih (all gates) + b_hh (r, z) folded together
    bhn_ref  : (1, H)    b_hh for the n gate (lives inside the r* product)
    wout_ref : (H, Cp)   classifier weights, lane-padded to Cp
    bout_ref : (1, Cp)
    out_ref  : (B, Cp)   padded logits
    xp_ref   : VMEM (S*B, 3H) scratch: hoisted input projection
    h_ref    : VMEM (B, H)    hidden-state accumulator
    """
    B, H = h_ref.shape
    S = x_ref.shape[0] // B

    # Hoisted input projection: one large MXU matmul, outside the recurrence.
    xp_ref[...] = (
        jnp.dot(x_ref[...], wih_ref[...], preferred_element_type=jnp.float32)
        + bx_ref[...])

    # h0 = zeros (matches initialize_hidden()).
    h_ref[...] = jnp.zeros_like(h_ref)

    # Serial recurrence: one fused (B,H)x(H,3H) matmul + elementwise per step.
    def step(t, carry):
        h = h_ref[...]                                          # (B, H)
        row = pl.multiple_of(t * B, B)
        xp = xp_ref[pl.ds(row, B), :]                           # (B, 3H)
        hp = jnp.dot(h, whh_ref[...],
                     preferred_element_type=jnp.float32)        # (B, 3H)
        r = jax.nn.sigmoid(xp[:, 0:H] + hp[:, 0:H])
        z = jax.nn.sigmoid(xp[:, H:2 * H] + hp[:, H:2 * H])
        n = jnp.tanh(xp[:, 2 * H:3 * H]
                     + r * (hp[:, 2 * H:3 * H] + bhn_ref[...]))
        h_ref[...] = (1.0 - z) * n + z * h
        return carry

    jax.lax.fori_loop(0, S, step, 0, unroll=True)

    # Classifier head on the last hidden state (lane-dense padded output).
    out_ref[...] = (
        jnp.dot(h_ref[...], wout_ref[...], preferred_element_type=jnp.float32)
        + bout_ref[...])


def gru_forward(sentences, labels, params):
    """Mirrors GRU.forward(sentences, labels) -> (logits, labels)."""
    emb_table = params["embedding"]      # (V, E)
    w_ih = params["w_ih"]                # (E, 3H), gates [r | z | n]
    w_hh = params["w_hh"]                # (H, 3H)
    b_ih = params["b_ih"]                # (3H,)
    b_hh = params["b_hh"]                # (3H,)
    w_out = params["w_out"]              # (H, C)
    b_out = params["b_out"]              # (C,)

    S, B = sentences.shape
    E = emb_table.shape[1]
    H = w_hh.shape[0]
    C = w_out.shape[1]
    C_pad = ((C + 127) // 128) * 128     # lane-dense classifier output

    # Embedding gather (plain-JAX glue) and time-flatten to (S*B, E).
    embeds = jnp.take(emb_table, sentences, axis=0)              # (S, B, E)
    x_flat = embeds.reshape(S * B, E)

    # Fold biases: b_ih (all gates) + b_hh (r, z) go into the hoisted input
    # projection; b_hh for n stays separate (it sits inside the r* product).
    bx = (b_ih + jnp.concatenate(
        [b_hh[:2 * H], jnp.zeros((H,), b_hh.dtype)])).reshape(1, 3 * H)
    bhn = b_hh[2 * H:].reshape(1, H)

    # Lane-pad the classifier head so the final store is a full-width vst.
    w_out_p = jnp.zeros((H, C_pad), w_out.dtype).at[:, :C].set(w_out)
    b_out_p = jnp.zeros((1, C_pad), b_out.dtype).at[0, :C].set(b_out)

    vmem = pl.BlockSpec(memory_space=pltpu.MemorySpace.VMEM)
    logits_padded = pl.pallas_call(
        _gru_kernel,
        out_shape=jax.ShapeDtypeStruct((B, C_pad), jnp.float32),
        in_specs=[vmem] * 7,
        out_specs=vmem,
        scratch_shapes=[
            pltpu.VMEM((S * B, 3 * H), jnp.float32),   # hoisted input proj
            pltpu.VMEM((B, H), jnp.float32),           # hidden state
        ],
    )(x_flat, w_ih, w_hh, bx, bhn, w_out_p, b_out_p)

    return logits_padded[:, :C], labels


def make_params(key, vocab, dim_embedding, dim_hidden, classes):
    ks = jax.random.split(key, 7)
    E, H, C = dim_embedding, dim_hidden, classes
    bound = 1.0 / jnp.sqrt(H)   # nn.GRU and nn.Linear(H, C) init bound
    return {
        # nn.Embedding: N(0, 1)
        "embedding": jax.random.normal(ks[0], (vocab, E), jnp.float32),
        # nn.GRU weights U(-1/sqrt(H), 1/sqrt(H)); stored transposed + fused
        # lane-dense: columns ordered [r | z | n] so the kernel does x @ W.
        "w_ih": jax.random.uniform(ks[1], (E, 3 * H), jnp.float32, -bound, bound),
        "w_hh": jax.random.uniform(ks[2], (H, 3 * H), jnp.float32, -bound, bound),
        "b_ih": jax.random.uniform(ks[3], (3 * H,), jnp.float32, -bound, bound),
        "b_hh": jax.random.uniform(ks[4], (3 * H,), jnp.float32, -bound, bound),
        # nn.Linear(H, C)
        "w_out": jax.random.uniform(ks[5], (H, C), jnp.float32, -bound, bound),
        "b_out": jax.random.uniform(ks[6], (C,), jnp.float32, -bound, bound),
    }


def _reference_forward(sentences, params):
    """Pure-JAX reference (torch.nn.GRU semantics) for correctness checking."""
    embeds = jnp.take(params["embedding"], sentences, axis=0)    # (S, B, E)
    w_ih, w_hh = params["w_ih"], params["w_hh"]
    b_ih, b_hh = params["b_ih"], params["b_hh"]
    H = w_hh.shape[0]
    B = sentences.shape[1]
    h0 = jnp.zeros((B, H), jnp.float32)

    def step(h, x):
        gi = x @ w_ih + b_ih            # (B, 3H)
        gh = h @ w_hh + b_hh            # (B, 3H)
        r = jax.nn.sigmoid(gi[:, :H] + gh[:, :H])
        z = jax.nn.sigmoid(gi[:, H:2 * H] + gh[:, H:2 * H])
        n = jnp.tanh(gi[:, 2 * H:] + r * gh[:, 2 * H:])
        return (1.0 - z) * n + z * h, None

    h_last, _ = jax.lax.scan(step, h0, embeds)
    return h_last @ params["w_out"] + params["b_out"]


if __name__ == "__main__":
    # Full-f32 reference matmuls so the tolerance check is meaningful.
    jax.config.update("jax_default_matmul_precision", "highest")

    # Small shapes consistent with the module (E=100, H=40, 20 classes).
    seq_len = 12
    batch = 8
    dim_embedding = 100
    dim_hidden = 40
    classes = 20
    vocab = 500

    key = jax.random.PRNGKey(0)
    k_param, k_sent, k_lab = jax.random.split(key, 3)

    params = make_params(k_param, vocab, dim_embedding, dim_hidden, classes)
    sentences = jax.random.randint(k_sent, (seq_len, batch), 0, vocab, jnp.int32)
    labels = jax.random.randint(k_lab, (batch,), 0, classes, jnp.int32)

    logits, labels_out = gru_forward(sentences, labels, params)
    logits = jax.block_until_ready(logits)

    ref = _reference_forward(sentences, params)
    assert logits.shape == (batch, classes)
    assert jnp.allclose(logits, ref, atol=1e-3, rtol=1e-3), "mismatch vs reference"
    assert jnp.array_equal(labels_out, labels)

    print("KERNEL_OK")
</pallas_src>

<mosaic_0001>
module attributes {stable_mosaic.version = 11 : i64} {
  func.func @_gru_kernel(%arg0: memref<96x100xf32, #tpu.memory_space<vmem>>, %arg1: memref<100x120xf32, #tpu.memory_space<vmem>>, %arg2: memref<40x120xf32, #tpu.memory_space<vmem>>, %arg3: memref<1x120xf32, #tpu.memory_space<vmem>>, %arg4: memref<1x40xf32, #tpu.memory_space<vmem>>, %arg5: memref<40x128xf32, #tpu.memory_space<vmem>>, %arg6: memref<1x128xf32, #tpu.memory_space<vmem>>, %arg7: memref<8x128xf32, #tpu.memory_space<vmem>>, %arg8: memref<96x120xf32, #tpu.memory_space<vmem>>, %arg9: memref<8x40xf32, #tpu.memory_space<vmem>>) attributes {dimension_semantics = [], scalar_prefetch = 0 : i64, scratch_operands = 2 : i64, tpu.core_type = #tpu.core_type<tc>} {
    %c0 = arith.constant 0 : index
    %c0_0 = arith.constant 0 : index
    %0 = vector.load %arg0[%c0, %c0_0] : memref<96x100xf32, #tpu.memory_space<vmem>>, vector<96x100xf32>
    %c0_1 = arith.constant 0 : index
    %c0_2 = arith.constant 0 : index
    %1 = vector.load %arg1[%c0_1, %c0_2] : memref<100x120xf32, #tpu.memory_space<vmem>>, vector<100x120xf32>
    %cst = arith.constant dense<0.000000e+00> : vector<96x120xf32>
    %2 = tpu.matmul %0, %1, %cst {dimension_numbers = #tpu.dot_dimension_numbers<[1], [0], [0], [1], [0, 0, 1, 1], [], []>, precision = #tpu.contract_precision<fp32>} : vector<96x100xf32>, vector<100x120xf32>, vector<96x120xf32> -> vector<96x120xf32>
    %c0_3 = arith.constant 0 : index
    %c0_4 = arith.constant 0 : index
    %3 = vector.load %arg3[%c0_3, %c0_4] : memref<1x120xf32, #tpu.memory_space<vmem>>, vector<1x120xf32>
    %4 = vector.broadcast %3 : vector<1x120xf32> to vector<96x120xf32>
    %5 = arith.addf %2, %4 : vector<96x120xf32>
    %c0_5 = arith.constant 0 : index
    %c0_6 = arith.constant 0 : index
    %6 = vector.load %arg8[%c0_5, %c0_6] : memref<96x120xf32, #tpu.memory_space<vmem>>, vector<96x120xf32>
    tpu.vector_store %arg8[%c0_5, %c0_6], %5 {strides = array<i32>} : memref<96x120xf32, #tpu.memory_space<vmem>>, vector<96x120xf32>,
    %cst_7 = arith.constant 0.000000e+00 : f32
    %7 = vector.broadcast %cst_7 : f32 to vector<8x40xf32>
    %c0_8 = arith.constant 0 : index
    %c0_9 = arith.constant 0 : index
    %8 = vector.load %arg9[%c0_8, %c0_9] : memref<8x40xf32, #tpu.memory_space<vmem>>, vector<8x40xf32>
    tpu.vector_store %arg9[%c0_8, %c0_9], %7 {strides = array<i32>} : memref<8x40xf32, #tpu.memory_space<vmem>>, vector<8x40xf32>,
    %c0_i32 = arith.constant 0 : i32
    %c0_10 = arith.constant 0 : index
    %c0_11 = arith.constant 0 : index
    %9 = vector.load %arg9[%c0_10, %c0_11] : memref<8x40xf32, #tpu.memory_space<vmem>>, vector<8x40xf32>
    %c8_i32 = arith.constant 8 : i32
    %10 = arith.muli %c0_i32, %c8_i32 : i32
    %11 = tpu.assume_multiple %10, 8 : i32
    %12 = arith.index_cast %11 : i32 to index
    %c0_12 = arith.constant 0 : index
    %13 = vector.load %arg8[%12, %c0_12] : memref<96x120xf32, #tpu.memory_space<vmem>>, vector<8x120xf32>
    %c0_13 = arith.constant 0 : index
    %c0_14 = arith.constant 0 : index
    %14 = vector.load %arg2[%c0_13, %c0_14] : memref<40x120xf32, #tpu.memory_space<vmem>>, vector<40x120xf32>
    %cst_15 = arith.constant dense<0.000000e+00> : vector<8x120xf32>
    %15 = tpu.matmul %9, %14, %cst_15 {dimension_numbers = #tpu.dot_dimension_numbers<[1], [0], [0], [1], [0, 0, 1, 1], [], []>, precision = #tpu.contract_precision<fp32>} : vector<8x40xf32>, vector<40x120xf32>, vector<8x120xf32> -> vector<8x120xf32>
    %16 = vector.extract_strided_slice %13 {offsets = [0, 0], sizes = [8, 40], strides = [1, 1]} : vector<8x120xf32> to vector<8x40xf32>
    %17 = vector.extract_strided_slice %15 {offsets = [0, 0], sizes = [8, 40], strides = [1, 1]} : vector<8x120xf32> to vector<8x40xf32>
    %18 = arith.addf %16, %17 : vector<8x40xf32>
    %19 = arith.negf %18 : vector<8x40xf32>
    %20 = math.exp %19 : vector<8x40xf32>
    %cst_16 = arith.constant 1.000000e+00 : f32
    %21 = vector.broadcast %cst_16 : f32 to vector<8x40xf32>
    %22 = arith.addf %21, %20 : vector<8x40xf32>
    %23 = arith.divf %21, %22 : vector<8x40xf32>
    %24 = vector.extract_strided_slice %13 {offsets = [0, 40], sizes = [8, 40], strides = [1, 1]} : vector<8x120xf32> to vector<8x40xf32>
    %25 = vector.extract_strided_slice %15 {offsets = [0, 40], sizes = [8, 40], strides = [1, 1]} : vector<8x120xf32> to vector<8x40xf32>
    %26 = arith.addf %24, %25 : vector<8x40xf32>
    %27 = arith.negf %26 : vector<8x40xf32>
    %28 = math.exp %27 : vector<8x40xf32>
    %cst_17 = arith.constant 1.000000e+00 : f32
    %29 = vector.broadcast %cst_17 : f32 to vector<8x40xf32>
    %30 = arith.addf %29, %28 : vector<8x40xf32>
    %31 = arith.divf %29, %30 : vector<8x40xf32>
    %32 = vector.extract_strided_slice %13 {offsets = [0, 80], sizes = [8, 40], strides = [1, 1]} : vector<8x120xf32> to vector<8x40xf32>
    %33 = vector.extract_strided_slice %15 {offsets = [0, 80], sizes = [8, 40], strides = [1, 1]} : vector<8x120xf32> to vector<8x40xf32>
    %c0_18 = arith.constant 0 : index
    %c0_19 = arith.constant 0 : index
    %34 = vector.load %arg4[%c0_18, %c0_19] : memref<1x40xf32, #tpu.memory_space<vmem>>, vector<1x40xf32>
    %35 = vector.broadcast %34 : vector<1x40xf32> to vector<8x40xf32>
    %36 = arith.addf %33, %35 : vector<8x40xf32>
    %37 = arith.mulf %23, %36 : vector<8x40xf32>
    %38 = arith.addf %32, %37 : vector<8x40xf32>
    %39 = math.tanh %38 : vector<8x40xf32>
    %cst_20 = arith.constant 1.000000e+00 : f32
    %40 = vector.broadcast %cst_20 : f32 to vector<8x40xf32>
    %41 = arith.subf %40, %31 : vector<8x40xf32>
    %42 = arith.mulf %41, %39 : vector<8x40xf32>
    %43 = arith.mulf %31, %9 : vector<8x40xf32>
    %44 = arith.addf %42, %43 : vector<8x40xf32>
    %c0_21 = arith.constant 0 : index
    %c0_22 = arith.constant 0 : index
    %45 = vector.load %arg9[%c0_21, %c0_22] : memref<8x40xf32, #tpu.memory_space<vmem>>, vector<8x40xf32>
    tpu.vector_store %arg9[%c0_21, %c0_22], %44 {strides = array<i32>} : memref<8x40xf32, #tpu.memory_space<vmem>>, vector<8x40xf32>,
    %c1_i32 = arith.constant 1 : i32
    %c0_23 = arith.constant 0 : index
    %c0_24 = arith.constant 0 : index
    %46 = vector.load %arg9[%c0_23, %c0_24] : memref<8x40xf32, #tpu.memory_space<vmem>>, vector<8x40xf32>
    %c8_i32_25 = arith.constant 8 : i32
    %47 = arith.muli %c1_i32, %c8_i32_25 : i32
    %48 = tpu.assume_multiple %47, 8 : i32
    %49 = arith.index_cast %48 : i32 to index
    %c0_26 = arith.constant 0 : index
    %50 = vector.load %arg8[%49, %c0_26] : memref<96x120xf32, #tpu.memory_space<vmem>>, vector<8x120xf32>
    %c0_27 = arith.constant 0 : index
    %c0_28 = arith.constant 0 : index
    %51 = vector.load %arg2[%c0_27, %c0_28] : memref<40x120xf32, #tpu.memory_space<vmem>>, vector<40x120xf32>
    %cst_29 = arith.constant dense<0.000000e+00> : vector<8x120xf32>
    %52 = tpu.matmul %46, %51, %cst_29 {dimension_numbers = #tpu.dot_dimension_numbers<[1], [0], [0], [1], [0, 0, 1, 1], [], []>, precision = #tpu.contract_precision<fp32>} : vector<8x40xf32>, vector<40x120xf32>, vector<8x120xf32> -> vector<8x120xf32>
    %53 = vector.extract_strided_slice %50 {offsets = [0, 0], sizes = [8, 40], strides = [1, 1]} : vector<8x120xf32> to vector<8x40xf32>
    %54 = vector.extract_strided_slice %52 {offsets = [0, 0], sizes = [8, 40], strides = [1, 1]} : vector<8x120xf32> to vector<8x40xf32>
    %55 = arith.addf %53, %54 : vector<8x40xf32>
    %56 = arith.negf %55 : vector<8x40xf32>
    %57 = math.exp %56 : vector<8x40xf32>
    %cst_30 = arith.constant 1.000000e+00 : f32
    %58 = vector.broadcast %cst_30 : f32 to vector<8x40xf32>
    %59 = arith.addf %58, %57 : vector<8x40xf32>
    %60 = arith.divf %58, %59 : vector<8x40xf32>
    %61 = vector.extract_strided_slice %50 {offsets = [0, 40], sizes = [8, 40], strides = [1, 1]} : vector<8x120xf32> to vector<8x40xf32>
    %62 = vector.extract_strided_slice %52 {offsets = [0, 40], sizes = [8, 40], strides = [1, 1]} : vector<8x120xf32> to vector<8x40xf32>
    %63 = arith.addf %61, %62 : vector<8x40xf32>
    %64 = arith.negf %63 : vector<8x40xf32>
    %65 = math.exp %64 : vector<8x40xf32>
    %cst_31 = arith.constant 1.000000e+00 : f32
    %66 = vector.broadcast %cst_31 : f32 to vector<8x40xf32>
    %67 = arith.addf %66, %65 : vector<8x40xf32>
    %68 = arith.divf %66, %67 : vector<8x40xf32>
    %69 = vector.extract_strided_slice %50 {offsets = [0, 80], sizes = [8, 40], strides = [1, 1]} : vector<8x120xf32> to vector<8x40xf32>
    %70 = vector.extract_strided_slice %52 {offsets = [0, 80], sizes = [8, 40], strides = [1, 1]} : vector<8x120xf32> to vector<8x40xf32>
    %c0_32 = arith.constant 0 : index
    %c0_33 = arith.constant 0 : index
    %71 = vector.load %arg4[%c0_32, %c0_33] : memref<1x40xf32, #tpu.memory_space<vmem>>, vector<1x40xf32>
    %72 = vector.broadcast %71 : vector<1x40xf32> to vector<8x40xf32>
    %73 = arith.addf %70, %72 : vector<8x40xf32>
    %74 = arith.mulf %60, %73 : vector<8x40xf32>
    %75 = arith.addf %69, %74 : vector<8x40xf32>
    %76 = math.tanh %75 : vector<8x40xf32>
    %cst_34 = arith.constant 1.000000e+00 : f32
    %77 = vector.broadcast %cst_34 : f32 to vector<8x40xf32>
    %78 = arith.subf %77, %68 : vector<8x40xf32>
    %79 = arith.mulf %78, %76 : vector<8x40xf32>
    %80 = arith.mulf %68, %46 : vector<8x40xf32>
    %81 = arith.addf %79, %80 : vector<8x40xf32>
    %c0_35 = arith.constant 0 : index
    %c0_36 = arith.constant 0 : index
    %82 = vector.load %arg9[%c0_35, %c0_36] : memref<8x40xf32, #tpu.memory_space<vmem>>, vector<8x40xf32>
    tpu.vector_store %arg9[%c0_35, %c0_36], %81 {strides = array<i32>} : memref<8x40xf32, #tpu.memory_space<vmem>>, vector<8x40xf32>,
    %c2_i32 = arith.constant 2 : i32
    %c0_37 = arith.constant 0 : index
    %c0_38 = arith.constant 0 : index
    %83 = vector.load %arg9[%c0_37, %c0_38] : memref<8x40xf32, #tpu.memory_space<vmem>>, vector<8x40xf32>
    %c8_i32_39 = arith.constant 8 : i32
    %84 = arith.muli %c2_i32, %c8_i32_39 : i32
    %85 = tpu.assume_multiple %84, 8 : i32
    %86 = arith.index_cast %85 : i32 to index
    %c0_40 = arith.constant 0 : index
    %87 = vector.load %arg8[%86, %c0_40] : memref<96x120xf32, #tpu.memory_space<vmem>>, vector<8x120xf32>
    %c0_41 = arith.constant 0 : index
    %c0_42 = arith.constant 0 : index
    %88 = vector.load %arg2[%c0_41, %c0_42] : memref<40x120xf32, #tpu.memory_space<vmem>>, vector<40x120xf32>
    %cst_43 = arith.constant dense<0.000000e+00> : vector<8x120xf32>
    %89 = tpu.matmul %83, %88, %cst_43 {dimension_numbers = #tpu.dot_dimension_numbers<[1], [0], [0], [1], [0, 0, 1, 1], [], []>, precision = #tpu.contract_precision<fp32>} : vector<8x40xf32>, vector<40x120xf32>, vector<8x120xf32> -> vector<8x120xf32>
    %90 = vector.extract_strided_slice %87 {offsets = [0, 0], sizes = [8, 40], strides = [1, 1]} : vector<8x120xf32> to vector<8x40xf32>
    %91 = vector.extract_strided_slice %89 {offsets = [0, 0], sizes = [8, 40], strides = [1, 1]} : vector<8x120xf32> to vector<8x40xf32>
    %92 = arith.addf %90, %91 : vector<8x40xf32>
    %93 = arith.negf %92 : vector<8x40xf32>
    %94 = math.exp %93 : vector<8x40xf32>
    %cst_44 = arith.constant 1.000000e+00 : f32
    %95 = vector.broadcast %cst_44 : f32 to vector<8x40xf32>
    %96 = arith.addf %95, %94 : vector<8x40xf32>
    %97 = arith.divf %95, %96 : vector<8x40xf32>
    %98 = vector.extract_strided_slice %87 {offsets = [0, 40], sizes = [8, 40], strides = [1, 1]} : vector<8x120xf32> to vector<8x40xf32>
    %99 = vector.extract_strided_slice %89 {offsets = [0, 40], sizes = [8, 40], strides = [1, 1]} : vector<8x120xf32> to vector<8x40xf32>
    %100 = arith.addf %98, %99 : vector<8x40xf32>
    %101 = arith.negf %100 : vector<8x40xf32>
    %102 = math.exp %101 : vector<8x40xf32>
    %cst_45 = arith.constant 1.000000e+00 : f32
    %103 = vector.broadcast %cst_45 : f32 to vector<8x40xf32>
    %104 = arith.addf %103, %102 : vector<8x40xf32>
    %105 = arith.divf %103, %104 : vector<8x40xf32>
    %106 = vector.extract_strided_slice %87 {offsets = [0, 80], sizes = [8, 40], strides = [1, 1]} : vector<8x120xf32> to vector<8x40xf32>
    %107 = vector.extract_strided_slice %89 {offsets = [0, 80], sizes = [8, 40], strides = [1, 1]} : vector<8x120xf32> to vector<8x40xf32>
    %c0_46 = arith.constant 0 : index
    %c0_47 = arith.constant 0 : index
    %108 = vector.load %arg4[%c0_46, %c0_47] : memref<1x40xf32, #tpu.memory_space<vmem>>, vector<1x40xf32>
    %109 = vector.broadcast %108 : vector<1x40xf32> to vector<8x40xf32>
    %110 = arith.addf %107, %109 : vector<8x40xf32>
    %111 = arith.mulf %97, %110 : vector<8x40xf32>
    %112 = arith.addf %106, %111 : vector<8x40xf32>
    %113 = math.tanh %112 : vector<8x40xf32>
    %cst_48 = arith.constant 1.000000e+00 : f32
    %114 = vector.broadcast %cst_48 : f32 to vector<8x40xf32>
    %115 = arith.subf %114, %105 : vector<8x40xf32>
    %116 = arith.mulf %115, %113 : vector<8x40xf32>
    %117 = arith.mulf %105, %83 : vector<8x40xf32>
    %118 = arith.addf %116, %117 : vector<8x40xf32>
    %c0_49 = arith.constant 0 : index
    %c0_50 = arith.constant 0 : index
    %119 = vector.load %arg9[%c0_49, %c0_50] : memref<8x40xf32, #tpu.memory_space<vmem>>, vector<8x40xf32>
    tpu.vector_store %arg9[%c0_49, %c0_50], %118 {strides = array<i32>} : memref<8x40xf32, #tpu.memory_space<vmem>>, vector<8x40xf32>,
    %c3_i32 = arith.constant 3 : i32
    %c0_51 = arith.constant 0 : index
    %c0_52 = arith.constant 0 : index
    %120 = vector.load %arg9[%c0_51, %c0_52] : memref<8x40xf32, #tpu.memory_space<vmem>>, vector<8x40xf32>
    %c8_i32_53 = arith.constant 8 : i32
    %121 = arith.muli %c3_i32, %c8_i32_53 : i32
    %122 = tpu.assume_multiple %121, 8 : i32
    %123 = arith.index_cast %122 : i32 to index
    %c0_54 = arith.constant 0 : index
    %124 = vector.load %arg8[%123, %c0_54] : memref<96x120xf32, #tpu.memory_space<vmem>>, vector<8x120xf32>
    %c0_55 = arith.constant 0 : index
    %c0_56 = arith.constant 0 : index
    %125 = vector.load %arg2[%c0_55, %c0_56] : memref<40x120xf32, #tpu.memory_space<vmem>>, vector<40x120xf32>
    %cst_57 = arith.constant dense<0.000000e+00> : vector<8x120xf32>
    %126 = tpu.matmul %120, %125, %cst_57 {dimension_numbers = #tpu.dot_dimension_numbers<[1], [0], [0], [1], [0, 0, 1, 1], [], []>, precision = #tpu.contract_precision<fp32>} : vector<8x40xf32>, vector<40x120xf32>, vector<8x120xf32> -> vector<8x120xf32>
    %127 = vector.extract_strided_slice %124 {offsets = [0, 0], sizes = [8, 40], strides = [1, 1]} : vector<8x120xf32> to vector<8x40xf32>
    %128 = vector.extract_strided_slice %126 {offsets = [0, 0], sizes = [8, 40], strides = [1, 1]} : vector<8x120xf32> to vector<8x40xf32>
    %129 = arith.addf %127, %128 : vector<8x40xf32>
    %130 = arith.negf %129 : vector<8x40xf32>
    %131 = math.exp %130 : vector<8x40xf32>
    %cst_58 = arith.constant 1.000000e+00 : f32
    %132 = vector.broadcast %cst_58 : f32 to vector<8x40xf32>
    %133 = arith.addf %132, %131 : vector<8x40xf32>
    %134 = arith.divf %132, %133 : vector<8x40xf32>
    %135 = vector.extract_strided_slice %124 {offsets = [0, 40], sizes = [8, 40], strides = [1, 1]} : vector<8x120xf32> to vector<8x40xf32>
    %136 = vector.extract_strided_slice %126 {offsets = [0, 40], sizes = [8, 40], strides = [1, 1]} : vector<8x120xf32> to vector<8x40xf32>
    %137 = arith.addf %135, %136 : vector<8x40xf32>
    %138 = arith.negf %137 : vector<8x40xf32>
    %139 = math.exp %138 : vector<8x40xf32>
    %cst_59 = arith.constant 1.000000e+00 : f32
    %140 = vector.broadcast %cst_59 : f32 to vector<8x40xf32>
    %141 = arith.addf %140, %139 : vector<8x40xf32>
    %142 = arith.divf %140, %141 : vector<8x40xf32>
    %143 = vector.extract_strided_slice %124 {offsets = [0, 80], sizes = [8, 40], strides = [1, 1]} : vector<8x120xf32> to vector<8x40xf32>
    %144 = vector.extract_strided_slice %126 {offsets = [0, 80], sizes = [8, 40], strides = [1, 1]} : vector<8x120xf32> to vector<8x40xf32>
    %c0_60 = arith.constant 0 : index
    %c0_61 = arith.constant 0 : index
    %145 = vector.load %arg4[%c0_60, %c0_61] : memref<1x40xf32, #tpu.memory_space<vmem>>, vector<1x40xf32>
    %146 = vector.broadcast %145 : vector<1x40xf32> to vector<8x40xf32>
    %147 = arith.addf %144, %146 : vector<8x40xf32>
    %148 = arith.mulf %134, %147 : vector<8x40xf32>
    %149 = arith.addf %143, %148 : vector<8x40xf32>
    %150 = math.tanh %149 : vector<8x40xf32>
    %cst_62 = arith.constant 1.000000e+00 : f32
    %151 = vector.broadcast %cst_62 : f32 to vector<8x40xf32>
    %152 = arith.subf %151, %142 : vector<8x40xf32>
    %153 = arith.mulf %152, %150 : vector<8x40xf32>
    %154 = arith.mulf %142, %120 : vector<8x40xf32>
    %155 = arith.addf %153, %154 : vector<8x40xf32>
    %c0_63 = arith.constant 0 : index
    %c0_64 = arith.constant 0 : index
    %156 = vector.load %arg9[%c0_63, %c0_64] : memref<8x40xf32, #tpu.memory_space<vmem>>, vector<8x40xf32>
    tpu.vector_store %arg9[%c0_63, %c0_64], %155 {strides = array<i32>} : memref<8x40xf32, #tpu.memory_space<vmem>>, vector<8x40xf32>,
    %c4_i32 = arith.constant 4 : i32
    %c0_65 = arith.constant 0 : index
    %c0_66 = arith.constant 0 : index
    %157 = vector.load %arg9[%c0_65, %c0_66] : memref<8x40xf32, #tpu.memory_space<vmem>>, vector<8x40xf32>
    %c8_i32_67 = arith.constant 8 : i32
    %158 = arith.muli %c4_i32, %c8_i32_67 : i32
    %159 = tpu.assume_multiple %158, 8 : i32
    %160 = arith.index_cast %159 : i32 to index
    %c0_68 = arith.constant 0 : index
    %161 = vector.load %arg8[%160, %c0_68] : memref<96x120xf32, #tpu.memory_space<vmem>>, vector<8x120xf32>
    %c0_69 = arith.constant 0 : index
    %c0_70 = arith.constant 0 : index
    %162 = vector.load %arg2[%c0_69, %c0_70] : memref<40x120xf32, #tpu.memory_space<vmem>>, vector<40x120xf32>
    %cst_71 = arith.constant dense<0.000000e+00> : vector<8x120xf32>
    %163 = tpu.matmul %157, %162, %cst_71 {dimension_numbers = #tpu.dot_dimension_numbers<[1], [0], [0], [1], [0, 0, 1, 1], [], []>, precision = #tpu.contract_precision<fp32>} : vector<8x40xf32>, vector<40x120xf32>, vector<8x120xf32> -> vector<8x120xf32>
    %164 = vector.extract_strided_slice %161 {offsets = [0, 0], sizes = [8, 40], strides = [1, 1]} : vector<8x120xf32> to vector<8x40xf32>
    %165 = vector.extract_strided_slice %163 {offsets = [0, 0], sizes = [8, 40], strides = [1, 1]} : vector<8x120xf32> to vector<8x40xf32>
    %166 = arith.addf %164, %165 : vector<8x40xf32>
    %167 = arith.negf %166 : vector<8x40xf32>
    %168 = math.exp %167 : vector<8x40xf32>
    %cst_72 = arith.constant 1.000000e+00 : f32
    %169 = vector.broadcast %cst_72 : f32 to vector<8x40xf32>
    %170 = arith.addf %169, %168 : vector<8x40xf32>
    %171 = arith.divf %169, %170 : vector<8x40xf32>
    %172 = vector.extract_strided_slice %161 {offsets = [0, 40], sizes = [8, 40], strides = [1, 1]} : vector<8x120xf32> to vector<8x40xf32>
    %173 = vector.extract_strided_slice %163 {offsets = [0, 40], sizes = [8, 40], strides = [1, 1]} : vector<8x120xf32> to vector<8x40xf32>
    %174 = arith.addf %172, %173 : vector<8x40xf32>
    %175 = arith.negf %174 : vector<8x40xf32>
    %176 = math.exp %175 : vector<8x40xf32>
    %cst_73 = arith.constant 1.000000e+00 : f32
    %177 = vector.broadcast %cst_73 : f32 to vector<8x40xf32>
    %178 = arith.addf %177, %176 : vector<8x40xf32>
    %179 = arith.divf %177, %178 : vector<8x40xf32>
    %180 = vector.extract_strided_slice %161 {offsets = [0, 80], sizes = [8, 40], strides = [1, 1]} : vector<8x120xf32> to vector<8x40xf32>
    %181 = vector.extract_strided_slice %163 {offsets = [0, 80], sizes = [8, 40], strides = [1, 1]} : vector<8x120xf32> to vector<8x40xf32>
    %c0_74 = arith.constant 0 : index
    %c0_75 = arith.constant 0 : index
    %182 = vector.load %arg4[%c0_74, %c0_75] : memref<1x40xf32, #tpu.memory_space<vmem>>, vector<1x40xf32>
    %183 = vector.broadcast %182 : vector<1x40xf32> to vector<8x40xf32>
    %184 = arith.addf %181, %183 : vector<8x40xf32>
    %185 = arith.mulf %171, %184 : vector<8x40xf32>
    %186 = arith.addf %180, %185 : vector<8x40xf32>
    %187 = math.tanh %186 : vector<8x40xf32>
    %cst_76 = arith.constant 1.000000e+00 : f32
    %188 = vector.broadcast %cst_76 : f32 to vector<8x40xf32>
    %189 = arith.subf %188, %179 : vector<8x40xf32>
    %190 = arith.mulf %189, %187 : vector<8x40xf32>
    %191 = arith.mulf %179, %157 : vector<8x40xf32>
    %192 = arith.addf %190, %191 : vector<8x40xf32>
    %c0_77 = arith.constant 0 : index
    %c0_78 = arith.constant 0 : index
    %193 = vector.load %arg9[%c0_77, %c0_78] : memref<8x40xf32, #tpu.memory_space<vmem>>, vector<8x40xf32>
    tpu.vector_store %arg9[%c0_77, %c0_78], %192 {strides = array<i32>} : memref<8x40xf32, #tpu.memory_space<vmem>>, vector<8x40xf32>,
    %c5_i32 = arith.constant 5 : i32
    %c0_79 = arith.constant 0 : index
    %c0_80 = arith.constant 0 : index
    %194 = vector.load %arg9[%c0_79, %c0_80] : memref<8x40xf32, #tpu.memory_space<vmem>>, vector<8x40xf32>
    %c8_i32_81 = arith.constant 8 : i32
    %195 = arith.muli %c5_i32, %c8_i32_81 : i32
    %196 = tpu.assume_multiple %195, 8 : i32
    %197 = arith.index_cast %196 : i32 to index
    %c0_82 = arith.constant 0 : index
    %198 = vector.load %arg8[%197, %c0_82] : memref<96x120xf32, #tpu.memory_space<vmem>>, vector<8x120xf32>
    %c0_83 = arith.constant 0 : index
    %c0_84 = arith.constant 0 : index
    %199 = vector.load %arg2[%c0_83, %c0_84] : memref<40x120xf32, #tpu.memory_space<vmem>>, vector<40x120xf32>
    %cst_85 = arith.constant dense<0.000000e+00> : vector<8x120xf32>
    %200 = tpu.matmul %194, %199, %cst_85 {dimension_numbers = #tpu.dot_dimension_numbers<[1], [0], [0], [1], [0, 0, 1, 1], [], []>, precision = #tpu.contract_precision<fp32>} : vector<8x40xf32>, vector<40x120xf32>, vector<8x120xf32> -> vector<8x120xf32>
    %201 = vector.extract_strided_slice %198 {offsets = [0, 0], sizes = [8, 40], strides = [1, 1]} : vector<8x120xf32> to vector<8x40xf32>
    %202 = vector.extract_strided_slice %200 {offsets = [0, 0], sizes = [8, 40], strides = [1, 1]} : vector<8x120xf32> to vector<8x40xf32>
    %203 = arith.addf %201, %202 : vector<8x40xf32>
    %204 = arith.negf %203 : vector<8x40xf32>
    %205 = math.exp %204 : vector<8x40xf32>
    %cst_86 = arith.constant 1.000000e+00 : f32
    %206 = vector.broadcast %cst_86 : f32 to vector<8x40xf32>
    %207 = arith.addf %206, %205 : vector<8x40xf32>
    %208 = arith.divf %206, %207 : vector<8x40xf32>
    %209 = vector.extract_strided_slice %198 {offsets = [0, 40], sizes = [8, 40], strides = [1, 1]} : vector<8x120xf32> to vector<8x40xf32>
    %210 = vector.extract_strided_slice %200 {offsets = [0, 40], sizes = [8, 40], strides = [1, 1]} : vector<8x120xf32> to vector<8x40xf32>
    %211 = arith.addf %209, %210 : vector<8x40xf32>
    %212 = arith.negf %211 : vector<8x40xf32>
    %213 = math.exp %212 : vector<8x40xf32>
    %cst_87 = arith.constant 1.000000e+00 : f32
    %214 = vector.broadcast %cst_87 : f32 to vector<8x40xf32>
    %215 = arith.addf %214, %213 : vector<8x40xf32>
    %216 = arith.divf %214, %215 : vector<8x40xf32>
    %217 = vector.extract_strided_slice %198 {offsets = [0, 80], sizes = [8, 40], strides = [1, 1]} : vector<8x120xf32> to vector<8x40xf32>
    %218 = vector.extract_strided_slice %200 {offsets = [0, 80], sizes = [8, 40], strides = [1, 1]} : vector<8x120xf32> to vector<8x40xf32>
    %c0_88 = arith.constant 0 : index
    %c0_89 = arith.constant 0 : index
    %219 = vector.load %arg4[%c0_88, %c0_89] : memref<1x40xf32, #tpu.memory_space<vmem>>, vector<1x40xf32>
    %220 = vector.broadcast %219 : vector<1x40xf32> to vector<8x40xf32>
    %221 = arith.addf %218, %220 : vector<8x40xf32>
    %222 = arith.mulf %208, %221 : vector<8x40xf32>
    %223 = arith.addf %217, %222 : vector<8x40xf32>
    %224 = math.tanh %223 : vector<8x40xf32>
    %cst_90 = arith.constant 1.000000e+00 : f32
    %225 = vector.broadcast %cst_90 : f32 to vector<8x40xf32>
    %226 = arith.subf %225, %216 : vector<8x40xf32>
    %227 = arith.mulf %226, %224 : vector<8x40xf32>
    %228 = arith.mulf %216, %194 : vector<8x40xf32>
    %229 = arith.addf %227, %228 : vector<8x40xf32>
    %c0_91 = arith.constant 0 : index
    %c0_92 = arith.constant 0 : index
    %230 = vector.load %arg9[%c0_91, %c0_92] : memref<8x40xf32, #tpu.memory_space<vmem>>, vector<8x40xf32>
    tpu.vector_store %arg9[%c0_91, %c0_92], %229 {strides = array<i32>} : memref<8x40xf32, #tpu.memory_space<vmem>>, vector<8x40xf32>,
    %c6_i32 = arith.constant 6 : i32
    %c0_93 = arith.constant 0 : index
    %c0_94 = arith.constant 0 : index
    %231 = vector.load %arg9[%c0_93, %c0_94] : memref<8x40xf32, #tpu.memory_space<vmem>>, vector<8x40xf32>
    %c8_i32_95 = arith.constant 8 : i32
    %232 = arith.muli %c6_i32, %c8_i32_95 : i32
    %233 = tpu.assume_multiple %232, 8 : i32
    %234 = arith.index_cast %233 : i32 to index
    %c0_96 = arith.constant 0 : index
    %235 = vector.load %arg8[%234, %c0_96] : memref<96x120xf32, #tpu.memory_space<vmem>>, vector<8x120xf32>
    %c0_97 = arith.constant 0 : index
    %c0_98 = arith.constant 0 : index
    %236 = vector.load %arg2[%c0_97, %c0_98] : memref<40x120xf32, #tpu.memory_space<vmem>>, vector<40x120xf32>
    %cst_99 = arith.constant dense<0.000000e+00> : vector<8x120xf32>
    %237 = tpu.matmul %231, %236, %cst_99 {dimension_numbers = #tpu.dot_dimension_numbers<[1], [0], [0], [1], [0, 0, 1, 1], [], []>, precision = #tpu.contract_precision<fp32>} : vector<8x40xf32>, vector<40x120xf32>, vector<8x120xf32> -> vector<8x120xf32>
    %238 = vector.extract_strided_slice %235 {offsets = [0, 0], sizes = [8, 40], strides = [1, 1]} : vector<8x120xf32> to vector<8x40xf32>
    %239 = vector.extract_strided_slice %237 {offsets = [0, 0], sizes = [8, 40], strides = [1, 1]} : vector<8x120xf32> to vector<8x40xf32>
    %240 = arith.addf %238, %239 : vector<8x40xf32>
    %241 = arith.negf %240 : vector<8x40xf32>
    %242 = math.exp %241 : vector<8x40xf32>
    %cst_100 = arith.constant 1.000000e+00 : f32
    %243 = vector.broadcast %cst_100 : f32 to vector<8x40xf32>
    %244 = arith.addf %243, %242 : vector<8x40xf32>
    %245 = arith.divf %243, %244 : vector<8x40xf32>
    %246 = vector.extract_strided_slice %235 {offsets = [0, 40], sizes = [8, 40], strides = [1, 1]} : vector<8x120xf32> to vector<8x40xf32>
    %247 = vector.extract_strided_slice %237 {offsets = [0, 40], sizes = [8, 40], strides = [1, 1]} : vector<8x120xf32> to vector<8x40xf32>
    %248 = arith.addf %246, %247 : vector<8x40xf32>
    %249 = arith.negf %248 : vector<8x40xf32>
    %250 = math.exp %249 : vector<8x40xf32>
    %cst_101 = arith.constant 1.000000e+00 : f32
    %251 = vector.broadcast %cst_101 : f32 to vector<8x40xf32>
    %252 = arith.addf %251, %250 : vector<8x40xf32>
    %253 = arith.divf %251, %252 : vector<8x40xf32>
    %254 = vector.extract_strided_slice %235 {offsets = [0, 80], sizes = [8, 40], strides = [1, 1]} : vector<8x120xf32> to vector<8x40xf32>
    %255 = vector.extract_strided_slice %237 {offsets = [0, 80], sizes = [8, 40], strides = [1, 1]} : vector<8x120xf32> to vector<8x40xf32>
    %c0_102 = arith.constant 0 : index
    %c0_103 = arith.constant 0 : index
    %256 = vector.load %arg4[%c0_102, %c0_103] : memref<1x40xf32, #tpu.memory_space<vmem>>, vector<1x40xf32>
    %257 = vector.broadcast %256 : vector<1x40xf32> to vector<8x40xf32>
    %258 = arith.addf %255, %257 : vector<8x40xf32>
    %259 = arith.mulf %245, %258 : vector<8x40xf32>
    %260 = arith.addf %254, %259 : vector<8x40xf32>
    %261 = math.tanh %260 : vector<8x40xf32>
    %cst_104 = arith.constant 1.000000e+00 : f32
    %262 = vector.broadcast %cst_104 : f32 to vector<8x40xf32>
    %263 = arith.subf %262, %253 : vector<8x40xf32>
    %264 = arith.mulf %263, %261 : vector<8x40xf32>
    %265 = arith.mulf %253, %231 : vector<8x40xf32>
    %266 = arith.addf %264, %265 : vector<8x40xf32>
    %c0_105 = arith.constant 0 : index
    %c0_106 = arith.constant 0 : index
    %267 = vector.load %arg9[%c0_105, %c0_106] : memref<8x40xf32, #tpu.memory_space<vmem>>, vector<8x40xf32>
    tpu.vector_store %arg9[%c0_105, %c0_106], %266 {strides = array<i32>} : memref<8x40xf32, #tpu.memory_space<vmem>>, vector<8x40xf32>,
    %c7_i32 = arith.constant 7 : i32
    %c0_107 = arith.constant 0 : index
    %c0_108 = arith.constant 0 : index
    %268 = vector.load %arg9[%c0_107, %c0_108] : memref<8x40xf32, #tpu.memory_space<vmem>>, vector<8x40xf32>
    %c8_i32_109 = arith.constant 8 : i32
    %269 = arith.muli %c7_i32, %c8_i32_109 : i32
    %270 = tpu.assume_multiple %269, 8 : i32
    %271 = arith.index_cast %270 : i32 to index
    %c0_110 = arith.constant 0 : index
    %272 = vector.load %arg8[%271, %c0_110] : memref<96x120xf32, #tpu.memory_space<vmem>>, vector<8x120xf32>
    %c0_111 = arith.constant 0 : index
    %c0_112 = arith.constant 0 : index
    %273 = vector.load %arg2[%c0_111, %c0_112] : memref<40x120xf32, #tpu.memory_space<vmem>>, vector<40x120xf32>
    %cst_113 = arith.constant dense<0.000000e+00> : vector<8x120xf32>
    %274 = tpu.matmul %268, %273, %cst_113 {dimension_numbers = #tpu.dot_dimension_numbers<[1], [0], [0], [1], [0, 0, 1, 1], [], []>, precision = #tpu.contract_precision<fp32>} : vector<8x40xf32>, vector<40x120xf32>, vector<8x120xf32> -> vector<8x120xf32>
    %275 = vector.extract_strided_slice %272 {offsets = [0, 0], sizes = [8, 40], strides = [1, 1]} : vector<8x120xf32> to vector<8x40xf32>
    %276 = vector.extract_strided_slice %274 {offsets = [0, 0], sizes = [8, 40], strides = [1, 1]} : vector<8x120xf32> to vector<8x40xf32>
    %277 = arith.addf %275, %276 : vector<8x40xf32>
    %278 = arith.negf %277 : vector<8x40xf32>
    %279 = math.exp %278 : vector<8x40xf32>
    %cst_114 = arith.constant 1.000000e+00 : f32
    %280 = vector.broadcast %cst_114 : f32 to vector<8x40xf32>
    %281 = arith.addf %280, %279 : vector<8x40xf32>
    %282 = arith.divf %280, %281 : vector<8x40xf32>
    %283 = vector.extract_strided_slice %272 {offsets = [0, 40], sizes = [8, 40], strides = [1, 1]} : vector<8x120xf32> to vector<8x40xf32>
    %284 = vector.extract_strided_slice %274 {offsets = [0, 40], sizes = [8, 40], strides = [1, 1]} : vector<8x120xf32> to vector<8x40xf32>
    %285 = arith.addf %283, %284 : vector<8x40xf32>
    %286 = arith.negf %285 : vector<8x40xf32>
    %287 = math.exp %286 : vector<8x40xf32>
    %cst_115 = arith.constant 1.000000e+00 : f32
    %288 = vector.broadcast %cst_115 : f32 to vector<8x40xf32>
    %289 = arith.addf %288, %287 : vector<8x40xf32>
    %290 = arith.divf %288, %289 : vector<8x40xf32>
    %291 = vector.extract_strided_slice %272 {offsets = [0, 80], sizes = [8, 40], strides = [1, 1]} : vector<8x120xf32> to vector<8x40xf32>
    %292 = vector.extract_strided_slice %274 {offsets = [0, 80], sizes = [8, 40], strides = [1, 1]} : vector<8x120xf32> to vector<8x40xf32>
    %c0_116 = arith.constant 0 : index
    %c0_117 = arith.constant 0 : index
    %293 = vector.load %arg4[%c0_116, %c0_117] : memref<1x40xf32, #tpu.memory_space<vmem>>, vector<1x40xf32>
    %294 = vector.broadcast %293 : vector<1x40xf32> to vector<8x40xf32>
    %295 = arith.addf %292, %294 : vector<8x40xf32>
    %296 = arith.mulf %282, %295 : vector<8x40xf32>
    %297 = arith.addf %291, %296 : vector<8x40xf32>
    %298 = math.tanh %297 : vector<8x40xf32>
    %cst_118 = arith.constant 1.000000e+00 : f32
    %299 = vector.broadcast %cst_118 : f32 to vector<8x40xf32>
    %300 = arith.subf %299, %290 : vector<8x40xf32>
    %301 = arith.mulf %300, %298 : vector<8x40xf32>
    %302 = arith.mulf %290, %268 : vector<8x40xf32>
    %303 = arith.addf %301, %302 : vector<8x40xf32>
    %c0_119 = arith.constant 0 : index
    %c0_120 = arith.constant 0 : index
    %304 = vector.load %arg9[%c0_119, %c0_120] : memref<8x40xf32, #tpu.memory_space<vmem>>, vector<8x40xf32>
    tpu.vector_store %arg9[%c0_119, %c0_120], %303 {strides = array<i32>} : memref<8x40xf32, #tpu.memory_space<vmem>>, vector<8x40xf32>,
    %c8_i32_121 = arith.constant 8 : i32
    %c0_122 = arith.constant 0 : index
    %c0_123 = arith.constant 0 : index
    %305 = vector.load %arg9[%c0_122, %c0_123] : memref<8x40xf32, #tpu.memory_space<vmem>>, vector<8x40xf32>
    %c8_i32_124 = arith.constant 8 : i32
    %306 = arith.muli %c8_i32_121, %c8_i32_124 : i32
    %307 = tpu.assume_multiple %306, 8 : i32
    %308 = arith.index_cast %307 : i32 to index
    %c0_125 = arith.constant 0 : index
    %309 = vector.load %arg8[%308, %c0_125] : memref<96x120xf32, #tpu.memory_space<vmem>>, vector<8x120xf32>
    %c0_126 = arith.constant 0 : index
    %c0_127 = arith.constant 0 : index
    %310 = vector.load %arg2[%c0_126, %c0_127] : memref<40x120xf32, #tpu.memory_space<vmem>>, vector<40x120xf32>
    %cst_128 = arith.constant dense<0.000000e+00> : vector<8x120xf32>
    %311 = tpu.matmul %305, %310, %cst_128 {dimension_numbers = #tpu.dot_dimension_numbers<[1], [0], [0], [1], [0, 0, 1, 1], [], []>, precision = #tpu.contract_precision<fp32>} : vector<8x40xf32>, vector<40x120xf32>, vector<8x120xf32> -> vector<8x120xf32>
    %312 = vector.extract_strided_slice %309 {offsets = [0, 0], sizes = [8, 40], strides = [1, 1]} : vector<8x120xf32> to vector<8x40xf32>
    %313 = vector.extract_strided_slice %311 {offsets = [0, 0], sizes = [8, 40], strides = [1, 1]} : vector<8x120xf32> to vector<8x40xf32>
    %314 = arith.addf %312, %313 : vector<8x40xf32>
    %315 = arith.negf %314 : vector<8x40xf32>
    %316 = math.exp %315 : vector<8x40xf32>
    %cst_129 = arith.constant 1.000000e+00 : f32
    %317 = vector.broadcast %cst_129 : f32 to vector<8x40xf32>
    %318 = arith.addf %317, %316 : vector<8x40xf32>
    %319 = arith.divf %317, %318 : vector<8x40xf32>
    %320 = vector.extract_strided_slice %309 {offsets = [0, 40], sizes = [8, 40], strides = [1, 1]} : vector<8x120xf32> to vector<8x40xf32>
    %321 = vector.extract_strided_slice %311 {offsets = [0, 40], sizes = [8, 40], strides = [1, 1]} : vector<8x120xf32> to vector<8x40xf32>
    %322 = arith.addf %320, %321 : vector<8x40xf32>
    %323 = arith.negf %322 : vector<8x40xf32>
    %324 = math.exp %323 : vector<8x40xf32>
    %cst_130 = arith.constant 1.000000e+00 : f32
    %325 = vector.broadcast %cst_130 : f32 to vector<8x40xf32>
    %326 = arith.addf %325, %324 : vector<8x40xf32>
    %327 = arith.divf %325, %326 : vector<8x40xf32>
    %328 = vector.extract_strided_slice %309 {offsets = [0, 80], sizes = [8, 40], strides = [1, 1]} : vector<8x120xf32> to vector<8x40xf32>
    %329 = vector.extract_strided_slice %311 {offsets = [0, 80], sizes = [8, 40], strides = [1, 1]} : vector<8x120xf32> to vector<8x40xf32>
    %c0_131 = arith.constant 0 : index
    %c0_132 = arith.constant 0 : index
    %330 = vector.load %arg4[%c0_131, %c0_132] : memref<1x40xf32, #tpu.memory_space<vmem>>, vector<1x40xf32>
    %331 = vector.broadcast %330 : vector<1x40xf32> to vector<8x40xf32>
    %332 = arith.addf %329, %331 : vector<8x40xf32>
    %333 = arith.mulf %319, %332 : vector<8x40xf32>
    %334 = arith.addf %328, %333 : vector<8x40xf32>
    %335 = math.tanh %334 : vector<8x40xf32>
    %cst_133 = arith.constant 1.000000e+00 : f32
    %336 = vector.broadcast %cst_133 : f32 to vector<8x40xf32>
    %337 = arith.subf %336, %327 : vector<8x40xf32>
    %338 = arith.mulf %337, %335 : vector<8x40xf32>
    %339 = arith.mulf %327, %305 : vector<8x40xf32>
    %340 = arith.addf %338, %339 : vector<8x40xf32>
    %c0_134 = arith.constant 0 : index
    %c0_135 = arith.constant 0 : index
    %341 = vector.load %arg9[%c0_134, %c0_135] : memref<8x40xf32, #tpu.memory_space<vmem>>, vector<8x40xf32>
    tpu.vector_store %arg9[%c0_134, %c0_135], %340 {strides = array<i32>} : memref<8x40xf32, #tpu.memory_space<vmem>>, vector<8x40xf32>,
    %c9_i32 = arith.constant 9 : i32
    %c0_136 = arith.constant 0 : index
    %c0_137 = arith.constant 0 : index
    %342 = vector.load %arg9[%c0_136, %c0_137] : memref<8x40xf32, #tpu.memory_space<vmem>>, vector<8x40xf32>
    %c8_i32_138 = arith.constant 8 : i32
    %343 = arith.muli %c9_i32, %c8_i32_138 : i32
    %344 = tpu.assume_multiple %343, 8 : i32
    %345 = arith.index_cast %344 : i32 to index
    %c0_139 = arith.constant 0 : index
    %346 = vector.load %arg8[%345, %c0_139] : memref<96x120xf32, #tpu.memory_space<vmem>>, vector<8x120xf32>
    %c0_140 = arith.constant 0 : index
    %c0_141 = arith.constant 0 : index
    %347 = vector.load %arg2[%c0_140, %c0_141] : memref<40x120xf32, #tpu.memory_space<vmem>>, vector<40x120xf32>
    %cst_142 = arith.constant dense<0.000000e+00> : vector<8x120xf32>
    %348 = tpu.matmul %342, %347, %cst_142 {dimension_numbers = #tpu.dot_dimension_numbers<[1], [0], [0], [1], [0, 0, 1, 1], [], []>, precision = #tpu.contract_precision<fp32>} : vector<8x40xf32>, vector<40x120xf32>, vector<8x120xf32> -> vector<8x120xf32>
    %349 = vector.extract_strided_slice %346 {offsets = [0, 0], sizes = [8, 40], strides = [1, 1]} : vector<8x120xf32> to vector<8x40xf32>
    %350 = vector.extract_strided_slice %348 {offsets = [0, 0], sizes = [8, 40], strides = [1, 1]} : vector<8x120xf32> to vector<8x40xf32>
    %351 = arith.addf %349, %350 : vector<8x40xf32>
    %352 = arith.negf %351 : vector<8x40xf32>
    %353 = math.exp %352 : vector<8x40xf32>
    %cst_143 = arith.constant 1.000000e+00 : f32
    %354 = vector.broadcast %cst_143 : f32 to vector<8x40xf32>
    %355 = arith.addf %354, %353 : vector<8x40xf32>
    %356 = arith.divf %354, %355 : vector<8x40xf32>
    %357 = vector.extract_strided_slice %346 {offsets = [0, 40], sizes = [8, 40], strides = [1, 1]} : vector<8x120xf32> to vector<8x40xf32>
    %358 = vector.extract_strided_slice %348 {offsets = [0, 40], sizes = [8, 40], strides = [1, 1]} : vector<8x120xf32> to vector<8x40xf32>
    %359 = arith.addf %357, %358 : vector<8x40xf32>
    %360 = arith.negf %359 : vector<8x40xf32>
    %361 = math.exp %360 : vector<8x40xf32>
    %cst_144 = arith.constant 1.000000e+00 : f32
    %362 = vector.broadcast %cst_144 : f32 to vector<8x40xf32>
    %363 = arith.addf %362, %361 : vector<8x40xf32>
    %364 = arith.divf %362, %363 : vector<8x40xf32>
    %365 = vector.extract_strided_slice %346 {offsets = [0, 80], sizes = [8, 40], strides = [1, 1]} : vector<8x120xf32> to vector<8x40xf32>
    %366 = vector.extract_strided_slice %348 {offsets = [0, 80], sizes = [8, 40], strides = [1, 1]} : vector<8x120xf32> to vector<8x40xf32>
    %c0_145 = arith.constant 0 : index
    %c0_146 = arith.constant 0 : index
    %367 = vector.load %arg4[%c0_145, %c0_146] : memref<1x40xf32, #tpu.memory_space<vmem>>, vector<1x40xf32>
    %368 = vector.broadcast %367 : vector<1x40xf32> to vector<8x40xf32>
    %369 = arith.addf %366, %368 : vector<8x40xf32>
    %370 = arith.mulf %356, %369 : vector<8x40xf32>
    %371 = arith.addf %365, %370 : vector<8x40xf32>
    %372 = math.tanh %371 : vector<8x40xf32>
    %cst_147 = arith.constant 1.000000e+00 : f32
    %373 = vector.broadcast %cst_147 : f32 to vector<8x40xf32>
    %374 = arith.subf %373, %364 : vector<8x40xf32>
    %375 = arith.mulf %374, %372 : vector<8x40xf32>
    %376 = arith.mulf %364, %342 : vector<8x40xf32>
    %377 = arith.addf %375, %376 : vector<8x40xf32>
    %c0_148 = arith.constant 0 : index
    %c0_149 = arith.constant 0 : index
    %378 = vector.load %arg9[%c0_148, %c0_149] : memref<8x40xf32, #tpu.memory_space<vmem>>, vector<8x40xf32>
    tpu.vector_store %arg9[%c0_148, %c0_149], %377 {strides = array<i32>} : memref<8x40xf32, #tpu.memory_space<vmem>>, vector<8x40xf32>,
    %c10_i32 = arith.constant 10 : i32
    %c0_150 = arith.constant 0 : index
    %c0_151 = arith.constant 0 : index
    %379 = vector.load %arg9[%c0_150, %c0_151] : memref<8x40xf32, #tpu.memory_space<vmem>>, vector<8x40xf32>
    %c8_i32_152 = arith.constant 8 : i32
    %380 = arith.muli %c10_i32, %c8_i32_152 : i32
    %381 = tpu.assume_multiple %380, 8 : i32
    %382 = arith.index_cast %381 : i32 to index
    %c0_153 = arith.constant 0 : index
    %383 = vector.load %arg8[%382, %c0_153] : memref<96x120xf32, #tpu.memory_space<vmem>>, vector<8x120xf32>
    %c0_154 = arith.constant 0 : index
    %c0_155 = arith.constant 0 : index
    %384 = vector.load %arg2[%c0_154, %c0_155] : memref<40x120xf32, #tpu.memory_space<vmem>>, vector<40x120xf32>
    %cst_156 = arith.constant dense<0.000000e+00> : vector<8x120xf32>
    %385 = tpu.matmul %379, %384, %cst_156 {dimension_numbers = #tpu.dot_dimension_numbers<[1], [0], [0], [1], [0, 0, 1, 1], [], []>, precision = #tpu.contract_precision<fp32>} : vector<8x40xf32>, vector<40x120xf32>, vector<8x120xf32> -> vector<8x120xf32>
    %386 = vector.extract_strided_slice %383 {offsets = [0, 0], sizes = [8, 40], strides = [1, 1]} : vector<8x120xf32> to vector<8x40xf32>
    %387 = vector.extract_strided_slice %385 {offsets = [0, 0], sizes = [8, 40], strides = [1, 1]} : vector<8x120xf32> to vector<8x40xf32>
    %388 = arith.addf %386, %387 : vector<8x40xf32>
    %389 = arith.negf %388 : vector<8x40xf32>
    %390 = math.exp %389 : vector<8x40xf32>
    %cst_157 = arith.constant 1.000000e+00 : f32
    %391 = vector.broadcast %cst_157 : f32 to vector<8x40xf32>
    %392 = arith.addf %391, %390 : vector<8x40xf32>
    %393 = arith.divf %391, %392 : vector<8x40xf32>
    %394 = vector.extract_strided_slice %383 {offsets = [0, 40], sizes = [8, 40], strides = [1, 1]} : vector<8x120xf32> to vector<8x40xf32>
    %395 = vector.extract_strided_slice %385 {offsets = [0, 40], sizes = [8, 40], strides = [1, 1]} : vector<8x120xf32> to vector<8x40xf32>
    %396 = arith.addf %394, %395 : vector<8x40xf32>
    %397 = arith.negf %396 : vector<8x40xf32>
    %398 = math.exp %397 : vector<8x40xf32>
    %cst_158 = arith.constant 1.000000e+00 : f32
    %399 = vector.broadcast %cst_158 : f32 to vector<8x40xf32>
    %400 = arith.addf %399, %398 : vector<8x40xf32>
    %401 = arith.divf %399, %400 : vector<8x40xf32>
    %402 = vector.extract_strided_slice %383 {offsets = [0, 80], sizes = [8, 40], strides = [1, 1]} : vector<8x120xf32> to vector<8x40xf32>
    %403 = vector.extract_strided_slice %385 {offsets = [0, 80], sizes = [8, 40], strides = [1, 1]} : vector<8x120xf32> to vector<8x40xf32>
    %c0_159 = arith.constant 0 : index
    %c0_160 = arith.constant 0 : index
    %404 = vector.load %arg4[%c0_159, %c0_160] : memref<1x40xf32, #tpu.memory_space<vmem>>, vector<1x40xf32>
    %405 = vector.broadcast %404 : vector<1x40xf32> to vector<8x40xf32>
    %406 = arith.addf %403, %405 : vector<8x40xf32>
    %407 = arith.mulf %393, %406 : vector<8x40xf32>
    %408 = arith.addf %402, %407 : vector<8x40xf32>
    %409 = math.tanh %408 : vector<8x40xf32>
    %cst_161 = arith.constant 1.000000e+00 : f32
    %410 = vector.broadcast %cst_161 : f32 to vector<8x40xf32>
    %411 = arith.subf %410, %401 : vector<8x40xf32>
    %412 = arith.mulf %411, %409 : vector<8x40xf32>
    %413 = arith.mulf %401, %379 : vector<8x40xf32>
    %414 = arith.addf %412, %413 : vector<8x40xf32>
    %c0_162 = arith.constant 0 : index
    %c0_163 = arith.constant 0 : index
    %415 = vector.load %arg9[%c0_162, %c0_163] : memref<8x40xf32, #tpu.memory_space<vmem>>, vector<8x40xf32>
    tpu.vector_store %arg9[%c0_162, %c0_163], %414 {strides = array<i32>} : memref<8x40xf32, #tpu.memory_space<vmem>>, vector<8x40xf32>,
    %c11_i32 = arith.constant 11 : i32
    %c0_164 = arith.constant 0 : index
    %c0_165 = arith.constant 0 : index
    %416 = vector.load %arg9[%c0_164, %c0_165] : memref<8x40xf32, #tpu.memory_space<vmem>>, vector<8x40xf32>
    %c8_i32_166 = arith.constant 8 : i32
    %417 = arith.muli %c11_i32, %c8_i32_166 : i32
    %418 = tpu.assume_multiple %417, 8 : i32
    %419 = arith.index_cast %418 : i32 to index
    %c0_167 = arith.constant 0 : index
    %420 = vector.load %arg8[%419, %c0_167] : memref<96x120xf32, #tpu.memory_space<vmem>>, vector<8x120xf32>
    %c0_168 = arith.constant 0 : index
    %c0_169 = arith.constant 0 : index
    %421 = vector.load %arg2[%c0_168, %c0_169] : memref<40x120xf32, #tpu.memory_space<vmem>>, vector<40x120xf32>
    %cst_170 = arith.constant dense<0.000000e+00> : vector<8x120xf32>
    %422 = tpu.matmul %416, %421, %cst_170 {dimension_numbers = #tpu.dot_dimension_numbers<[1], [0], [0], [1], [0, 0, 1, 1], [], []>, precision = #tpu.contract_precision<fp32>} : vector<8x40xf32>, vector<40x120xf32>, vector<8x120xf32> -> vector<8x120xf32>
    %423 = vector.extract_strided_slice %420 {offsets = [0, 0], sizes = [8, 40], strides = [1, 1]} : vector<8x120xf32> to vector<8x40xf32>
    %424 = vector.extract_strided_slice %422 {offsets = [0, 0], sizes = [8, 40], strides = [1, 1]} : vector<8x120xf32> to vector<8x40xf32>
    %425 = arith.addf %423, %424 : vector<8x40xf32>
    %426 = arith.negf %425 : vector<8x40xf32>
    %427 = math.exp %426 : vector<8x40xf32>
    %cst_171 = arith.constant 1.000000e+00 : f32
    %428 = vector.broadcast %cst_171 : f32 to vector<8x40xf32>
    %429 = arith.addf %428, %427 : vector<8x40xf32>
    %430 = arith.divf %428, %429 : vector<8x40xf32>
    %431 = vector.extract_strided_slice %420 {offsets = [0, 40], sizes = [8, 40], strides = [1, 1]} : vector<8x120xf32> to vector<8x40xf32>
    %432 = vector.extract_strided_slice %422 {offsets = [0, 40], sizes = [8, 40], strides = [1, 1]} : vector<8x120xf32> to vector<8x40xf32>
    %433 = arith.addf %431, %432 : vector<8x40xf32>
    %434 = arith.negf %433 : vector<8x40xf32>
    %435 = math.exp %434 : vector<8x40xf32>
    %cst_172 = arith.constant 1.000000e+00 : f32
    %436 = vector.broadcast %cst_172 : f32 to vector<8x40xf32>
    %437 = arith.addf %436, %435 : vector<8x40xf32>
    %438 = arith.divf %436, %437 : vector<8x40xf32>
    %439 = vector.extract_strided_slice %420 {offsets = [0, 80], sizes = [8, 40], strides = [1, 1]} : vector<8x120xf32> to vector<8x40xf32>
    %440 = vector.extract_strided_slice %422 {offsets = [0, 80], sizes = [8, 40], strides = [1, 1]} : vector<8x120xf32> to vector<8x40xf32>
    %c0_173 = arith.constant 0 : index
    %c0_174 = arith.constant 0 : index
    %441 = vector.load %arg4[%c0_173, %c0_174] : memref<1x40xf32, #tpu.memory_space<vmem>>, vector<1x40xf32>
    %442 = vector.broadcast %441 : vector<1x40xf32> to vector<8x40xf32>
    %443 = arith.addf %440, %442 : vector<8x40xf32>
    %444 = arith.mulf %430, %443 : vector<8x40xf32>
    %445 = arith.addf %439, %444 : vector<8x40xf32>
    %446 = math.tanh %445 : vector<8x40xf32>
    %cst_175 = arith.constant 1.000000e+00 : f32
    %447 = vector.broadcast %cst_175 : f32 to vector<8x40xf32>
    %448 = arith.subf %447, %438 : vector<8x40xf32>
    %449 = arith.mulf %448, %446 : vector<8x40xf32>
    %450 = arith.mulf %438, %416 : vector<8x40xf32>
    %451 = arith.addf %449, %450 : vector<8x40xf32>
    %c0_176 = arith.constant 0 : index
    %c0_177 = arith.constant 0 : index
    %452 = vector.load %arg9[%c0_176, %c0_177] : memref<8x40xf32, #tpu.memory_space<vmem>>, vector<8x40xf32>
    tpu.vector_store %arg9[%c0_176, %c0_177], %451 {strides = array<i32>} : memref<8x40xf32, #tpu.memory_space<vmem>>, vector<8x40xf32>,
    %c12_i32 = arith.constant 12 : i32
    %c0_178 = arith.constant 0 : index
    %c0_179 = arith.constant 0 : index
    %453 = vector.load %arg9[%c0_178, %c0_179] : memref<8x40xf32, #tpu.memory_space<vmem>>, vector<8x40xf32>
    %c0_180 = arith.constant 0 : index
    %c0_181 = arith.constant 0 : index
    %454 = vector.load %arg5[%c0_180, %c0_181] : memref<40x128xf32, #tpu.memory_space<vmem>>, vector<40x128xf32>
    %cst_182 = arith.constant dense<0.000000e+00> : vector<8x128xf32>
    %455 = tpu.matmul %453, %454, %cst_182 {dimension_numbers = #tpu.dot_dimension_numbers<[1], [0], [0], [1], [0, 0, 1, 1], [], []>, precision = #tpu.contract_precision<fp32>} : vector<8x40xf32>, vector<40x128xf32>, vector<8x128xf32> -> vector<8x128xf32>
    %c0_183 = arith.constant 0 : index
    %c0_184 = arith.constant 0 : index
    %456 = vector.load %arg6[%c0_183, %c0_184] : memref<1x128xf32, #tpu.memory_space<vmem>>, vector<1x128xf32>
    %457 = vector.broadcast %456 : vector<1x128xf32> to vector<8x128xf32>
    %458 = arith.addf %455, %457 : vector<8x128xf32>
    %c0_185 = arith.constant 0 : index
    %c0_186 = arith.constant 0 : index
    %459 = vector.load %arg7[%c0_185, %c0_186] : memref<8x128xf32, #tpu.memory_space<vmem>>, vector<8x128xf32>
    tpu.vector_store %arg7[%c0_185, %c0_186], %458 {strides = array<i32>} : memref<8x128xf32, #tpu.memory_space<vmem>>, vector<8x128xf32>,
    return
  }
}

</mosaic_0001>

<bundles_post_ra>
// kernel: tpu_custom_call.1
= control target key start
LH: loop header
LB: loop body
LE: loop exit
PB: predicated region body
PF: predicated region fallthrough
CT: control target
= control target key end

     0   :  { %12 = vsyncpa [#allocation5], 0  ;;  %s12583_s0 = inlined_call_operand.hbm [shape: f32[96,100], index: 0, kind: input, shape index: {}]   ;;  %s12584_s1 = inlined_call_operand.hbm [shape: f32[100,120], index: 1, kind: input, shape index: {}]   ;;  %s12585_s2 = inlined_call_operand.hbm [shape: f32[40,120], index: 2, kind: input, shape index: {}]   ;;  %s12586_s3 = inlined_call_operand.vmem [shape: f32[1,120], index: 3, kind: input, shape index: {}]   ;;  %s12587_s4 = inlined_call_operand.vmem [shape: f32[1,40], index: 4, kind: input, shape index: {}]   ;;  %s12588_s5 = inlined_call_operand.hbm [shape: f32[40,128], index: 5, kind: input, shape index: {}]   ;;  %s12589_s6 = inlined_call_operand.vmem [shape: f32[1,128], index: 6, kind: input, shape index: {}]   ;;  %s12590_s7 = inlined_call_operand.hbm [shape: f32[8,128], index: 7, kind: output, shape index: {}]  }
   0x1   :  { %13 = vsyncpa [#allocation8], 0 }
   0x2   :  { %14 = vsyncpa [#allocation11], 0 }
   0x3   :  { %15 = vsyncpa [#allocation6], 0  ;;  %s10527_s24 = smov [#allocation7]   ;;  %s10528_s26 = smov [#allocation4]  }
   0x4   :  { %s33_s25 = sshll.u32 %s10527_s24, 4  ;;  %s21_s27 = sshll.u32 %s10528_s26, 4  ;;  %s34_s25 = int_to_ptr.vmem [resolvable:$true] %s33_s25  ;;  %s22_s27 = int_to_ptr.vmem [resolvable:$true] %s21_s27 }
   0x5   :  { %s10427_s28 = scalar_lea.vmem %s34_s25, 1664  ;;  %p10432_p1 = scmp.lt.s32.totalorder %s34_s25, %s34_s25 }
   0x6   :  { %p10428_p0 = scmp.ne.s32.totalorder %s34_s25, %s10427_s28  ;;  %p10433_p2 = scmp.lt.s32.totalorder %s10427_s28, %s10427_s28 }
   0x8   :  { %p10434_p3 = por %p10433_p2, %p10432_p1 }
   0xa   :  { %p10435_p4 = pnand %p10434_p3, %p10428_p0 }
   0xc   :  { %10438 = shalt.err (!%p10435_p4)
}
   0xd   :  { %s10529_s29 = smov 128   ;;  %s10530_s30 = smov 8  }
   0xe   :  { %39 = dma.hbm_to_vmem [thread:$0]  %s12584_s1, 1664, %s34_s25, [#allocation8], %s10529_s29, %s10529_s29, %s10530_s30  }
   0xf   :  { %s10447_s10 = scalar_lea.vmem %s22_s27, 1536  ;;  %p10452_p6 = scmp.lt.s32.totalorder %s22_s27, %s22_s27 }
  0x10   :  { %p10448_p5 = scmp.ne.s32.totalorder %s22_s27, %s10447_s10  ;;  %p10453_p7 = scmp.lt.s32.totalorder %s10447_s10, %s10447_s10 }
  0x12   :  { %p10454_p8 = por %p10453_p7, %p10452_p6 }
  0x14   :  { %p10455_p9 = pnand %p10454_p8, %p10448_p5 }
  0x16   :  { %10458 = shalt.err (!%p10455_p9)
}
  0x17   :  { %27 = dma.hbm_to_vmem [thread:$0]  %s12583_s0, 1536, %s22_s27, [#allocation5], %s10529_s29, %s10529_s29, %s10530_s30  }
  0x18   :  { %s10531_s13 = smov [#allocation9]   ;;  %s10532_s15 = smov [#allocation10]  }
  0x19   :  { %s45_s14 = sshll.u32 %s10531_s13, 4  ;;  %s61_s16 = sshll.u32 %s10532_s15, 4  ;;  %s46_s14 = int_to_ptr.vmem [resolvable:$true] %s45_s14  ;;  %s62_s16 = int_to_ptr.vmem [resolvable:$true] %s61_s16 }
  0x1a   :  { %s10467_s1 = scalar_lea.vmem %s46_s14, 640  ;;  %p10472_p11 = scmp.lt.s32.totalorder %s46_s14, %s46_s14 }
  0x1b   :  { %p10468_p10 = scmp.ne.s32.totalorder %s46_s14, %s10467_s1  ;;  %p10473_p12 = scmp.lt.s32.totalorder %s10467_s1, %s10467_s1 }
  0x1d   :  { %p10474_p13 = por %p10473_p12, %p10472_p11 }
  0x1f   :  { %p10475_p0 = pnand %p10474_p13, %p10468_p10 }
  0x21   :  { %10478 = shalt.err (!%p10475_p0)
}
  0x22   :  { %51 = dma.hbm_to_vmem [thread:$0]  %s12585_s2, 640, %s46_s14, [#allocation8], %s10529_s29, %s10529_s29, %s10530_s30  }
  0x23   :  { %s10487_s0 = scalar_lea.vmem %s62_s16, 640  ;;  %p10492_p2 = scmp.lt.s32.totalorder %s62_s16, %s62_s16 }
  0x24   :  { %p10488_p1 = scmp.ne.s32.totalorder %s62_s16, %s10487_s0  ;;  %p10493_p3 = scmp.lt.s32.totalorder %s10487_s0, %s10487_s0 }
  0x26   :  { %p10494_p4 = por %p10493_p3, %p10492_p2 }
  0x28   :  { %p10495_p5 = pnand %p10494_p4, %p10488_p1 }
  0x2a   :  { %10498 = shalt.err (!%p10495_p5)
}
  0x2b   :  { %67 = dma.hbm_to_vmem [thread:$0]  %s12588_s5, 640, %s62_s16, [#allocation11], %s10529_s29, %s10529_s29, %s10530_s30  }
  0x2c   :  { %10519 = dma.done.wait [#allocation5], 1536  }
  0x2d   :  { %10520 = vsyncadd [#allocation5], 4294965760 }
  0x2e   :  { %10521 = dma.done.wait [#allocation8], 2304  }
  0x2f   :  { %10522 = vsyncadd [#allocation8], 4294964992 }
  0x30   :  { %10523 = dma.done.wait [#allocation11], 640  }
  0x31   :  { %10524 = vsyncadd [#allocation11], 4294966656  ;;  %vm1243_vm0 = vcmask 326656   ;;  %v12591_v0 = vmov 0.0   ;;  %vm151_vm1 = vcmask 1043456   ;;  %v105_v2 = vld [vmem:[#allocation7 + $0x58] sm:$0xff] }
  0x32   :  { %1244 = vst.msk [vmem:[#allocation3] sm:$0xff] %vm1243_vm0, %v12591_v0  ;;  %v106_v1 = vld [vmem:[#allocation7 + $0x60] sm:$0xf]  ;;  %v104_v3 = vld [vmem:[#allocation7 + $0x50] sm:$0xff]  ;;  %v10606_v5 = vand.u32 4294901760, %v105_v2  ;;  %v103_v7 = vld [vmem:[#allocation7 + $0x48] sm:$0xff] }
  0x33   :  { %v153_v4 = vsel %vm151_vm1, %v106_v1, 0  ;;  %v10608_v6 = vand.u32 4294901760, %v104_v3  ;;  %v102_v8 = vld [vmem:[#allocation7 + $0x40] sm:$0xff]  ;;  %v101_v9 = vld [vmem:[#allocation7 + $0x38] sm:$0xff]  ;;  %v10612_v11 = vand.u32 4294901760, %v103_v7  ;;  %v100_v14 = vld [vmem:[#allocation7 + $0x30] sm:$0xff] }
  0x34   :  { %v10610_v10 = vand.u32 4294901760, %v153_v4  ;;  %v10614_v12 = vand.u32 4294901760, %v102_v8  ;;  %v10616_v13 = vand.u32 4294901760, %v101_v9  ;;  %v10619_v15 = vsub.f32 %v105_v2, %v10606_v5  ;;  %v99_v17 = vld [vmem:[#allocation7 + $0x28] sm:$0xff]  ;;  %v98_v24 = vld [vmem:[#allocation7 + $0x20] sm:$0xff]  ;;  %v97_v29 = vld [vmem:[#allocation7 + $0x18] sm:$0xff] }
  0x35   :  { %v10622_v16 = vsub.f32 %v104_v3, %v10608_v6  ;;  %v10628_v19 = vand.u32 4294901760, %v100_v14  ;;  %v10631_v20 = vsub.f32 %v103_v7, %v10612_v11  ;;  %v10650_v27 = vand.u32 4294901760, %v99_v17  ;;  %v96_v35 = vld [vmem:[#allocation7 + $0x10] sm:$0xff]  ;;  %v82_v39 = vld [vmem:[#allocation4] sm:$0xff]  ;;  %v83_v40 = vld [vmem:[#allocation4 + $0x8] sm:$0xff]  ;;  %s10535_s21 = smov 80  }
  0x36   :  { %9056 = vmatprep.subr.mxu0 %v10610_v10  ;;  %v10626_v18 = vsub.f32 %v153_v4, %v10610_v10  ;;  %v10634_v21 = vsub.f32 %v102_v8, %v10614_v12  ;;  %v10638_v22 = vand.u32 4294901760, %v10619_v15  ;;  %v10644_v25 = vsub.f32 %v101_v9, %v10616_v13  ;;  %v95_v49 = vld [vmem:[#allocation7 + $0x8] sm:$0xff]  ;;  %v84_v53 = vld [vmem:[#allocation4 + $0x10] sm:$0xff]  ;;  %v94_v55 = vld [vmem:[#allocation7] sm:$0xff]  ;;  %s10537_s24 = smov 40   ;;  %s10538_s25 = smov 88  }
  0x37   :  { %9057 = vmatpush3.msra.mxu0 %v10610_v10  ;;  %v10641_v23 = vand.u32 4294901760, %v10622_v16  ;;  %v10653_v28 = vand.u32 4294901760, %v10631_v20  ;;  %v10666_v34 = vand.u32 4294901760, %v98_v24  ;;  %v10669_v36 = vsub.f32 %v100_v14, %v10628_v19  ;;  %v85_v2 = vld [vmem:[#allocation4 + $0x18] sm:$0xff]  ;;  %s10539_s10 = smov [#allocation12]  }
  0x38   :  { %9058 = vmatprep.subr.mxu0 %v10606_v5  ;;  %v10648_v26 = vand.u32 4294901760, %v10626_v18  ;;  %v370_v30 = vsub.f32 %v10619_v15, %v10638_v22  ;;  %v10661_v32 = vand.u32 4294901760, %v10634_v21  ;;  %v10672_v37 = vand.u32 4294901760, %v97_v29  ;;  %s8401_s11 = sshll.u32 %s10539_s10, 4  ;;  %s8402_s11 = int_to_ptr.vmem [resolvable:$true] %s8401_s11 }
  0x39   :  { %9059 = vmatpush3.msra.mxu0 %v10606_v5  ;;  %v377_v31 = vsub.f32 %v10622_v16, %v10641_v23  ;;  %v10675_v38 = vand.u32 4294901760, %v10644_v25  ;;  %vm114_vm2 = vcmask 818176   ;;  %v384_v43 = vsub.f32 %v10631_v20, %v10653_v28  ;;  %s10499_s12 = scalar_lea.vmem %s8402_s11, 128  ;;  %p10504_p7 = scmp.lt.s32.totalorder %s8402_s11, %s8402_s11 }
  0x3a   :  { %9060 = vmatprep.subr.mxu0 %v10608_v6  ;;  %v363_v33 = vsub.f32 %v10626_v18, %v10648_v26  ;;  %v371_v42 = vand.u32 4294901760, %v370_v30  ;;  %v10681_v44 = vsub.f32 %v99_v17, %v10650_v27  ;;  %v391_v46 = vsub.f32 %v10634_v21, %v10661_v32  ;;  %p10500_p6 = scmp.ne.s32.totalorder %s8402_s11, %s10499_s12  ;;  %p10505_p8 = scmp.lt.s32.totalorder %s10499_s12, %s10499_s12 }
  0x3b   :  { %9061 = vmatpush3.msra.mxu0 %v10608_v6  ;;  %12651 = vst [vmem:[#allocation17_spill] sm:$0xff] %v10675_v38  ;;  %v378_v45 = vand.u32 4294901760, %v377_v31  ;;  %v10686_v47 = vand.u32 4294901760, %v96_v35  ;;  %v10690_v48 = vand.u32 4294901760, %v10669_v36  ;;  %v10693_v50 = vsub.f32 %v98_v24, %v10666_v34 }
  0x3c   :  { %9062 = vmatprep.subr.mxu0 %v10612_v11  ;;  %v364_v41 = vand.u32 4294901760, %v363_v33  ;;  %v116_v51 = vsel %vm114_vm2, %v82_v39, 0  ;;  %v119_v52 = vsel %vm114_vm2, %v83_v40, 0  ;;  %v10699_v54 = vand.u32 4294901760, %v10681_v44  ;;  %p10506_p9 = por %p10505_p8, %p10504_p7 }
  0x3d   :  { %9063 = vmatpush3.msra.mxu0 %v10612_v11  ;;  %12652 = vst [vmem:[#allocation18_spill] sm:$0xff] %v10690_v48  ;;  %v10701_v56 = vand.u32 4294901760, %v116_v51  ;;  %v10704_v57 = vsub.f32 %v97_v29, %v10672_v37  ;;  %v10706_v58 = vand.u32 4294901760, %v119_v52  ;;  %v385_v59 = vand.u32 4294901760, %v384_v43  ;;  %v86_v29 = vld [vmem:[#allocation4 + $0x20] sm:$0xff] }
  0x3e   :  { %9064 = vmatprep.subr.mxu0 %v10614_v12  ;;  %9100 = vmatprep.subr.mxu1 %v364_v41  ;;  %12653 = vst [vmem:[#allocation19_spill] sm:$0xff] %v10699_v54  ;;  %v398_v60 = vsub.f32 %v10644_v25, %v10675_v38  ;;  %v10712_v61 = vand.u32 4294901760, %v95_v49  ;;  %v122_v1 = vsel %vm114_vm2, %v84_v53, 0  ;;  %v392_v3 = vand.u32 4294901760, %v391_v46  ;;  %p10507_p10 = pnand %p10506_p9, %p10500_p6 }
  0x3f   :  { %9065 = vmatpush3.msra.mxu0 %v10614_v12  ;;  %9101 = vmatpush3.msra.mxu1 %v364_v41  ;;  %v10715_v62 = vsub.f32 %v116_v51, %v10701_v56  ;;  %v10718_v63 = vsub.f32 %v119_v52, %v10706_v58  ;;  %v405_v4 = vsub.f32 %v10669_v36, %v10690_v48  ;;  %v10724_v7 = vand.u32 4294901760, %v94_v55  ;;  %v87_v41 = vld [vmem:[#allocation4 + $0x28] sm:$0xff] }
  0x40   :  { %9066 = vmatprep.subr.mxu0 %v10616_v13  ;;  %9102 = vmatprep.subr.mxu1 %v371_v42  ;;  %v10727_v8 = vand.u32 4294901760, %v10693_v50  ;;  %v412_v9 = vsub.f32 %v10681_v44, %v10699_v54  ;;  %v10733_v14 = vand.u32 4294901760, %v10704_v57  ;;  %v10736_v17 = vsub.f32 %v96_v35, %v10686_v47 }
  0x41   :  { %9067 = vmatpush3.msra.mxu0 %v10616_v13  ;;  %9103 = vmatpush3.msra.mxu1 %v371_v42  ;;  %v10738_v24 = vand.u32 4294901760, %v122_v1  ;;  %v399_v30 = vand.u32 4294901760, %v398_v60  ;;  %v12594_v31 = vand.u32 4294901760, %v10715_v62  ;;  %v125_v33 = vsel %vm114_vm2, %v85_v2, 0 }
  0x42   :  { %9068 = vmatprep.subr.mxu0 %v10628_v19  ;;  %9104 = vmatprep.subr.mxu1 %v378_v45  ;;  %12654 = vst [vmem:[#allocation20_spill] sm:$0xff] %v10727_v8  ;;  %12655 = vst [vmem:[#allocation21_spill] sm:$0xff] %v10733_v14  ;;  %v12593_v39 = vand.u32 4294901760, %v10718_v63  ;;  %v10746_v40 = vsub.f32 %v95_v49, %v10712_v61  ;;  %v10748_v35 = vand.u32 4294901760, %v125_v33  ;;  %v406_v42 = vand.u32 4294901760, %v405_v4 }
  0x43   :  { %9069 = vmatpush3.msra.mxu0 %v10628_v19  ;;  %9105 = vmatpush3.msra.mxu1 %v378_v45  ;;  %v419_v43 = vsub.f32 %v10693_v50, %v10727_v8  ;;  %v10754_v45 = vsub.f32 %v122_v1, %v10738_v24  ;;  %v128_v46 = vsel %vm114_vm2, %v86_v29, 0  ;;  %v413_v49 = vand.u32 4294901760, %v412_v9  ;;  %v89_v29 = vld [vmem:[#allocation4 + $0x38] sm:$0xff] }
  0x44   :  { %9070 = vmatprep.subr.mxu0 %v10650_v27  ;;  %9106 = vmatprep.subr.mxu1 %v385_v59  ;;  %v426_v51 = vsub.f32 %v10704_v57, %v10733_v14  ;;  %v10761_v52 = vand.u32 4294901760, %v10736_v17  ;;  %v10764_v53 = vsub.f32 %v94_v55, %v10724_v7  ;;  %v236_v60 = vsub.f32 %v10715_v62, %v12594_v31 }
  0x45   :  { %9071 = vmatpush3.msra.mxu0 %v10650_v27  ;;  %9107 = vmatpush3.msra.mxu1 %v385_v59  ;;  %v88_v59 = vld [vmem:[#allocation4 + $0x30] sm:$0xff]  ;;  %v10771_v1 = vsub.f32 %v125_v33, %v10748_v35  ;;  %v10773_v2 = vand.u32 4294901760, %v128_v46  ;;  %v246_v55 = vsub.f32 %v10718_v63, %v12593_v39  ;;  %v10781_v4 = vand.u32 4294901760, %v10746_v40 }
  0x46   :  { %9072 = vmatprep.subr.mxu0 %v10666_v34  ;;  %9108 = vmatprep.subr.mxu1 %v392_v3  ;;  %12656 = vst [vmem:[#allocation22_spill] sm:$0xff] %v10761_v52  ;;  %v420_v33 = vand.u32 4294901760, %v419_v43  ;;  %v433_v39 = vsub.f32 %v10736_v17, %v10761_v52  ;;  %v10792_v31 = vand.u32 4294901760, %v10764_v53  ;;  %v237_v14 = vand.u32 4294901760, %v236_v60  ;;  %v90_v60 = vld [vmem:[#allocation4 + $0x40] sm:$0xff] }
  0x47   :  { %9073 = vmatpush3.msra.mxu0 %v10666_v34  ;;  %9109 = vmatpush3.msra.mxu1 %v392_v3  ;;  %v131_v3 = vsel %vm114_vm2, %v87_v41, 0  ;;  %12657 = vst [vmem:[#allocation23_spill] sm:$0xff] %v10781_v4  ;;  %v134_v41 = vsel %vm114_vm2, %v88_v59, 0  ;;  %v10797_v0 = vsub.f32 %v128_v46, %v10773_v2  ;;  %v137_v59 = vsel %vm114_vm2, %v89_v29, 0 }
  0x48   :  { %9074 = vmatprep.subr.mxu0 %v10672_v37  ;;  %9110 = vmatprep.subr.mxu1 %v399_v30  ;;  %v10783_v9 = vand.u32 4294901760, %v131_v3  ;;  %12658 = vst [vmem:[#allocation24_spill] sm:$0xff] %v10792_v31  ;;  %v10806_v8 = vand.u32 4294901760, %v134_v41  ;;  %v12659_v46 = vand.u32 4294901760, %v10754_v45  ;;  %v10815_v43 = vand.u32 4294901760, %v137_v59 }
  0x49   :  { %9075 = vmatpush3.msra.mxu0 %v10672_v37  ;;  %9111 = vmatpush3.msra.mxu1 %v399_v30  ;;  %v427_v30 = vand.u32 4294901760, %v426_v51  ;;  %v440_v51 = vsub.f32 %v10746_v40, %v10781_v4  ;;  %v12660_v4 = vand.u32 4294901760, %v10771_v1  ;;  %v275_v48 = vand.u32 4294901760, %v10797_v0 }
  0x4a   :  { %9076 = vmatprep.subr.mxu0 %v10686_v47  ;;  %9112 = vmatprep.subr.mxu1 %v406_v42  ;;  %v10804_v52 = vsub.f32 %v131_v3, %v10783_v9  ;;  %v256_v29 = vsub.f32 %v10754_v45, %v12659_v46  ;;  %v91_v3 = vld [vmem:[#allocation4 + $0x48] sm:$0xff]  ;;  %v140_v46 = vsel %vm114_vm2, %v90_v60, 0  ;;  %v10831_v60 = vsub.f32 %v137_v59, %v10815_v43 }
  0x4b   :  { %9077 = vmatpush3.msra.mxu0 %v10686_v47  ;;  %9113 = vmatpush3.msra.mxu1 %v406_v42  ;;  %v247_v42 = vand.u32 4294901760, %v246_v55  ;;  %v447_v55 = vsub.f32 %v10764_v53, %v10792_v31  ;;  %v266_v54 = vsub.f32 %v10771_v1, %v12660_v4  ;;  %v10825_v31 = vsub.f32 %v134_v41, %v10806_v8 }
  0x4c   :  { %9078 = vmatprep.subr.mxu0 %v10712_v61  ;;  %9114 = vmatprep.subr.mxu1 %v413_v49  ;;  %v143_v38 = vsel %vm114_vm2, %v91_v3, 0  ;;  %vm10534_vm3 = vmmov 0   ;;  %vm1230_vm4 = vcmask 982016  }
  0x4d   :  { %9079 = vmatpush3.msra.mxu0 %v10712_v61  ;;  %9115 = vmatpush3.msra.mxu1 %v413_v49  ;;  %v434_v49 = vand.u32 4294901760, %v433_v39  ;;  %v441_v39 = vand.u32 4294901760, %v440_v51  ;;  %v448_v4 = vand.u32 4294901760, %v447_v55  ;;  %v92_v51 = vld [vmem:[#allocation4 + $0x50] sm:$0xff]  ;;  %v267_v41 = vand.u32 4294901760, %v266_v54  ;;  %v93_v55 = vld [vmem:[#allocation4 + $0x58] sm:$0xff] }
  0x4e   :  { %9080 = vmatprep.subr.mxu0 %v10724_v7  ;;  %9116 = vmatprep.subr.mxu1 %v420_v33  ;;  %v295_v59 = vand.u32 4294901760, %v10825_v31  ;;  %v305_v54 = vand.u32 4294901760, %v10831_v60 }
  0x4f   :  { %9081 = vmatpush3.msra.mxu0 %v10724_v7  ;;  %9117 = vmatpush3.msra.mxu1 %v420_v33  ;;  %v12611_v33 = vand.u32 4294901760, %v10804_v52 }
  0x50   :  { %9082 = vmatprep.mubr.f32.mxu0 %v237_v14  ;;  %9118 = vmatprep.subr.mxu1 %v427_v30  ;;  %v257_v14 = vand.u32 4294901760, %v256_v29  ;;  %v10844_v29 = vand.u32 4294901760, %v143_v38 }
  0x51   :  { %9144 = vmatprep.subr.mxu0 %v10626_v18  ;;  %9083 = vmatmul.mubr.f32.vlgmr.msra.gmra.mxu0 %v247_v42  ;;  %v10833_v42 = vand.u32 4294901760, %v140_v46 }
  0x52   :  { %9119 = vmatpush3.msra.mxu1 %v427_v30  ;;  %9145 = vmatpush3.msra.mxu0 %v10626_v18  ;;  %v276_v18 = vsub.f32 %v10797_v0, %v275_v48  ;;  %v286_v30 = vsub.f32 %v10804_v52, %v12611_v33  ;;  %v149_v33 = vsel %vm114_vm2, %v93_v55, 0 }
  0x53   :  { %9120 = vmatprep.subr.mxu1 %v434_v49  ;;  %9146 = vmatprep.subr.mxu0 %v10619_v15 }
  0x54   :  { %9121 = vmatpush3.msra.mxu1 %v434_v49  ;;  %9147 = vmatpush3.msra.mxu0 %v10619_v15  ;;  %v146_v15 = vsel %vm114_vm2, %v92_v51, 0  ;;  %v10850_v49 = vsub.f32 %v140_v46, %v10833_v42  ;;  %v277_v3 = vand.u32 4294901760, %v276_v18  ;;  %v306_v46 = vsub.f32 %v10831_v60, %v305_v54 }
  0x55   :  { %9122 = vmatprep.subr.mxu1 %v441_v39  ;;  %9148 = vmatprep.subr.mxu0 %v10622_v16  ;;  %v10861_v51 = vand.u32 4294901760, %v146_v15 }
  0x56   :  { %9085 = vmatprep.mubr.f32.mxu0 %v257_v14  ;;  %9123 = vmatpush3.msra.mxu1 %v441_v39  ;;  %v287_v39 = vand.u32 4294901760, %v286_v30  ;;  %v10859_v14 = vsub.f32 %v143_v38, %v10844_v29  ;;  %v307_v30 = vand.u32 4294901760, %v306_v46 }
  0x57   :  { %9149 = vmatpush3.msra.mxu0 %v10622_v16  ;;  %9124 = vmatprep.subr.mxu1 %v448_v4  ;;  %v296_v16 = vsub.f32 %v10825_v31, %v295_v59  ;;  %v10877_v18 = vsub.f32 %v146_v15, %v10861_v51 }
  0x58   :  { %9086 = vmatmul.mubr.f32.gmra.mxu0 %v267_v41  ;;  %9150 = vmatprep.subr.mxu0 %v10631_v20  ;;  %v10871_v41 = vand.u32 4294901760, %v149_v33  ;;  %v325_v38 = vand.u32 4294901760, %v10859_v14 }
  0x59   :  { %9125 = vmatpush3.msra.mxu1 %v448_v4  ;;  %9126 = vmatprep.mubr.f32.mxu1 %v10701_v56  ;;  %v315_v4 = vand.u32 4294901760, %v10850_v49  ;;  %v335_v15 = vand.u32 4294901760, %v10877_v18 }
  0x5a   :  { %9151 = vmatpush3.msra.mxu0 %v10631_v20  ;;  %9127 = vmatmul.mubr.f32.vlgmr.msra.gmra.mxu1 %v10706_v58  ;;  %v297_v20 = vand.u32 4294901760, %v296_v16  ;;  %v10887_v55 = vsub.f32 %v149_v33, %v10871_v41 }
  0x5b   :  { %9152 = vmatprep.subr.mxu0 %v10634_v21  ;;  %9188 = vmatprep.subr.mxu1 %v10610_v10  ;;  %v336_v16 = vsub.f32 %v10877_v18, %v335_v15 }
  0x5c   :  { %9088 = vmatprep.mubr.f32.mxu0 %v277_v3  ;;  %9153 = vmatpush3.msra.mxu0 %v10634_v21  ;;  %v316_v21 = vsub.f32 %v10850_v49, %v315_v4  ;;  %v345_v3 = vand.u32 4294901760, %v10887_v55 }
  0x5d   :  { %9189 = vmatpush3.msra.mxu1 %v10610_v10  ;;  %9089 = vmatmul.mubr.f32.gmra.mxu0 %v287_v39 }
  0x5e   :  { %9154 = vmatprep.subr.mxu0 %v10644_v25  ;;  %9190 = vmatprep.subr.mxu1 %v10606_v5  ;;  %v317_v33 = vand.u32 4294901760, %v316_v21 }
  0x5f   :  { %9155 = vmatpush3.msra.mxu0 %v10644_v25  ;;  %9191 = vmatpush3.msra.mxu1 %v10606_v5  ;;  %v326_v25 = vsub.f32 %v10859_v14, %v325_v38 }
  0x60   :  { %9129 = vmatprep.mubr.f32.mxu1 %v10738_v24  ;;  %9156 = vmatprep.subr.mxu0 %v10669_v36 }
  0x61   :  { %9192 = vmatprep.subr.mxu1 %v10608_v6  ;;  %9091 = vmatprep.mubr.f32.mxu0 %v297_v20  ;;  %v327_v39 = vand.u32 4294901760, %v326_v25 }
  0x62   :  { %9130 = vmatmul.mubr.f32.gmra.mxu1 %v10748_v35  ;;  %9157 = vmatpush3.msra.mxu0 %v10669_v36  ;;  %v346_v36 = vsub.f32 %v10887_v55, %v345_v3 }
  0x63   :  { %9193 = vmatpush3.msra.mxu1 %v10608_v6  ;;  %9092 = vmatmul.mubr.f32.gmra.mxu0 %v307_v30 }
  0x64   :  { %9158 = vmatprep.subr.mxu0 %v10681_v44  ;;  %9194 = vmatprep.subr.mxu1 %v10612_v11  ;;  %v347_v46 = vand.u32 4294901760, %v346_v36 }
  0x65   :  { %9159 = vmatpush3.msra.mxu0 %v10681_v44  ;;  %9195 = vmatpush3.msra.mxu1 %v10612_v11  ;;  %v337_v44 = vand.u32 4294901760, %v336_v16 }
  0x66   :  { %9132 = vmatprep.mubr.f32.mxu1 %v10773_v2  ;;  %9160 = vmatprep.subr.mxu0 %v10693_v50 }
  0x67   :  { %9196 = vmatprep.subr.mxu1 %v10614_v12  ;;  %9094 = vmatprep.mubr.f32.mxu0 %v317_v33 }
  0x68   :  { %9133 = vmatmul.mubr.f32.gmra.mxu1 %v10783_v9  ;;  %9161 = vmatpush3.msra.mxu0 %v10693_v50  ;;  %v12665_v50 = vand.u32 4294901760, %v10771_v1 }
  0x69   :  { %9197 = vmatpush3.msra.mxu1 %v10614_v12  ;;  %9095 = vmatmul.mubr.f32.gmra.mxu0 %v327_v39 }
  0x6a   :  { %9162 = vmatprep.subr.mxu0 %v10704_v57  ;;  %9198 = vmatprep.subr.mxu1 %v10616_v13 }
  0x6b   :  { %9163 = vmatpush3.msra.mxu0 %v10704_v57  ;;  %9199 = vmatpush3.msra.mxu1 %v10616_v13  ;;  %v12669_v57 = vld [vmem:[#allocation20_spill] sm:$0xff] }
  0x6c   :  { %9135 = vmatprep.mubr.f32.mxu1 %v10806_v8  ;;  %9164 = vmatprep.subr.mxu0 %v10736_v17 }
  0x6d   :  { %9200 = vmatprep.subr.mxu1 %v10628_v19  ;;  %9097 = vmatprep.mubr.f32.mxu0 %v337_v44 }
  0x6e   :  { %9136 = vmatmul.mubr.f32.gmra.mxu1 %v10815_v43  ;;  %9165 = vmatpush3.msra.mxu0 %v10736_v17  ;;  %v12676_v17 = vld [vmem:[#allocation24_spill] sm:$0xff] }
  0x6f   :  { %9201 = vmatpush3.msra.mxu1 %v10628_v19  ;;  %9098 = vmatmul.mubr.f32.gmra.mxu0 %v347_v46 }
  0x70   :  { %9166 = vmatprep.subr.mxu0 %v10746_v40  ;;  %9202 = vmatprep.subr.mxu1 %v10650_v27 }
  0x71   :  { %9167 = vmatpush3.msra.mxu0 %v10746_v40  ;;  %9203 = vmatpush3.msra.mxu1 %v10650_v27 }
  0x72   :  { %9138 = vmatprep.mubr.f32.mxu1 %v10833_v42  ;;  %9168 = vmatprep.subr.mxu0 %v10764_v53 }
  0x73   :  { %9204 = vmatprep.subr.mxu1 %v10666_v34  ;;  %9139 = vmatmul.mubr.f32.gmra.mxu1 %v10844_v29 }
  0x74   :  { %9169 = vmatpush3.msra.mxu0 %v10764_v53  ;;  %9170 = vmatprep.mubr.f32.mxu0 %v10715_v62 }
  0x75   :  { %9205 = vmatpush3.msra.mxu1 %v10666_v34  ;;  %9171 = vmatmul.mubr.f32.vlgmr.msra.gmra.mxu0 %v10718_v63 }
  0x76   :  { %9206 = vmatprep.subr.mxu1 %v10672_v37  ;;  %9232 = vmatprep.subr.mxu0 %v10648_v26 }
  0x77   :  { %9207 = vmatpush3.msra.mxu1 %v10672_v37  ;;  %9233 = vmatpush3.msra.mxu0 %v10648_v26  ;;  %v12662_v26 = vand.u32 4294901760, %v10718_v63  ;;  %v12674_v63 = vld [vmem:[#allocation23_spill] sm:$0xff] }
  0x78   :  { %9141 = vmatprep.mubr.f32.mxu1 %v10861_v51  ;;  %9208 = vmatprep.subr.mxu1 %v10686_v47 }
  0x79   :  { %9234 = vmatprep.subr.mxu0 %v10638_v22  ;;  %9142 = vmatmul.mubr.f32.gmra.mxu1 %v10871_v41 }
  0x7a   :  { %9173 = vmatprep.mubr.f32.mxu0 %v10754_v45  ;;  %9209 = vmatpush3.msra.mxu1 %v10686_v47 }
  0x7b   :  { %9235 = vmatpush3.msra.mxu0 %v10638_v22  ;;  %9210 = vmatprep.subr.mxu1 %v10712_v61  ;;  %v12661_v22 = vand.u32 4294901760, %v10715_v62 }
  0x7c   :  { %9174 = vmatmul.mubr.f32.gmra.mxu0 %v10771_v1  ;;  %9236 = vmatprep.subr.mxu0 %v10641_v23  ;;  %v1248_v1 = vld [vmem:[#allocation9 + $0x8] sm:$0xff] }
  0x7d   :  { %9211 = vmatpush3.msra.mxu1 %v10712_v61  ;;  %9237 = vmatpush3.msra.mxu0 %v10641_v23  ;;  %v12663_v23 = vld [vmem:[#allocation17_spill] sm:$0xff] }
  0x7e   :  { %9212 = vmatprep.subr.mxu1 %v10724_v7  ;;  %9238 = vmatprep.subr.mxu0 %v10653_v28 }
  0x7f   :  { %9176 = vmatprep.mubr.f32.mxu0 %v10797_v0  ;;  %9213 = vmatpush3.msra.mxu1 %v10724_v7  ;;  %v12670_v0 = vld [vmem:[#allocation21_spill] sm:$0xff] }
  0x80   :  { %9214 = vmatprep.mubr.f32.mxu1 %v12661_v22  ;;  %9239 = vmatpush3.msra.mxu0 %v10653_v28  ;;  %v12664_v28 = vand.u32 4294901760, %v10754_v45  ;;  %v11035_v45 = vld [vmem:[#allocation3] sm:$0xff] }
  0x81   :  { %9177 = vmatmul.mubr.f32.gmra.mxu0 %v10804_v52  ;;  %9215 = vmatmul.mubr.f32.vlgmr.msra.gmra.mxu1 %v12662_v26  ;;  %v1253_v53 = vsel %vm1243_vm0, %v11035_v45, 0 }
  0x82   :  { %9240 = vmatprep.subr.mxu0 %v10661_v32  ;;  %9276 = vmatprep.subr.mxu1 %v10610_v10 }
  0x83   :  { %9241 = vmatpush3.msra.mxu0 %v10661_v32  ;;  %9277 = vmatpush3.msra.mxu1 %v10610_v10  ;;  %v12666_v32 = vld [vmem:[#allocation18_spill] sm:$0xff]  ;;  %v12667_v10 = vld [vmem:[#allocation19_spill] sm:$0xff] }
  0x84   :  { %9242 = vmatprep.subr.mxu0 %v12663_v23  ;;  %9278 = vmatprep.subr.mxu1 %v10606_v5 }
  0x85   :  { %9179 = vmatprep.mubr.f32.mxu0 %v10825_v31  ;;  %9217 = vmatprep.mubr.f32.mxu1 %v12664_v28  ;;  %v1249_v31 = vld [vmem:[#allocation9 + $0x10] sm:$0xff] }
  0x86   :  { %9243 = vmatpush3.msra.mxu0 %v12663_v23  ;;  %9279 = vmatpush3.msra.mxu1 %v10606_v5  ;;  %v12668_v5 = vand.u32 4294901760, %v10804_v52 }
  0x87   :  { %9180 = vmatmul.mubr.f32.gmra.mxu0 %v10831_v60  ;;  %9218 = vmatmul.mubr.f32.gmra.mxu1 %v12665_v50  ;;  %v12683_v60 = vmov 0.0  }
  0x88   :  { %9244 = vmatprep.subr.mxu0 %v12666_v32  ;;  %9280 = vmatprep.subr.mxu1 %v10608_v6 }
  0x89   :  { %9245 = vmatpush3.msra.mxu0 %v12666_v32  ;;  %9281 = vmatpush3.msra.mxu1 %v10608_v6  ;;  %v1251_v6 = vld [vmem:[#allocation9 + $0x20] sm:$0xff] }
  0x8a   :  { %9246 = vmatprep.subr.mxu0 %v12667_v10  ;;  %9282 = vmatprep.subr.mxu1 %v10612_v11 }
  0x8b   :  { %9182 = vmatprep.mubr.f32.mxu0 %v10850_v49  ;;  %9220 = vmatprep.mubr.f32.mxu1 %v275_v48  ;;  %v1250_v48 = vld [vmem:[#allocation9 + $0x18] sm:$0xff]  ;;  %v11069_v49 = vand.u32 4294901760, %v1248_v1 }
  0x8c   :  { %9247 = vmatpush3.msra.mxu0 %v12667_v10  ;;  %9283 = vmatpush3.msra.mxu1 %v10612_v11  ;;  %v11003_v11 = vand.u32 4294901760, %v1251_v6  ;;  %v11012_v62 = vand.u32 4294901760, %v1250_v48 }
  0x8d   :  { %9183 = vmatmul.mubr.f32.gmra.mxu0 %v10859_v14  ;;  %9221 = vmatmul.mubr.f32.gmra.mxu1 %v12668_v5  ;;  %12684 = vst [vmem:[#allocation26_spill] sm:$0xff] %v11069_v49  ;;  %v1247_v14 = vld [vmem:[#allocation9] sm:$0xff] }
  0x8e   :  { %9248 = vmatprep.subr.mxu0 %v12669_v57  ;;  %9284 = vmatprep.subr.mxu1 %v10614_v12  ;;  %12671 = vst [vmem:[#allocation17_spill] sm:$0xff] %v11003_v11  ;;  %12673 = vst [vmem:[#allocation18_spill] sm:$0xff] %v11012_v62  ;;  %v11092_v20 = vand.u32 4294901760, %v1247_v14 }
  0x8f   :  { %9249 = vmatpush3.msra.mxu0 %v12669_v57  ;;  %9285 = vmatpush3.msra.mxu1 %v10614_v12  ;;  %v12672_v12 = vld [vmem:[#allocation22_spill] sm:$0xff] }
  0x90   :  { %9250 = vmatprep.subr.mxu0 %v12670_v0  ;;  %9286 = vmatprep.subr.mxu1 %v10616_v13  ;;  %12679 = vst [vmem:[#allocation22_spill] sm:$0xff] %v11035_v45  ;;  %12689 = vst [vmem:[#allocation31_spill] sm:$0xff] %v11092_v20 }
  0x91   :  { %9185 = vmatprep.mubr.f32.mxu0 %v10877_v18  ;;  %9223 = vmatprep.mubr.f32.mxu1 %v295_v59  ;;  %v11063_v59 = vand.u32 4294901760, %v1253_v53  ;;  %v11106_v18 = vsub.f32 %v1247_v14, %v11092_v20 }
  0x92   :  { %9251 = vmatpush3.msra.mxu0 %v12670_v0  ;;  %9287 = vmatpush3.msra.mxu1 %v10616_v13  ;;  %v11017_v13 = vsub.f32 %v1251_v6, %v11003_v11 }
  0x93   :  { %9186 = vmatmul.mubr.f32.gmra.mxu0 %v10887_v55  ;;  %9224 = vmatmul.mubr.f32.gmra.mxu1 %v305_v54  ;;  %12690 = vst [vmem:[#allocation32_spill] sm:$0xff] %v11106_v18  ;;  %v11127_v21 = vand.u32 4294901760, %v11106_v18 }
  0x94   :  { %9252 = vmatprep.subr.mxu0 %v12672_v12  ;;  %9288 = vmatprep.subr.mxu1 %v10628_v19  ;;  %12675 = vst [vmem:[#allocation19_spill] sm:$0xff] %v11017_v13  ;;  %v11033_v40 = vand.u32 4294901760, %v11017_v13 }
  0x95   :  { %9253 = vmatpush3.msra.mxu0 %v12672_v12  ;;  %9289 = vmatpush3.msra.mxu1 %v10628_v19  ;;  %v11028_v19 = vsub.f32 %v1250_v48, %v11012_v62  ;;  %12693 = vst [vmem:[#allocation35_spill] sm:$0xff] %v11127_v21 }
  0x96   :  { %9254 = vmatprep.subr.mxu0 %v12674_v63  ;;  %9290 = vmatprep.subr.mxu1 %v10650_v27  ;;  %12678 = vst [vmem:[#allocation21_spill] sm:$0xff] %v11033_v40 }
  0x97   :  { %9226 = vmatprep.mubr.f32.mxu1 %v315_v4  ;;  %9255 = vmatpush3.msra.mxu0 %v12674_v63  ;;  %12677 = vst [vmem:[#allocation20_spill] sm:$0xff] %v11028_v19  ;;  %v11047_v52 = vand.u32 4294901760, %v11028_v19  ;;  %v11083_v4 = vsub.f32 %v1253_v53, %v11063_v59 }
  0x98   :  { %9291 = vmatpush3.msra.mxu1 %v10650_v27  ;;  %9256 = vmatprep.subr.mxu0 %v12676_v17  ;;  %v11039_v27 = vand.u32 4294901760, %v1249_v31 }
  0x99   :  { %9227 = vmatmul.mubr.f32.gmra.mxu1 %v325_v38  ;;  %9292 = vmatprep.subr.mxu1 %v10666_v34  ;;  %12681 = vst [vmem:[#allocation24_spill] sm:$0xff] %v11047_v52  ;;  %v1368_v54 = vsub.f32 %v11028_v19, %v11047_v52  ;;  %v1327_v38 = vand.u32 4294901760, %v11083_v4 }
  0x9a   :  { %9257 = vmatpush3.msra.mxu0 %v12676_v17  ;;  %9258 = vmatprep.mubr.f32.mxu0 %v10701_v56  ;;  %12680 = vst [vmem:[#allocation23_spill] sm:$0xff] %v11039_v27 }
  0x9b   :  { %9293 = vmatpush3.msra.mxu1 %v10666_v34  ;;  %9259 = vmatmul.mubr.f32.vlgmr.msra.gmra.mxu0 %v10706_v58  ;;  %v1361_v34 = vsub.f32 %v11017_v13, %v11033_v40  ;;  %v1328_v30 = vsub.f32 %v11083_v4, %v1327_v38 }
  0x9c   :  { %9294 = vmatprep.subr.mxu1 %v10672_v37  ;;  %9229 = vmatprep.mubr.f32.mxu1 %v335_v15 }
  0x9d   :  { %9295 = vmatpush3.msra.mxu1 %v10672_v37  ;;  %9261 = vmatprep.mubr.f32.mxu0 %v10738_v24  ;;  %v11059_v37 = vsub.f32 %v1249_v31, %v11039_v27 }
  0x9e   :  { %9230 = vmatmul.mubr.f32.gmra.mxu1 %v345_v3  ;;  %9296 = vmatprep.subr.mxu1 %v10686_v47 }
  0x9f   :  { %9297 = vmatpush3.msra.mxu1 %v10686_v47  ;;  %9262 = vmatmul.mubr.f32.gmra.mxu0 %v10748_v35  ;;  %12682 = vst [vmem:[#allocation25_spill] sm:$0xff] %v11059_v37  ;;  %v11073_v47 = vand.u32 4294901760, %v1361_v34 }
  0xa0   :  { %9298 = vmatprep.subr.mxu1 %v10712_v61  ;;  %9320 = vmatprep.subr.mxu0 %v12683_v60 }
  0xa1   :  { %9299 = vmatpush3.msra.mxu1 %v10712_v61  ;;  %9264 = vmatprep.mubr.f32.mxu0 %v10773_v2  ;;  %12685 = vst [vmem:[#allocation27_spill] sm:$0xff] %v11073_v47  ;;  %v11078_v61 = vand.u32 4294901760, %v11059_v37 }
  0xa2   :  { %9300 = vmatprep.subr.mxu1 %v10724_v7  ;;  %9302 = vmatprep.mubr.f32.mxu1 %v10701_v56  ;;  %v11087_v56 = vand.u32 4294901760, %v1368_v54 }
  0xa3   :  { %9301 = vmatpush3.msra.mxu1 %v10724_v7  ;;  %9321 = vmatpush3.msra.mxu0 %v11003_v11  ;;  %12686 = vst [vmem:[#allocation28_spill] sm:$0xff] %v11078_v61  ;;  %v11090_v7 = vsub.f32 %v1248_v1, %v11069_v49 }
  0xa4   :  { %9265 = vmatmul.mubr.f32.gmra.mxu0 %v10783_v9  ;;  %9303 = vmatmul.mubr.f32.vlgmr.msra.gmra.mxu1 %v10706_v58  ;;  %12687 = vst [vmem:[#allocation29_spill] sm:$0xff] %v11087_v56  ;;  %v1375_v58 = vsub.f32 %v11059_v37, %v11078_v61 }
  0xa5   :  { %9333 = vmatprep.subr.mxu1 %v12683_v60  ;;  %9267 = vmatprep.mubr.f32.mxu0 %v10806_v8  ;;  %12688 = vst [vmem:[#allocation30_spill] sm:$0xff] %v11090_v7 }
  0xa6   :  { %9334 = vmatpush3.msra.mxu1 %v11073_v47  ;;  %9305 = vmatprep.mubr.f32.mxu1 %v10738_v24  ;;  %v11109_v24 = vand.u32 4294901760, %v11090_v7 }
  0xa7   :  { %9322 = vmatprep.subr.mxu0 %v12683_v60  ;;  %9335 = vmatprep.subr.mxu1 %v12683_v60 }
  0xa8   :  { %9268 = vmatmul.mubr.f32.gmra.mxu0 %v10815_v43  ;;  %9306 = vmatmul.mubr.f32.gmra.mxu1 %v10748_v35  ;;  %12691 = vst [vmem:[#allocation33_spill] sm:$0xff] %v11109_v24  ;;  %v11115_v35 = vand.u32 4294901760, %v1375_v58 }
  0xa9   :  { %9323 = vmatpush3.msra.mxu0 %v11012_v62  ;;  %9336 = vmatpush3.msra.mxu1 %v11087_v56 }
  0xaa   :  { %9270 = vmatprep.mubr.f32.mxu0 %v10833_v42  ;;  %9308 = vmatprep.mubr.f32.mxu1 %v10773_v2  ;;  %12692 = vst [vmem:[#allocation34_spill] sm:$0xff] %v11115_v35  ;;  %v1382_v2 = vsub.f32 %v11090_v7, %v11109_v24 }
  0xab   :  { %9324 = vmatprep.subr.mxu0 %v12683_v60  ;;  %9337 = vmatprep.subr.mxu1 %v12683_v60 }
  0xac   :  { %9271 = vmatmul.mubr.f32.gmra.mxu0 %v10844_v29  ;;  %9309 = vmatmul.mubr.f32.gmra.mxu1 %v10783_v9  ;;  %v1329_v9 = vand.u32 4294901760, %v1328_v30  ;;  %v11137_v55 = vand.u32 4294901760, %v1382_v2 }
  0xad   :  { %9325 = vmatpush3.msra.mxu0 %v11039_v27  ;;  %9273 = vmatprep.mubr.f32.mxu0 %v10861_v51 }
  0xae   :  { %9311 = vmatprep.mubr.f32.mxu1 %v10806_v8  ;;  %9326 = vmatprep.subr.mxu0 %v12683_v60  ;;  %12694 = vst [vmem:[#allocation36_spill] sm:$0xff] %v11137_v55  ;;  %v1389_v8 = vsub.f32 %v11106_v18, %v11127_v21 }
  0xaf   :  { %9338 = vmatpush3.msra.mxu1 %v11115_v35  ;;  %9327 = vmatpush3.msra.mxu0 %v11069_v49 }
  0xb0   :  { %9274 = vmatmul.mubr.f32.gmra.mxu0 %v10871_v41  ;;  %9312 = vmatmul.mubr.f32.gmra.mxu1 %v10815_v43  ;;  %v11149_v43 = vand.u32 4294901760, %v1389_v8 }
  0xb1   :  { %9328 = vmatprep.subr.mxu0 %v12683_v60  ;;  %9314 = vmatprep.mubr.f32.mxu1 %v10833_v42  ;;  %v11199_v42 = vld [vmem:[%s12587_s4] ss:$0 sm:$0xff] }
  0xb2   :  { %9329 = vmatpush3.msra.mxu0 %v11092_v20  ;;  %9330 = vmatprep.mubr.msk.f32.mxu0 %vm10534_vm3, %v12683_v60  ;;  %12695 = vst [vmem:[#allocation37_spill] sm:$0xff] %v11149_v43  ;;  %12696 = vst [vmem:[#allocation38_spill] sm:$0xff] %v11199_v42 }
  0xb3   :  { %9339 = vmatprep.subr.mxu1 %v12683_v60  ;;  %9346 = vmatprep.subr.mxu0 %v12683_v60 }
  0xb4   :  { %9315 = vmatmul.mubr.f32.gmra.mxu1 %v10844_v29  ;;  %9331 = vmatmul.mubr.f32.vlgmr.msra.gmra.mxu0 %v1329_v9 }
  0xb5   :  { %9340 = vmatpush3.msra.mxu1 %v11137_v55  ;;  %9347 = vmatpush3.msra.mxu0 %v11017_v13 }
  0xb6   :  { %9348 = vmatprep.subr.mxu0 %v12683_v60  ;;  %9317 = vmatprep.mubr.f32.mxu1 %v10861_v51 }
  0xb7   :  { %9349 = vmatpush3.msra.mxu0 %v11028_v19  ;;  %9341 = vmatprep.subr.mxu1 %v12683_v60 }
  0xb8   :  { %9350 = vmatprep.subr.mxu0 %v12683_v60  ;;  %9318 = vmatmul.mubr.f32.gmra.mxu1 %v10871_v41 }
  0xb9   :  { %9351 = vmatpush3.msra.mxu0 %v11059_v37  ;;  %9342 = vmatpush3.msra.mxu1 %v11149_v43 }
  0xba   :  { %9352 = vmatprep.subr.mxu0 %v12683_v60  ;;  %9343 = vmatprep.mubr.msk.f32.mxu1 %vm10534_vm3, %v12683_v60 }
  0xbb   :  { %9353 = vmatpush3.msra.mxu0 %v11090_v7  ;;  %9359 = vmatprep.subr.mxu1 %v12683_v60 }
  0xbc   :  { %9354 = vmatprep.subr.mxu0 %v12683_v60  ;;  %9344 = vmatmul.mubr.f32.vlgmr.msra.gmra.mxu1 %v11063_v59 }
  0xbd   :  { %9355 = vmatpush3.msra.mxu0 %v11106_v18  ;;  %9360 = vmatpush3.msra.mxu1 %v11003_v11 }
  0xbe   :  { %9356 = vmatprep.mubr.msk.f32.mxu0 %vm10534_vm3, %v12683_v60  ;;  %9361 = vmatprep.subr.mxu1 %v12683_v60 }
  0xbf   :  { %9372 = vmatprep.subr.mxu0 %v12683_v60  ;;  %9357 = vmatmul.mubr.f32.vlgmr.msra.gmra.mxu0 %v11083_v4 }
  0xc0   :  { %9362 = vmatpush3.msra.mxu1 %v11012_v62  ;;  %9373 = vmatpush3.msra.mxu0 %v11033_v40 }
  0xc1   :  { %9363 = vmatprep.subr.mxu1 %v12683_v60  ;;  %9374 = vmatprep.subr.mxu0 %v12683_v60 }
  0xc2   :  { %9364 = vmatpush3.msra.mxu1 %v11039_v27  ;;  %9375 = vmatpush3.msra.mxu0 %v11047_v52 }
  0xc3   :  { %9365 = vmatprep.subr.mxu1 %v12683_v60  ;;  %9376 = vmatprep.subr.mxu0 %v12683_v60 }
  0xc4   :  { %9366 = vmatpush3.msra.mxu1 %v11069_v49  ;;  %9377 = vmatpush3.msra.mxu0 %v11078_v61 }
  0xc5   :  { %9367 = vmatprep.subr.mxu1 %v12683_v60  ;;  %9378 = vmatprep.subr.mxu0 %v12683_v60 }
  0xc6   :  { %9368 = vmatpush3.msra.mxu1 %v11092_v20  ;;  %9369 = vmatprep.mubr.msk.f32.mxu1 %vm10534_vm3, %v12683_v60 }
  0xc7   :  { %9379 = vmatpush3.msra.mxu0 %v11109_v24  ;;  %9370 = vmatmul.mubr.f32.vlgmr.msra.gmra.mxu1 %v1327_v38 }
  0xc8   :  { %9380 = vmatprep.subr.mxu0 %v12683_v60  ;;  %9385 = vmatprep.subr.mxu1 %v12683_v60 }
  0xc9   :  { %9381 = vmatpush3.msra.mxu0 %v11127_v21  ;;  %9382 = vmatprep.mubr.msk.f32.mxu0 %vm10534_vm3, %v12683_v60 }
  0xca   :  { %9386 = vmatpush3.msra.mxu1 %v11003_v11  ;;  %9383 = vmatmul.mubr.f32.vlgmr.msra.gmra.mxu0 %v11063_v59 }
  0xcb   :  { %9387 = vmatprep.subr.mxu1 %v12683_v60  ;;  %9395 = vmatprep.mubr.msk.f32.mxu1 %vm10534_vm3, %v12683_v60 }
  0xcc   :  { %9388 = vmatpush3.msra.mxu1 %v11012_v62  ;;  %1766 = vrot.lane.b32.xlu0 %v11199_v42, %s10535_s21 }
  0xcd   :  { %9389 = vmatprep.subr.mxu1 %v12683_v60  ;;  %9398 = vmatprep.subr.mxu0 %v12683_v60 }
  0xce   :  { %9390 = vmatpush3.msra.mxu1 %v11039_v27  ;;  %9399 = vmatpush3.msra.mxu0 %v11003_v11 }
  0xcf   :  { %9391 = vmatprep.subr.mxu1 %v12683_v60  ;;  %9400 = vmatprep.subr.mxu0 %v12683_v60 }
  0xd0   :  { %9392 = vmatpush3.msra.mxu1 %v11069_v49  ;;  %9401 = vmatpush3.msra.mxu0 %v11012_v62 }
  0xd1   :  { %9393 = vmatprep.subr.mxu1 %v12683_v60  ;;  %9402 = vmatprep.subr.mxu0 %v12683_v60 }
  0xd2   :  { %9394 = vmatpush3.msra.mxu1 %v11092_v20  ;;  %9403 = vmatpush3.msra.mxu0 %v11039_v27 }
  0xd3   :  { %9396 = vmatmul.mubr.f32.vlgmr.msra.gmra.mxu1 %v11063_v59  ;;  %9411 = vmatprep.subr.mxu1 %v12683_v60 }
  0xd4   :  { %9412 = vmatpush3.msra.mxu1 %v11073_v47  ;;  %9421 = vmatprep.mubr.msk.f32.mxu1 %vm10534_vm3, %v12683_v60 }
  0xd5   :  { %9413 = vmatprep.subr.mxu1 %v12683_v60  ;;  %9404 = vmatprep.subr.mxu0 %v12683_v60 }
  0xd6   :  { %9414 = vmatpush3.msra.mxu1 %v11087_v56  ;;  %9405 = vmatpush3.msra.mxu0 %v11069_v49 }
  0xd7   :  { %9415 = vmatprep.subr.mxu1 %v12683_v60  ;;  %9406 = vmatprep.subr.mxu0 %v12683_v60 }
  0xd8   :  { %9416 = vmatpush3.msra.mxu1 %v11115_v35  ;;  %9407 = vmatpush3.msra.mxu0 %v11092_v20  ;;  %v11285_v35 = vld [vmem:[%s12586_s3] ss:$0 sm:$0xff]  ;;  %s10536_s3 = smov 48  }
  0xd9   :  { %9417 = vmatprep.subr.mxu1 %v12683_v60  ;;  %9408 = vmatprep.mubr.msk.f32.mxu0 %vm10534_vm3, %v12683_v60 }
  0xda   :  { %9418 = vmatpush3.msra.mxu1 %v11137_v55  ;;  %9424 = vmatprep.subr.mxu0 %v12683_v60 }
  0xdb   :  { %9419 = vmatprep.subr.mxu1 %v12683_v60 }
  0xdc   :  { %9420 = vmatpush3.msra.mxu1 %v11149_v43 }
  0xdd   :  { %9437 = vmatprep.subr.mxu1 %v12683_v60 }
 0x111   :  { %v9084_v29 = vpop.f32.mrf.mxu0 }
 0x112   :  { %v250_v21 = vadd.f32 %v9084_v29, %v11285_v35 }
 0x113   :  { %v239_v51 = vpop.f32.mrf.mxu0 }
 0x114   :  { %v240_v47 = vadd.f32 %v11285_v35, %v239_v51 }
 0x118   :  { %v9087_v41 = vpop.f32.mrf.mxu0 }
 0x119   :  { %v270_v40 = vadd.f32 %v9087_v41, %v11285_v35 }
 0x11a   :  { %v259_v25 = vpop.f32.mrf.mxu0  ;;  %v9128_v15 = vpop.f32.mrf.mxu1 }
 0x11b   :  { %v492_v18 = vadd.f32 %v9128_v15, %v250_v21  ;;  %v260_v19 = vadd.f32 %v11285_v35, %v259_v25 }
 0x11c   :  { %v485_v3 = vpop.f32.mrf.mxu1 }
 0x11d   :  { %v9090_v33 = vpop.f32.mrf.mxu0  ;;  %v486_v20 = vadd.f32 %v485_v3, %v240_v47 }
 0x11e   :  { %v290_v49 = vadd.f32 %v9090_v33, %v11285_v35 }
 0x11f   :  { %v279_v39 = vpop.f32.mrf.mxu0 }
 0x120   :  { %v280_v11 = vadd.f32 %v11285_v35, %v279_v39 }
 0x122   :  { %v9131_v16 = vpop.f32.mrf.mxu1 }
 0x123   :  { %v9093_v36 = vpop.f32.mrf.mxu0  ;;  %v504_v27 = vadd.f32 %v9131_v16, %v270_v40 }
 0x124   :  { %v497_v44 = vpop.f32.mrf.mxu1 }
 0x125   :  { %v11242_v46 = vpop.f32.mrf.mxu0  ;;  %v498_v41 = vadd.f32 %v497_v44, %v260_v19 }
 0x128   :  { %v9134_v22 = vpop.f32.mrf.mxu1 }
 0x129   :  { %v11244_v26 = vpop.f32.mrf.mxu0  ;;  %v516_v25 = vadd.f32 %v9134_v22, %v290_v49 }
 0x12a   :  { %v11246_v23 = vpop.f32.mrf.mxu1  ;;  %v330_v49 = vadd.f32 %v11244_v26, %v11285_v35 }
 0x12b   :  { %v11248_v28 = vpop.f32.mrf.mxu0  ;;  %v510_v39 = vadd.f32 %v11246_v23, %v280_v11 }
 0x12c   :  { %v320_v23 = vadd.f32 %v11285_v35, %v11248_v28 }
 0x12e   :  { %v11250_v50 = vpop.f32.mrf.mxu1 }
 0x12f   :  { %v11252_v32 = vpop.f32.mrf.mxu0 }
 0x130   :  { %v11254_v10 = vpop.f32.mrf.mxu1 }
 0x131   :  { %v11256_v5 = vpop.f32.mrf.mxu0 }
 0x133   :  { %v11258_v57 = vpop.f32.mrf.mxu1 }
 0x135   :  { %v9172_v6 = vpop.f32.mrf.mxu0  ;;  %v11260_v0 = vpop.f32.mrf.mxu1 }
 0x136   :  { %v657_v13 = vadd.f32 %v9172_v6, %v492_v18 }
 0x137   :  { %v649_v48 = vpop.f32.mrf.mxu0 }
 0x138   :  { %v650_v62 = vadd.f32 %v649_v48, %v486_v20 }
 0x139   :  { %v11262_v12 = vpop.f32.mrf.mxu1 }
 0x13b   :  { %v11264_v17 = vpop.f32.mrf.mxu1 }
 0x13c   :  { %v9175_v63 = vpop.f32.mrf.mxu0 }
 0x13d   :  { %v671_v21 = vadd.f32 %v9175_v63, %v504_v27 }
 0x13e   :  { %v663_v31 = vpop.f32.mrf.mxu0 }
 0x13f   :  { %v664_v3 = vadd.f32 %v663_v31, %v498_v41 }
 0x141   :  { %v9178_v53 = vpop.f32.mrf.mxu0  ;;  %v9216_v34 = vpop.f32.mrf.mxu1 }
 0x142   :  { %v821_v60 = vadd.f32 %v9216_v34, %v657_v13  ;;  %v300_v13 = vadd.f32 %v11285_v35, %v11242_v46  ;;  %v685_v27 = vadd.f32 %v9178_v53, %v516_v25  ;;  %v350_v53 = vadd.f32 %v11252_v32, %v11285_v35 }
 0x143   :  { %v677_v1 = vpop.f32.mrf.mxu0  ;;  %v812_v59 = vpop.f32.mrf.mxu1  ;;  %v540_v34 = vadd.f32 %v11258_v57, %v330_v49 }
 0x144   :  { %v813_v15 = vadd.f32 %v812_v59, %v650_v62  ;;  %v678_v44 = vadd.f32 %v677_v1, %v510_v39  ;;  %v522_v6 = vadd.f32 %v11254_v10, %v300_v13 }
 0x147   :  { %v11266_v54 = vpop.f32.mrf.mxu0  ;;  %v9219_v14 = vpop.f32.mrf.mxu1 }
 0x148   :  { %v837_v33 = vadd.f32 %v9219_v14, %v671_v21 }
 0x149   :  { %v11268_v4 = vpop.f32.mrf.mxu0  ;;  %v828_v58 = vpop.f32.mrf.mxu1 }
 0x14a   :  { %v829_v62 = vadd.f32 %v828_v58, %v664_v3  ;;  %v692_v28 = vadd.f32 %v11268_v4, %v522_v6  ;;  %v340_v58 = vadd.f32 %v11285_v35, %v11256_v5 }
 0x14d   :  { %v11270_v38 = vpop.f32.mrf.mxu0  ;;  %v9222_v30 = vpop.f32.mrf.mxu1 }
 0x14e   :  { %v853_v22 = vadd.f32 %v9222_v30, %v685_v27  ;;  %v534_v30 = vadd.f32 %v11260_v0, %v320_v23  ;;  %v713_v32 = vadd.f32 %v11270_v38, %v540_v34  ;;  %v546_v38 = vadd.f32 %v11264_v17, %v340_v58  ;;  %v12700_v34 = vld [vmem:[#allocation38_spill] sm:$0xff] }
 0x14f   :  { %v11272_v2 = vpop.f32.mrf.mxu1  ;;  %v11274_v9 = vpop.f32.mrf.mxu0 }
 0x150   :  { %v845_v26 = vadd.f32 %v11272_v2, %v678_v44 }
 0x153   :  { %v11276_v8 = vpop.f32.mrf.mxu1  ;;  %v11278_v43 = vpop.f32.mrf.mxu0 }
 0x155   :  { %v11280_v55 = vpop.f32.mrf.mxu1  ;;  %v11288_v56 = vpop.f32.mrf.mxu0 }
 0x156   :  { %v861_v57 = vadd.f32 %v11280_v55, %v692_v28 }
 0x159   :  { %v11290_v24 = vpop.f32.mrf.mxu1 }
 0x15b   :  { %v11293_v61 = vpop.f32.mrf.mxu1  ;;  %v9260_v52 = vpop.f32.mrf.mxu0 }
 0x15c   :  { %v1017_v45 = vadd.f32 %v9260_v52, %v821_v60 }
 0x15d   :  { %v1010_v7 = vpop.f32.mrf.mxu0 }
 0x15e   :  { %v11296_v37 = vpop.f32.mrf.mxu1  ;;  %v1011_v40 = vadd.f32 %v1010_v7, %v813_v15  ;;  %v706_v15 = vadd.f32 %v11274_v9, %v534_v30 }
 0x15f   :  { %12697 = vst [vmem:[#allocation39_spill] sm:$0xff] %v11296_v37  ;;  %v9263_v29 = vpop.f32.mrf.mxu0  ;;  %v310_v37 = vadd.f32 %v9093_v36, %v11285_v35  ;;  %v885_v35 = vadd.f32 %v11290_v24, %v713_v32  ;;  %v720_v24 = vadd.f32 %v11288_v56, %v546_v38 }
 0x160   :  { %v11301_v42 = vpop.f32.mrf.mxu1  ;;  %v1029_v52 = vadd.f32 %v9263_v29, %v837_v33 }
 0x161   :  { %v1022_v51 = vpop.f32.mrf.mxu0  ;;  %v528_v36 = vadd.f32 %v11250_v50, %v310_v37 }
 0x162   :  { %v1023_v46 = vadd.f32 %v1022_v51, %v829_v62 }
 0x163   :  { %v699_v31 = vadd.f32 %v11266_v54, %v528_v36 }
 0x164   :  { %v9266_v47 = vpop.f32.mrf.mxu0  ;;  %v9304_v18 = vpop.f32.mrf.mxu1 }
 0x165   :  { %v1167_v20 = vadd.f32 %v9304_v18, %v1017_v45  ;;  %v1041_v37 = vadd.f32 %v9266_v47, %v853_v22  ;;  %v869_v10 = vadd.f32 %v11276_v8, %v699_v31  ;;  %v552_v8 = vadd.f32 %v11262_v12, %v350_v53  ;;  %v1767_v31 = vpop.permute.xlu0 %1766  ;;  %v12699_v53 = vld [vmem:[#allocation22_spill] sm:$0xff] }
 0x166   :  { %v1034_v16 = vpop.f32.mrf.mxu0  ;;  %v1160_v19 = vpop.f32.mrf.mxu1  ;;  %v877_v18 = vadd.f32 %v11293_v61, %v706_v15 }
 0x167   :  { %1232 = vst.msk [vmem:[#allocation2 + $0x8] sm:$0xff] %vm1230_vm4, %v1167_v20  ;;  %v1161_v60 = vadd.f32 %v1160_v19, %v1011_v40  ;;  %v1035_v14 = vadd.f32 %v1034_v16, %v845_v26  ;;  %v727_v47 = vadd.f32 %v11278_v43, %v552_v8  ;;  %v12698_v40 = vld [vmem:[#allocation39_spill] sm:$0xff]  ;;  %v893_v43 = vadd.f32 %v11301_v42, %v720_v24 }
 0x168   :  { %v9269_v7 = vpop.f32.mrf.mxu0  ;;  %v9307_v45 = vpop.f32.mrf.mxu1  ;;  %v12706_v24 = vld [vmem:[#allocation19_spill] sm:$0xff] }
 0x169   :  { %1231 = vst.msk [vmem:[#allocation2] sm:$0xff] %vm1230_vm4, %v1161_v60  ;;  %v1179_v11 = vadd.f32 %v9307_v45, %v1029_v52  ;;  %v1053_v51 = vadd.f32 %v9269_v7, %v869_v10  ;;  %v901_v20 = vadd.f32 %v12698_v40, %v727_v47  ;;  %v12707_v40 = vld [vmem:[#allocation31_spill] sm:$0xff] }
 0x16a   :  { %v1046_v48 = vpop.f32.mrf.mxu0  ;;  %v1172_v63 = vpop.f32.mrf.mxu1 }
 0x16b   :  { %1234 = vst.msk [vmem:[#allocation2 + $0x18] sm:$0xff] %vm1230_vm4, %v1179_v11  ;;  %v1173_v50 = vadd.f32 %v1172_v63, %v1023_v46  ;;  %v1047_v5 = vadd.f32 %v1046_v48, %v861_v57 }
 0x16c   :  { %v9272_v1 = vpop.f32.mrf.mxu0  ;;  %v9310_v59 = vpop.f32.mrf.mxu1 }
 0x16d   :  { %1233 = vst.msk [vmem:[#allocation2 + $0x10] sm:$0xff] %vm1230_vm4, %v1173_v50  ;;  %v1191_v54 = vadd.f32 %v9310_v59, %v1041_v37  ;;  %v1065_v3 = vadd.f32 %v9272_v1, %v885_v35 }
 0x16e   :  { %v1058_v2 = vpop.f32.mrf.mxu0  ;;  %v1184_v29 = vpop.f32.mrf.mxu1 }
 0x16f   :  { %1236 = vst.msk [vmem:[#allocation2 + $0x28] sm:$0xff] %vm1230_vm4, %v1191_v54  ;;  %v1185_v4 = vadd.f32 %v1184_v29, %v1035_v14  ;;  %v1059_v13 = vadd.f32 %v1058_v2, %v877_v18  ;;  %v12703_v18 = vld [vmem:[#allocation18_spill] sm:$0xff] }
 0x170   :  { %v9275_v41 = vpop.f32.mrf.mxu0  ;;  %v9313_v21 = vpop.f32.mrf.mxu1  ;;  %v1246_v1 = vld [vmem:[#allocation2] sm:$0xff] }
 0x171   :  { %1235 = vst.msk [vmem:[#allocation2 + $0x20] sm:$0xff] %vm1230_vm4, %v1185_v4  ;;  %v1203_v0 = vadd.f32 %v9313_v21, %v1053_v51  ;;  %v1077_v19 = vadd.f32 %v9275_v41, %v901_v20  ;;  %v12708_v20 = vld [vmem:[#allocation20_spill] sm:$0xff] }
 0x172   :  { %v1070_v25 = vpop.f32.mrf.mxu0  ;;  %v1196_v55 = vpop.f32.mrf.mxu1 }
 0x173   :  { %1238 = vst.msk [vmem:[#allocation2 + $0x38] sm:$0xff] %vm1230_vm4, %v1203_v0  ;;  %v1197_v12 = vadd.f32 %v1196_v55, %v1047_v5  ;;  %v1071_v62 = vadd.f32 %v1070_v25, %v893_v43  ;;  %v12701_v25 = vld [vmem:[#allocation17_spill] sm:$0xff]  ;;  %v12702_v55 = vmov 0.0   ;;  %v12713_v43 = vld [vmem:[#allocation24_spill] sm:$0xff] }
 0x174   :  { %v9316_v33 = vpop.f32.mrf.mxu1  ;;  %v1331_v9 = vpop.f32.mrf.mxu0 }
 0x175   :  { %1237 = vst.msk [vmem:[#allocation2 + $0x30] sm:$0xff] %vm1230_vm4, %v1197_v12  ;;  %v1215_v17 = vadd.f32 %v9316_v33, %v1065_v3  ;;  %v12704_v12 = vld [vmem:[#allocation23_spill] sm:$0xff] }
 0x176   :  { %v1208_v39 = vpop.f32.mrf.mxu1  ;;  %v9332_v16 = vpop.f32.mrf.mxu0 }
 0x177   :  { %1240 = vst.msk [vmem:[#allocation2 + $0x48] sm:$0xff] %vm1230_vm4, %v1215_v17  ;;  %v1209_v61 = vadd.f32 %v1208_v39, %v1059_v13  ;;  %v12709_v13 = vld [vmem:[#allocation25_spill] sm:$0xff]  ;;  %v12710_v17 = vld [vmem:[#allocation30_spill] sm:$0xff]  ;;  %v12711_v39 = vld [vmem:[#allocation32_spill] sm:$0xff] }
 0x178   :  { %v9319_v27 = vpop.f32.mrf.mxu1  ;;  %v12712_v16 = vld [vmem:[#allocation21_spill] sm:$0xff] }
 0x179   :  { %1239 = vst.msk [vmem:[#allocation2 + $0x40] sm:$0xff] %vm1230_vm4, %v1209_v61  ;;  %v1227_v52 = vadd.f32 %v9319_v27, %v1077_v19  ;;  %v12714_v19 = vld [vmem:[#allocation28_spill] sm:$0xff]  ;;  %v12715_v61 = vld [vmem:[#allocation27_spill] sm:$0xff]  ;;  %v12716_v27 = vld [vmem:[#allocation33_spill] sm:$0xff] }
 0x17a   :  { %v1220_v56 = vpop.f32.mrf.mxu1 }
 0x17b   :  { %1242 = vst.msk [vmem:[#allocation2 + $0x58] sm:$0xff] %vm1230_vm4, %v1227_v52  ;;  %v1221_v60 = vadd.f32 %v1220_v56, %v1071_v62  ;;  %v12717_v62 = vld [vmem:[#allocation29_spill] sm:$0xff]  ;;  %v12718_v52 = vld [vmem:[#allocation35_spill] sm:$0xff]  ;;  %v12719_v56 = vld [vmem:[#allocation34_spill] sm:$0xff] }
 0x17c   :  { %v1427_v49 = vpop.f32.mrf.mxu1 }
 0x17d   :  { %1241 = vst.msk [vmem:[#allocation2 + $0x50] sm:$0xff] %vm1230_vm4, %v1221_v60  ;;  %v1428_v44 = vadd.f32 %v1427_v49, %v1331_v9  ;;  %v12705_v9 = vld [vmem:[#allocation26_spill] sm:$0xff]  ;;  %v12720_v60 = vld [vmem:[#allocation36_spill] sm:$0xff]  ;;  %v12721_v49 = vld [vmem:[#allocation37_spill] sm:$0xff] }
 0x17e   :  { %v9345_v36 = vpop.f32.mrf.mxu1 }
 0x17f   :  { %v1509_v7 = vpop.f32.mrf.mxu0 }
 0x180   :  { %v1510_v11 = vadd.f32 %v1509_v7, %v1428_v44 }
 0x181   :  { %v9358_v45 = vpop.f32.mrf.mxu0 }
 0x187   :  { %v1587_v42 = vpop.f32.mrf.mxu1 }
 0x188   :  { %v1588_v6 = vadd.f32 %v1587_v42, %v1510_v11 }
 0x189   :  { %v9371_v22 = vpop.f32.mrf.mxu1 }
 0x18a   :  { %v1673_v46 = vpop.f32.mrf.mxu0 }
 0x18b   :  { %v1674_v48 = vadd.f32 %v1673_v46, %v1588_v6 }
 0x18c   :  { %v9384_v23 = vpop.f32.mrf.mxu0 }
 0x193   :  { %v1749_v63 = vpop.f32.mrf.mxu1 }
 0x194   :  { %v1750_v26 = vadd.f32 %v1749_v63, %v1674_v48 }
 0x195   :  { %v9397_v37 = vpop.f32.mrf.mxu1 }
 0x196   :  { %v1769_v50 = vadd.f32 %v1767_v31, %v1750_v26  ;;  %v1753_v59 = vadd.f32 %v1750_v26, %v1246_v1 }
 0x198   :  { %1771 = vrot.lane.b32.xlu0 %v1769_v50, %s10536_s3  ;;  %v8413_v28 = vmul.f32 -1.442695, %v1753_v59 }
 0x19a   :  { %10347 = vpow2.f32 %v8413_v28  ;;  %v1799_v28 = vld [vmem:[#allocation2 + $0x8] sm:$0xff] }
 0x19c   :  { %1787 = vrot.lane.b32.xlu0 %v12699_v53, %s10537_s24 }
 0x1a0   :  { %2319 = vrot.lane.b32.xlu0 %v12700_v34, %s10535_s21 }
 0x1a7   :  { %v10348_v10 = vpop.eup %10347 }
 0x1a8   :  { %v1757_v14 = vadd.f32 1.0, %v10348_v10 }
 0x1aa   :  { %10349 = vrcp.f32 %v1757_v14 }
 0x1b7   :  { %v10350_v54 = vpop.eup %10349 }
 0x1b8   :  { %v1781_v51 = vsub.f32 1.0, %v10350_v54 }
 0x20a   :  { %v1772_v58 = vpop.permute.xlu0 %1771 }
 0x20b   :  { %v1774_v30 = vmul.f32 %v10350_v54, %v1772_v58 }
 0x20d   :  { %1776 = vrot.lane.b32.xlu1 %v1774_v30, %s10535_s21 }
 0x20e   :  { %v1788_v57 = vpop.permute.xlu0 %1787 }
 0x20f   :  { %v1790_v8 = vmul.f32 %v10350_v54, %v1788_v57 }
 0x212   :  { %v2320_v53 = vpop.permute.xlu0 %2319 }
 0x27f   :  { %v1777_v2 = vpop.permute.xlu1 %1776 }
 0x280   :  { %v1779_v29 = vadd.f32 %v1777_v2, %v1246_v1 }
 0x282   :  { %10351 = vtanh.f32 %v1779_v29 }
 0x28f   :  { %v10352_v32 = vpop.eup %10351 }
 0x290   :  { %1783 = vrot.lane.b32.xlu1 %v10352_v32, %s10538_s25 }
 0x302   :  { %v1784_v4 = vpop.permute.xlu1 %1783 }
 0x303   :  { %v1786_v41 = vmul.f32 %v1784_v4, %v1781_v51 }
 0x305   :  { %v1791_v21 = vadd.f32 %v1790_v8, %v1786_v41 }
 0x307   :  { %1793 = vrot.lane.b32.xlu1 %v1791_v21, %s10538_s25 }
 0x379   :  { %v1794_v15 = vpop.permute.xlu1 %1793 }
 0x37a   :  { %1796 = vst.msk [vmem:[#allocation3] sm:$0xff] %vm1243_vm0, %v1794_v15 }
 0x381   :  { %v11355_v35 = vld [vmem:[#allocation3] sm:$0xff] }
 0x382   :  { %v1806_v5 = vsel %vm1243_vm0, %v11355_v35, 0 }
 0x383   :  { %v1878_v0 = vand.u32 4294901760, %v1806_v5 }
 0x385   :  { %v1879_v38 = vsub.f32 %v1806_v5, %v1878_v0  ;;  %9422 = vmatmul.mubr.f32.vlgmr.msra.gmra.mxu1 %v1878_v0 }
 0x386   :  { %9438 = vmatpush3.msra.mxu1 %v12701_v25  ;;  %9447 = vmatprep.mubr.msk.f32.mxu1 %vm10534_vm3, %v12702_v55 }
 0x387   :  { %9439 = vmatprep.subr.mxu1 %v12702_v55  ;;  %v1880_v47 = vand.u32 4294901760, %v1879_v38 }
 0x388   :  { %9440 = vmatpush3.msra.mxu1 %v12703_v18 }
 0x389   :  { %9441 = vmatprep.subr.mxu1 %v12702_v55  ;;  %v1881_v3 = vsub.f32 %v1879_v38, %v1880_v47 }
 0x38a   :  { %9442 = vmatpush3.msra.mxu1 %v12704_v12 }
 0x38b   :  { %9443 = vmatprep.subr.mxu1 %v12702_v55  ;;  %v1882_v33 = vand.u32 4294901760, %v1881_v3 }
 0x38c   :  { %9444 = vmatpush3.msra.mxu1 %v12705_v9 }
 0x38d   :  { %9445 = vmatprep.subr.mxu1 %v12702_v55  ;;  %9409 = vmatmul.mubr.f32.vlgmr.msra.gmra.mxu0 %v1882_v33 }
 0x38e   :  { %9425 = vmatpush3.msra.mxu0 %v12706_v24  ;;  %9446 = vmatpush3.msra.mxu1 %v12707_v40 }
 0x38f   :  { %9426 = vmatprep.subr.mxu0 %v12702_v55  ;;  %9448 = vmatmul.mubr.f32.vlgmr.msra.gmra.mxu1 %v1880_v47 }
 0x390   :  { %9463 = vmatprep.subr.mxu1 %v12702_v55  ;;  %9427 = vmatpush3.msra.mxu0 %v12708_v20 }
 0x391   :  { %9464 = vmatpush3.msra.mxu1 %v12701_v25  ;;  %9428 = vmatprep.subr.mxu0 %v12702_v55 }
 0x392   :  { %9465 = vmatprep.subr.mxu1 %v12702_v55  ;;  %9429 = vmatpush3.msra.mxu0 %v12709_v13 }
 0x393   :  { %9466 = vmatpush3.msra.mxu1 %v12703_v18  ;;  %9430 = vmatprep.subr.mxu0 %v12702_v55 }
 0x394   :  { %9467 = vmatprep.subr.mxu1 %v12702_v55  ;;  %9431 = vmatpush3.msra.mxu0 %v12710_v17 }
 0x395   :  { %9468 = vmatpush3.msra.mxu1 %v12704_v12  ;;  %9432 = vmatprep.subr.mxu0 %v12702_v55 }
 0x396   :  { %9469 = vmatprep.subr.mxu1 %v12702_v55  ;;  %9433 = vmatpush3.msra.mxu0 %v12711_v39 }
 0x397   :  { %9434 = vmatprep.mubr.msk.f32.mxu0 %vm10534_vm3, %v12702_v55  ;;  %9470 = vmatpush3.msra.mxu1 %v12705_v9 }
 0x398   :  { %9435 = vmatmul.mubr.f32.vlgmr.msra.gmra.mxu0 %v1879_v38  ;;  %9450 = vmatprep.subr.mxu0 %v12702_v55 }
 0x399   :  { %9471 = vmatprep.subr.mxu1 %v12702_v55  ;;  %9451 = vmatpush3.msra.mxu0 %v12712_v16 }
 0x39a   :  { %9472 = vmatpush3.msra.mxu1 %v12707_v40  ;;  %9473 = vmatprep.mubr.msk.f32.mxu1 %vm10534_vm3, %v12702_v55 }
 0x39b   :  { %9452 = vmatprep.subr.mxu0 %v12702_v55  ;;  %9474 = vmatmul.mubr.f32.vlgmr.msra.gmra.mxu1 %v1878_v0 }
 0x39c   :  { %9453 = vmatpush3.msra.mxu0 %v12713_v43  ;;  %9460 = vmatprep.mubr.msk.f32.mxu0 %vm10534_vm3, %v12702_v55 }
 0x39d   :  { %9454 = vmatprep.subr.mxu0 %v12702_v55  ;;  %9489 = vmatprep.subr.mxu1 %v12702_v55 }
 0x39e   :  { %9455 = vmatpush3.msra.mxu0 %v12714_v19  ;;  %9490 = vmatpush3.msra.mxu1 %v12715_v61 }
 0x39f   :  { %9456 = vmatprep.subr.mxu0 %v12702_v55  ;;  %9491 = vmatprep.subr.mxu1 %v12702_v55 }
 0x3a0   :  { %9457 = vmatpush3.msra.mxu0 %v12716_v27  ;;  %9492 = vmatpush3.msra.mxu1 %v12717_v62 }
 0x3a1   :  { %9458 = vmatprep.subr.mxu0 %v12702_v55  ;;  %9493 = vmatprep.subr.mxu1 %v12702_v55 }
 0x3a2   :  { %9459 = vmatpush3.msra.mxu0 %v12718_v52  ;;  %9494 = vmatpush3.msra.mxu1 %v12719_v56 }
 0x3a3   :  { %9461 = vmatmul.mubr.f32.vlgmr.msra.gmra.mxu0 %v1878_v0  ;;  %9495 = vmatprep.subr.mxu1 %v12702_v55 }
 0x3a4   :  { %9496 = vmatpush3.msra.mxu1 %v12720_v60  ;;  %9476 = vmatprep.subr.mxu0 %v12702_v55 }
 0x3a5   :  { %9497 = vmatprep.subr.mxu1 %v12702_v55  ;;  %9477 = vmatpush3.msra.mxu0 %v12701_v25 }
 0x3a6   :  { %9498 = vmatpush3.msra.mxu1 %v12721_v49  ;;  %9478 = vmatprep.subr.mxu0 %v12702_v55 }
 0x3a7   :  { %9499 = vmatprep.mubr.msk.f32.mxu1 %vm10534_vm3, %v12702_v55  ;;  %9515 = vmatprep.subr.mxu1 %v12702_v55 }
 0x3a8   :  { %9479 = vmatpush3.msra.mxu0 %v12703_v18  ;;  %9486 = vmatprep.mubr.msk.f32.mxu0 %vm10534_vm3, %v12702_v55 }
 0x3a9   :  { %9480 = vmatprep.subr.mxu0 %v12702_v55 }
 0x3aa   :  { %9481 = vmatpush3.msra.mxu0 %v12704_v12 }
 0x3ab   :  { %9482 = vmatprep.subr.mxu0 %v12702_v55 }
 0x3ac   :  { %9483 = vmatpush3.msra.mxu0 %v12705_v9 }
 0x3ad   :  { %9484 = vmatprep.subr.mxu0 %v12702_v55 }
 0x3ae   :  { %9485 = vmatpush3.msra.mxu0 %v12707_v40 }
 0x3af   :  { %9502 = vmatprep.subr.mxu0 %v12702_v55 }
 0x445   :  { %v1980_v36 = vpop.f32.mrf.mxu1 }
 0x447   :  { %v9423_v7 = vpop.f32.mrf.mxu1 }
 0x44d   :  { %v1884_v45 = vpop.f32.mrf.mxu0 }
 0x44e   :  { %v1981_v6 = vadd.f32 %v1980_v36, %v1884_v45  ;;  %v2352_v36 = vld [vmem:[#allocation2 + $0x10] sm:$0xff] }
 0x44f   :  { %v2140_v42 = vpop.f32.mrf.mxu1  ;;  %v9410_v44 = vpop.f32.mrf.mxu0 }
 0x451   :  { %v9449_v22 = vpop.f32.mrf.mxu1 }
 0x458   :  { %v2062_v46 = vpop.f32.mrf.mxu0 }
 0x459   :  { %v2063_v63 = vadd.f32 %v2062_v46, %v1981_v6 }
 0x45a   :  { %v9436_v11 = vpop.f32.mrf.mxu0 }
 0x45b   :  { %v2302_v23 = vpop.f32.mrf.mxu1  ;;  %v2141_v31 = vadd.f32 %v2140_v42, %v2063_v63  ;;  %v2910_v63 = vld [vmem:[#allocation9 + $0x20] sm:$0xff] }
 0x45d   :  { %v9475_v48 = vpop.f32.mrf.mxu1 }
 0x463   :  { %v2226_v26 = vpop.f32.mrf.mxu0 }
 0x464   :  { %v2227_v37 = vadd.f32 %v2226_v26, %v2141_v31  ;;  %v11504_v31 = vand.u32 4294901760, %v2910_v63  ;;  %v2909_v26 = vld [vmem:[#allocation9 + $0x18] sm:$0xff] }
 0x465   :  { %v9462_v50 = vpop.f32.mrf.mxu0 }
 0x466   :  { %v2303_v1 = vadd.f32 %v2302_v23, %v2227_v37  ;;  %v11507_v37 = vsub.f32 %v2910_v63, %v11504_v31  ;;  %v11509_v50 = vand.u32 4294901760, %v2909_v26 }
 0x468   :  { %v2322_v59 = vadd.f32 %v2320_v53, %v2303_v1  ;;  %v2306_v10 = vadd.f32 %v2303_v1, %v1799_v28  ;;  %v2908_v53 = vld [vmem:[#allocation9 + $0x10] sm:$0xff]  ;;  %v11514_v1 = vand.u32 4294901760, %v11507_v37 }
 0x46a   :  { %2324 = vrot.lane.b32.xlu1 %v2322_v59, %s10536_s3  ;;  %v8415_v14 = vmul.f32 -1.442695, %v2306_v10  ;;  %v11517_v59 = vsub.f32 %v2909_v26, %v11509_v50  ;;  %v2907_v10 = vld [vmem:[#allocation9 + $0x8] sm:$0xff] }
 0x46b   :  { %v2905_v26 = vld [vmem:[#allocation2 + $0x18] sm:$0xff] }
 0x46c   :  { %10353 = vpow2.f32 %v8415_v14  ;;  %v3020_v14 = vsub.f32 %v11507_v37, %v11514_v1 }
 0x479   :  { %v10354_v54 = vpop.eup %10353 }
 0x47a   :  { %v2310_v58 = vadd.f32 1.0, %v10354_v54  ;;  %v11526_v54 = vand.u32 4294901760, %v11517_v59 }
 0x47c   :  { %10355 = vrcp.f32 %v2310_v58 }
 0x489   :  { %v10356_v30 = vpop.eup %10355 }
 0x48a   :  { %v2334_v8 = vsub.f32 1.0, %v10356_v30 }
 0x4dc   :  { %v2325_v2 = vpop.permute.xlu1 %2324 }
 0x4dd   :  { %v2327_v29 = vmul.f32 %v10356_v30, %v2325_v2  ;;  %v2906_v2 = vld [vmem:[#allocation9] sm:$0xff] }
 0x4df   :  { %2329 = vrot.lane.b32.xlu0 %v2327_v29, %s10535_s21  ;;  %v11535_v29 = vand.u32 4294901760, %v3020_v14 }
 0x4e3   :  { %2340 = vrot.lane.b32.xlu0 %v11355_v35, %s10537_s24 }
 0x4e7   :  { %2872 = vrot.lane.b32.xlu0 %v12700_v34, %s10535_s21 }
 0x551   :  { %v2330_v32 = vpop.permute.xlu0 %2329 }
 0x552   :  { %v2332_v57 = vadd.f32 %v2330_v32, %v1799_v28  ;;  %v11519_v28 = vand.u32 4294901760, %v2908_v53  ;;  %v3027_v32 = vsub.f32 %v11517_v59, %v11526_v54 }
 0x554   :  { %10357 = vtanh.f32 %v2332_v57  ;;  %v11529_v58 = vsub.f32 %v2908_v53, %v11519_v28 }
 0x555   :  { %v2341_v4 = vpop.permute.xlu0 %2340 }
 0x556   :  { %v2343_v21 = vmul.f32 %v10356_v30, %v2341_v4  ;;  %v11531_v30 = vand.u32 4294901760, %v2907_v10  ;;  %v11540_v57 = vand.u32 4294901760, %v11529_v58  ;;  %v11546_v4 = vand.u32 4294901760, %v2906_v2 }
 0x559   :  { %v2873_v56 = vpop.permute.xlu0 %2872 }
 0x561   :  { %v10358_v51 = vpop.eup %10357 }
 0x562   :  { %2336 = vrot.lane.b32.xlu1 %v10358_v51, %s10538_s25  ;;  %v11543_v51 = vsub.f32 %v2907_v10, %v11531_v30 }
 0x5d4   :  { %v2337_v41 = vpop.permute.xlu1 %2336 }
 0x5d5   :  { %v2339_v15 = vmul.f32 %v2337_v41, %v2334_v8  ;;  %v11550_v8 = vand.u32 4294901760, %v3027_v32  ;;  %v3034_v41 = vsub.f32 %v11529_v58, %v11540_v57 }
 0x5d7   :  { %v2344_v5 = vadd.f32 %v2343_v21, %v2339_v15  ;;  %v11555_v21 = vand.u32 4294901760, %v11543_v51  ;;  %v11559_v15 = vsub.f32 %v2906_v2, %v11546_v4 }
 0x5d9   :  { %2346 = vrot.lane.b32.xlu1 %v2344_v5, %s10538_s25  ;;  %v11563_v5 = vand.u32 4294901760, %v3034_v41 }
 0x64b   :  { %v2347_v0 = vpop.permute.xlu1 %2346 }
 0x64c   :  { %2349 = vst.msk [vmem:[#allocation3] sm:$0xff] %vm1243_vm0, %v2347_v0  ;;  %v3041_v0 = vsub.f32 %v11543_v51, %v11555_v21 }
 0x653   :  { %v11440_v35 = vld [vmem:[#allocation3] sm:$0xff] }
 0x654   :  { %v2359_v34 = vsel %vm1243_vm0, %v11440_v35, 0 }
 0x655   :  { %v2431_v38 = vand.u32 4294901760, %v2359_v34 }
 0x657   :  { %v2432_v47 = vsub.f32 %v2359_v34, %v2431_v38  ;;  %9500 = vmatmul.mubr.f32.vlgmr.msra.gmra.mxu1 %v2431_v38  ;;  %v11573_v34 = vand.u32 4294901760, %v3041_v0 }
 0x658   :  { %9516 = vmatpush3.msra.mxu1 %v12701_v25  ;;  %9525 = vmatprep.mubr.msk.f32.mxu1 %vm10534_vm3, %v12702_v55 }
 0x659   :  { %9517 = vmatprep.subr.mxu1 %v12702_v55  ;;  %v2433_v3 = vand.u32 4294901760, %v2432_v47 }
 0x65a   :  { %9518 = vmatpush3.msra.mxu1 %v12703_v18 }
 0x65b   :  { %9519 = vmatprep.subr.mxu1 %v12702_v55  ;;  %v2434_v33 = vsub.f32 %v2432_v47, %v2433_v3 }
 0x65c   :  { %9520 = vmatpush3.msra.mxu1 %v12704_v12 }
 0x65d   :  { %9521 = vmatprep.subr.mxu1 %v12702_v55  ;;  %v2435_v61 = vand.u32 4294901760, %v2434_v33 }
 0x65e   :  { %9522 = vmatpush3.msra.mxu1 %v12705_v9 }
 0x65f   :  { %9523 = vmatprep.subr.mxu1 %v12702_v55  ;;  %9487 = vmatmul.mubr.f32.vlgmr.msra.gmra.mxu0 %v2435_v61 }
 0x660   :  { %9503 = vmatpush3.msra.mxu0 %v12706_v24  ;;  %9524 = vmatpush3.msra.mxu1 %v12707_v40 }
 0x661   :  { %9504 = vmatprep.subr.mxu0 %v12702_v55  ;;  %9526 = vmatmul.mubr.f32.vlgmr.msra.gmra.mxu1 %v2433_v3 }
 0x662   :  { %9541 = vmatprep.subr.mxu1 %v12702_v55  ;;  %9505 = vmatpush3.msra.mxu0 %v12708_v20 }
 0x663   :  { %9542 = vmatpush3.msra.mxu1 %v12701_v25  ;;  %9506 = vmatprep.subr.mxu0 %v12702_v55 }
 0x664   :  { %9543 = vmatprep.subr.mxu1 %v12702_v55  ;;  %9507 = vmatpush3.msra.mxu0 %v12709_v13 }
 0x665   :  { %9544 = vmatpush3.msra.mxu1 %v12703_v18  ;;  %9508 = vmatprep.subr.mxu0 %v12702_v55 }
 0x666   :  { %9545 = vmatprep.subr.mxu1 %v12702_v55  ;;  %9509 = vmatpush3.msra.mxu0 %v12710_v17 }
 0x667   :  { %9546 = vmatpush3.msra.mxu1 %v12704_v12  ;;  %9510 = vmatprep.subr.mxu0 %v12702_v55 }
 0x668   :  { %9547 = vmatprep.subr.mxu1 %v12702_v55  ;;  %9511 = vmatpush3.msra.mxu0 %v12711_v39 }
 0x669   :  { %9512 = vmatprep.mubr.msk.f32.mxu0 %vm10534_vm3, %v12702_v55  ;;  %9548 = vmatpush3.msra.mxu1 %v12705_v9 }
 0x66a   :  { %9513 = vmatmul.mubr.f32.vlgmr.msra.gmra.mxu0 %v2432_v47  ;;  %9528 = vmatprep.subr.mxu0 %v12702_v55 }
 0x66b   :  { %9549 = vmatprep.subr.mxu1 %v12702_v55  ;;  %9529 = vmatpush3.msra.mxu0 %v12712_v16 }
 0x66c   :  { %9550 = vmatpush3.msra.mxu1 %v12707_v40  ;;  %9551 = vmatprep.mubr.msk.f32.mxu1 %vm10534_vm3, %v12702_v55 }
 0x66d   :  { %9530 = vmatprep.subr.mxu0 %v12702_v55  ;;  %9552 = vmatmul.mubr.f32.vlgmr.msra.gmra.mxu1 %v2431_v38 }
 0x66e   :  { %9531 = vmatpush3.msra.mxu0 %v12713_v43  ;;  %9538 = vmatprep.mubr.msk.f32.mxu0 %vm10534_vm3, %v12702_v55 }
 0x66f   :  { %9532 = vmatprep.subr.mxu0 %v12702_v55  ;;  %9567 = vmatprep.subr.mxu1 %v12702_v55 }
 0x670   :  { %9533 = vmatpush3.msra.mxu0 %v12714_v19  ;;  %9577 = vmatprep.mubr.msk.f32.mxu1 %vm10534_vm3, %v12702_v55 }
 0x671   :  { %9534 = vmatprep.subr.mxu0 %v12702_v55  ;;  %9568 = vmatpush3.msra.mxu1 %v11535_v29 }
 0x672   :  { %9535 = vmatpush3.msra.mxu0 %v12716_v27  ;;  %9569 = vmatprep.subr.mxu1 %v12702_v55 }
 0x673   :  { %9536 = vmatprep.subr.mxu0 %v12702_v55  ;;  %9570 = vmatpush3.msra.mxu1 %v11550_v8 }
 0x674   :  { %9537 = vmatpush3.msra.mxu0 %v12718_v52  ;;  %9571 = vmatprep.subr.mxu1 %v12702_v55 }
 0x675   :  { %9539 = vmatmul.mubr.f32.vlgmr.msra.gmra.mxu0 %v2431_v38  ;;  %9554 = vmatprep.subr.mxu0 %v12702_v55 }
 0x676   :  { %9564 = vmatprep.mubr.msk.f32.mxu0 %vm10534_vm3, %v12702_v55  ;;  %9555 = vmatpush3.msra.mxu0 %v11504_v31 }
 0x677   :  { %9556 = vmatprep.subr.mxu0 %v12702_v55  ;;  %9572 = vmatpush3.msra.mxu1 %v11563_v5 }
 0x678   :  { %9557 = vmatpush3.msra.mxu0 %v11509_v50  ;;  %9573 = vmatprep.subr.mxu1 %v12702_v55 }
 0x679   :  { %9558 = vmatprep.subr.mxu0 %v12702_v55  ;;  %9574 = vmatpush3.msra.mxu1 %v11573_v34 }
 0x67a   :  { %9559 = vmatpush3.msra.mxu0 %v11519_v28  ;;  %9575 = vmatprep.subr.mxu1 %v12702_v55 }
 0x67b   :  { %9560 = vmatprep.subr.mxu0 %v12702_v55 }
 0x67c   :  { %9561 = vmatpush3.msra.mxu0 %v11531_v30 }
 0x67d   :  { %9562 = vmatprep.subr.mxu0 %v12702_v55 }
 0x67e   :  { %9563 = vmatpush3.msra.mxu0 %v11546_v4 }
 0x67f   :  { %9580 = vmatprep.subr.mxu0 %v12702_v55 }
 0x717   :  { %v2533_v25 = vpop.f32.mrf.mxu1 }
 0x719   :  { %v9501_v18 = vpop.f32.mrf.mxu1 }
 0x71f   :  { %v2437_v12 = vpop.f32.mrf.mxu0 }
 0x720   :  { %v2534_v39 = vadd.f32 %v2533_v25, %v2437_v12 }
 0x721   :  { %v2693_v9 = vpop.f32.mrf.mxu1  ;;  %v9488_v24 = vpop.f32.mrf.mxu0 }
 0x723   :  { %v9527_v40 = vpop.f32.mrf.mxu1 }
 0x72a   :  { %v2615_v20 = vpop.f32.mrf.mxu0 }
 0x72b   :  { %v2616_v43 = vadd.f32 %v2615_v20, %v2534_v39 }
 0x72c   :  { %v9514_v13 = vpop.f32.mrf.mxu0 }
 0x72d   :  { %v2855_v17 = vpop.f32.mrf.mxu1  ;;  %v2694_v19 = vadd.f32 %v2693_v9, %v2616_v43  ;;  %v11590_v9 = vld [vmem:[%s12587_s4] ss:$0 sm:$0xff] }
 0x72f   :  { %v9553_v16 = vpop.f32.mrf.mxu1 }
 0x735   :  { %v2779_v27 = vpop.f32.mrf.mxu0 }
 0x736   :  { %v2780_v62 = vadd.f32 %v2779_v27, %v2694_v19 }
 0x737   :  { %v9540_v52 = vpop.f32.mrf.mxu0 }
 0x738   :  { %v2856_v60 = vadd.f32 %v2855_v17, %v2780_v62 }
 0x73a   :  { %v2875_v49 = vadd.f32 %v2873_v56, %v2856_v60  ;;  %v2859_v7 = vadd.f32 %v2856_v60, %v2352_v36 }
 0x73c   :  { %2877 = vrot.lane.b32.xlu1 %v2875_v49, %s10536_s3  ;;  %v8417_v45 = vmul.f32 -1.442695, %v2859_v7 }
 0x73e   :  { %10359 = vpow2.f32 %v8417_v45 }
 0x74b   :  { %v10360_v42 = vpop.eup %10359 }
 0x74c   :  { %v2863_v44 = vadd.f32 1.0, %v10360_v42 }
 0x74e   :  { %10361 = vrcp.f32 %v2863_v44 }
 0x75b   :  { %v11497_v22 = vpop.eup %10361 }
 0x75c   :  { %v2887_v3 = vsub.f32 1.0, %v11497_v22 }
 0x7ae   :  { %v2878_v46 = vpop.permute.xlu1 %2877 }
 0x7af   :  { %v2880_v11 = vmul.f32 %v11497_v22, %v2878_v46 }
 0x7b1   :  { %2882 = vrot.lane.b32.xlu0 %v2880_v11, %s10535_s21 }
 0x7b5   :  { %2893 = vrot.lane.b32.xlu0 %v11440_v35, %s10537_s24  ;;  %v11570_v35 = vand.u32 4294901760, %v11559_v15 }
 0x7b7   :  { %v3048_v47 = vsub.f32 %v11559_v15, %v11570_v35 }
 0x7b9   :  { %v11581_v61 = vand.u32 4294901760, %v3048_v47  ;;  %3425 = vrot.lane.b32.xlu0 %v11590_v9, %s10535_s21 }
 0x7bb   :  { %9576 = vmatpush3.msra.mxu1 %v11581_v61 }
 0x7bc   :  { %9593 = vmatprep.subr.mxu1 %v12702_v55 }
 0x823   :  { %v2883_v23 = vpop.permute.xlu0 %2882 }
 0x824   :  { %v2885_v6 = vadd.f32 %v2883_v23, %v2352_v36 }
 0x826   :  { %10363 = vtanh.f32 %v2885_v6 }
 0x827   :  { %v2894_v38 = vpop.permute.xlu0 %2893 }
 0x828   :  { %v2896_v25 = vmul.f32 %v11497_v22, %v2894_v38 }
 0x82b   :  { %v3426_v6 = vpop.permute.xlu0 %3425 }
 0x833   :  { %v10364_v48 = vpop.eup %10363 }
 0x834   :  { %2889 = vrot.lane.b32.xlu1 %v10364_v48, %s10538_s25 }
 0x8a6   :  { %v2890_v33 = vpop.permute.xlu1 %2889 }
 0x8a7   :  { %v2892_v18 = vmul.f32 %v2890_v33, %v2887_v3 }
 0x8a9   :  { %v2897_v12 = vadd.f32 %v2896_v25, %v2892_v18 }
 0x8ab   :  { %2899 = vrot.lane.b32.xlu1 %v2897_v12, %s10538_s25 }
 0x91d   :  { %v2900_v24 = vpop.permute.xlu1 %2899 }
 0x91e   :  { %2902 = vst.msk [vmem:[#allocation3] sm:$0xff] %vm1243_vm0, %v2900_v24 }
 0x925   :  { %v11595_v40 = vld [vmem:[#allocation3] sm:$0xff] }
 0x926   :  { %v2912_v20 = vsel %vm1243_vm0, %v11595_v40, 0 }
 0x927   :  { %v2984_v13 = vand.u32 4294901760, %v2912_v20 }
 0x929   :  { %v2985_v17 = vsub.f32 %v2912_v20, %v2984_v13  ;;  %9578 = vmatmul.mubr.f32.vlgmr.msra.gmra.mxu1 %v2984_v13 }
 0x92a   :  { %9594 = vmatpush3.msra.mxu1 %v11504_v31  ;;  %9603 = vmatprep.mubr.msk.f32.mxu1 %vm10534_vm3, %v12702_v55 }
 0x92b   :  { %9595 = vmatprep.subr.mxu1 %v12702_v55  ;;  %v2986_v39 = vand.u32 4294901760, %v2985_v17 }
 0x92c   :  { %9596 = vmatpush3.msra.mxu1 %v11509_v50 }
 0x92d   :  { %9597 = vmatprep.subr.mxu1 %v12702_v55  ;;  %v2987_v16 = vsub.f32 %v2985_v17, %v2986_v39 }
 0x92e   :  { %9598 = vmatpush3.msra.mxu1 %v11519_v28 }
 0x92f   :  { %9599 = vmatprep.subr.mxu1 %v12702_v55  ;;  %v2988_v43 = vand.u32 4294901760, %v2987_v16 }
 0x930   :  { %9600 = vmatpush3.msra.mxu1 %v11531_v30 }
 0x931   :  { %9601 = vmatprep.subr.mxu1 %v12702_v55  ;;  %9565 = vmatmul.mubr.f32.vlgmr.msra.gmra.mxu0 %v2988_v43 }
 0x932   :  { %9581 = vmatpush3.msra.mxu0 %v11507_v37  ;;  %9602 = vmatpush3.msra.mxu1 %v11546_v4 }
 0x933   :  { %9582 = vmatprep.subr.mxu0 %v12702_v55  ;;  %9604 = vmatmul.mubr.f32.vlgmr.msra.gmra.mxu1 %v2986_v39 }
 0x934   :  { %9619 = vmatprep.subr.mxu1 %v12702_v55  ;;  %9583 = vmatpush3.msra.mxu0 %v11517_v59 }
 0x935   :  { %9620 = vmatpush3.msra.mxu1 %v11504_v31  ;;  %9584 = vmatprep.subr.mxu0 %v12702_v55 }
 0x936   :  { %9621 = vmatprep.subr.mxu1 %v12702_v55  ;;  %9585 = vmatpush3.msra.mxu0 %v11529_v58 }
 0x937   :  { %9622 = vmatpush3.msra.mxu1 %v11509_v50  ;;  %9586 = vmatprep.subr.mxu0 %v12702_v55 }
 0x938   :  { %9623 = vmatprep.subr.mxu1 %v12702_v55  ;;  %9587 = vmatpush3.msra.mxu0 %v11543_v51 }
 0x939   :  { %9624 = vmatpush3.msra.mxu1 %v11519_v28  ;;  %9588 = vmatprep.subr.mxu0 %v12702_v55 }
 0x93a   :  { %9625 = vmatprep.subr.mxu1 %v12702_v55  ;;  %9589 = vmatpush3.msra.mxu0 %v11559_v15 }
 0x93b   :  { %9590 = vmatprep.mubr.msk.f32.mxu0 %vm10534_vm3, %v12702_v55  ;;  %9626 = vmatpush3.msra.mxu1 %v11531_v30 }
 0x93c   :  { %9591 = vmatmul.mubr.f32.vlgmr.msra.gmra.mxu0 %v2985_v17  ;;  %9606 = vmatprep.subr.mxu0 %v12702_v55 }
 0x93d   :  { %9627 = vmatprep.subr.mxu1 %v12702_v55  ;;  %9607 = vmatpush3.msra.mxu0 %v11514_v1 }
 0x93e   :  { %9628 = vmatpush3.msra.mxu1 %v11546_v4  ;;  %9629 = vmatprep.mubr.msk.f32.mxu1 %vm10534_vm3, %v12702_v55 }
 0x93f   :  { %9608 = vmatprep.subr.mxu0 %v12702_v55  ;;  %9630 = vmatmul.mubr.f32.vlgmr.msra.gmra.mxu1 %v2984_v13 }
 0x940   :  { %9609 = vmatpush3.msra.mxu0 %v11526_v54  ;;  %9616 = vmatprep.mubr.msk.f32.mxu0 %vm10534_vm3, %v12702_v55 }
 0x941   :  { %9610 = vmatprep.subr.mxu0 %v12702_v55  ;;  %9645 = vmatprep.subr.mxu1 %v12702_v55 }
 0x942   :  { %9611 = vmatpush3.msra.mxu0 %v11540_v57  ;;  %9646 = vmatpush3.msra.mxu1 %v11535_v29 }
 0x943   :  { %9612 = vmatprep.subr.mxu0 %v12702_v55  ;;  %9647 = vmatprep.subr.mxu1 %v12702_v55 }
 0x944   :  { %9613 = vmatpush3.msra.mxu0 %v11555_v21  ;;  %9648 = vmatpush3.msra.mxu1 %v11550_v8 }
 0x945   :  { %9614 = vmatprep.subr.mxu0 %v12702_v55  ;;  %9649 = vmatprep.subr.mxu1 %v12702_v55 }
 0x946   :  { %9615 = vmatpush3.msra.mxu0 %v11570_v35  ;;  %9650 = vmatpush3.msra.mxu1 %v11563_v5 }
 0x947   :  { %9617 = vmatmul.mubr.f32.vlgmr.msra.gmra.mxu0 %v2984_v13  ;;  %9651 = vmatprep.subr.mxu1 %v12702_v55 }
 0x948   :  { %9652 = vmatpush3.msra.mxu1 %v11573_v34  ;;  %9632 = vmatprep.subr.mxu0 %v12702_v55 }
 0x949   :  { %9653 = vmatprep.subr.mxu1 %v12702_v55  ;;  %9633 = vmatpush3.msra.mxu0 %v11504_v31 }
 0x94a   :  { %9654 = vmatpush3.msra.mxu1 %v11581_v61  ;;  %9634 = vmatprep.subr.mxu0 %v12702_v55 }
 0x94b   :  { %9655 = vmatprep.mubr.msk.f32.mxu1 %vm10534_vm3, %v12702_v55  ;;  %9671 = vmatprep.subr.mxu1 %v12702_v55 }
 0x94c   :  { %9635 = vmatpush3.msra.mxu0 %v11509_v50  ;;  %9642 = vmatprep.mubr.msk.f32.mxu0 %vm10534_vm3, %v12702_v55 }
 0x94d   :  { %9636 = vmatprep.subr.mxu0 %v12702_v55 }
 0x94e   :  { %9637 = vmatpush3.msra.mxu0 %v11519_v28 }
 0x94f   :  { %9638 = vmatprep.subr.mxu0 %v12702_v55 }
 0x950   :  { %9639 = vmatpush3.msra.mxu0 %v11531_v30 }
 0x951   :  { %9640 = vmatprep.subr.mxu0 %v12702_v55 }
 0x952   :  { %9641 = vmatpush3.msra.mxu0 %v11546_v4 }
 0x953   :  { %9658 = vmatprep.subr.mxu0 %v12702_v55 }
 0x9e9   :  { %v3086_v19 = vpop.f32.mrf.mxu1 }
 0x9eb   :  { %v9579_v27 = vpop.f32.mrf.mxu1 }
 0x9f1   :  { %v2990_v62 = vpop.f32.mrf.mxu0 }
 0x9f2   :  { %v3087_v45 = vadd.f32 %v3086_v19, %v2990_v62 }
 0x9f3   :  { %v3246_v52 = vpop.f32.mrf.mxu1  ;;  %v9566_v56 = vpop.f32.mrf.mxu0 }
 0x9f5   :  { %v9605_v60 = vpop.f32.mrf.mxu1 }
 0x9fc   :  { %v3168_v49 = vpop.f32.mrf.mxu0 }
 0x9fd   :  { %v3169_v44 = vadd.f32 %v3168_v49, %v3087_v45 }
 0x9fe   :  { %v9592_v36 = vpop.f32.mrf.mxu0 }
 0x9ff   :  { %v3408_v7 = vpop.f32.mrf.mxu1  ;;  %v3247_v22 = vadd.f32 %v3246_v52, %v3169_v44 }
 0xa01   :  { %v9631_v42 = vpop.f32.mrf.mxu1 }
 0xa07   :  { %v3332_v46 = vpop.f32.mrf.mxu0 }
 0xa08   :  { %v3333_v11 = vadd.f32 %v3332_v46, %v3247_v22 }
 0xa09   :  { %v9618_v23 = vpop.f32.mrf.mxu0 }
 0xa0a   :  { %v3409_v48 = vadd.f32 %v3408_v7, %v3333_v11 }
 0xa0c   :  { %v3428_v63 = vadd.f32 %v3426_v6, %v3409_v48  ;;  %v3412_v53 = vadd.f32 %v3409_v48, %v2905_v26 }
 0xa0e   :  { %3430 = vrot.lane.b32.xlu1 %v3428_v63, %s10536_s3  ;;  %v8419_v10 = vmul.f32 -1.442695, %v3412_v53 }
 0xa10   :  { %10365 = vpow2.f32 %v8419_v10  ;;  %v3458_v10 = vld [vmem:[#allocation2 + $0x20] sm:$0xff] }
 0xa1d   :  { %v10366_v14 = vpop.eup %10365 }
 0xa1e   :  { %v3416_v2 = vadd.f32 1.0, %v10366_v14 }
 0xa20   :  { %10367 = vrcp.f32 %v3416_v2 }
 0xa2d   :  { %v10368_v32 = vpop.eup %10367 }
 0xa2e   :  { %v3440_v25 = vsub.f32 1.0, %v10368_v32 }
 0xa80   :  { %v3431_v41 = vpop.permute.xlu1 %3430 }
 0xa81   :  { %v3433_v0 = vmul.f32 %v10368_v32, %v3431_v41 }
 0xa83   :  { %3435 = vrot.lane.b32.xlu0 %v3433_v0, %s10535_s21 }
 0xa87   :  { %3446 = vrot.lane.b32.xlu0 %v11595_v40, %s10537_s24 }
 0xa8b   :  { %3978 = vrot.lane.b32.xlu0 %v11590_v9, %s10535_s21 }
 0xaf5   :  { %v3436_v38 = vpop.permute.xlu0 %3435 }
 0xaf6   :  { %v3438_v47 = vadd.f32 %v3436_v38, %v2905_v26 }
 0xaf8   :  { %10369 = vtanh.f32 %v3438_v47 }
 0xaf9   :  { %v3447_v33 = vpop.permute.xlu0 %3446 }
 0xafa   :  { %v3449_v12 = vmul.f32 %v10368_v32, %v3447_v33 }
 0xafd   :  { %v3979_v63 = vpop.permute.xlu0 %3978 }
 0xb05   :  { %v10370_v3 = vpop.eup %10369 }
 0xb06   :  { %3442 = vrot.lane.b32.xlu1 %v10370_v3, %s10538_s25 }
 0xb78   :  { %v3443_v18 = vpop.permute.xlu1 %3442 }
 0xb79   :  { %v3445_v24 = vmul.f32 %v3443_v18, %v3440_v25 }
 0xb7b   :  { %v3450_v20 = vadd.f32 %v3449_v12, %v3445_v24 }
 0xb7d   :  { %3452 = vrot.lane.b32.xlu1 %v3450_v20, %s10538_s25 }
 0xbef   :  { %v3453_v13 = vpop.permute.xlu1 %3452 }
 0xbf0   :  { %3455 = vst.msk [vmem:[#allocation3] sm:$0xff] %vm1243_vm0, %v3453_v13 }
 0xbf7   :  { %v11680_v40 = vld [vmem:[#allocation3] sm:$0xff] }
 0xbf8   :  { %v3465_v17 = vsel %vm1243_vm0, %v11680_v40, 0 }
 0xbf9   :  { %v3537_v39 = vand.u32 4294901760, %v3465_v17 }
 0xbfb   :  { %v3538_v16 = vsub.f32 %v3465_v17, %v3537_v39  ;;  %9656 = vmatmul.mubr.f32.vlgmr.msra.gmra.mxu1 %v3537_v39 }
 0xbfc   :  { %9672 = vmatpush3.msra.mxu1 %v11504_v31  ;;  %9681 = vmatprep.mubr.msk.f32.mxu1 %vm10534_vm3, %v12702_v55 }
 0xbfd   :  { %9673 = vmatprep.subr.mxu1 %v12702_v55  ;;  %v3539_v43 = vand.u32 4294901760, %v3538_v16 }
 0xbfe   :  { %9674 = vmatpush3.msra.mxu1 %v11509_v50 }
 0xbff   :  { %9675 = vmatprep.subr.mxu1 %v12702_v55  ;;  %v3540_v19 = vsub.f32 %v3538_v16, %v3539_v43 }
 0xc00   :  { %9676 = vmatpush3.msra.mxu1 %v11519_v28 }
 0xc01   :  { %9677 = vmatprep.subr.mxu1 %v12702_v55  ;;  %v3541_v27 = vand.u32 4294901760, %v3540_v19 }
 0xc02   :  { %9678 = vmatpush3.msra.mxu1 %v11531_v30 }
 0xc03   :  { %9679 = vmatprep.subr.mxu1 %v12702_v55  ;;  %9643 = vmatmul.mubr.f32.vlgmr.msra.gmra.mxu0 %v3541_v27 }
 0xc04   :  { %9659 = vmatpush3.msra.mxu0 %v11507_v37  ;;  %9680 = vmatpush3.msra.mxu1 %v11546_v4 }
 0xc05   :  { %9660 = vmatprep.subr.mxu0 %v12702_v55  ;;  %9682 = vmatmul.mubr.f32.vlgmr.msra.gmra.mxu1 %v3539_v43 }
 0xc06   :  { %9697 = vmatprep.subr.mxu1 %v12702_v55  ;;  %9661 = vmatpush3.msra.mxu0 %v11517_v59 }
 0xc07   :  { %9698 = vmatpush3.msra.mxu1 %v11504_v31  ;;  %9662 = vmatprep.subr.mxu0 %v12702_v55 }
 0xc08   :  { %9699 = vmatprep.subr.mxu1 %v12702_v55  ;;  %9663 = vmatpush3.msra.mxu0 %v11529_v58 }
 0xc09   :  { %9700 = vmatpush3.msra.mxu1 %v11509_v50  ;;  %9664 = vmatprep.subr.mxu0 %v12702_v55 }
 0xc0a   :  { %9701 = vmatprep.subr.mxu1 %v12702_v55  ;;  %9665 = vmatpush3.msra.mxu0 %v11543_v51 }
 0xc0b   :  { %9702 = vmatpush3.msra.mxu1 %v11519_v28  ;;  %9666 = vmatprep.subr.mxu0 %v12702_v55 }
 0xc0c   :  { %9703 = vmatprep.subr.mxu1 %v12702_v55  ;;  %9667 = vmatpush3.msra.mxu0 %v11559_v15 }
 0xc0d   :  { %9668 = vmatprep.mubr.msk.f32.mxu0 %vm10534_vm3, %v12702_v55  ;;  %9704 = vmatpush3.msra.mxu1 %v11531_v30 }
 0xc0e   :  { %9669 = vmatmul.mubr.f32.vlgmr.msra.gmra.mxu0 %v3538_v16  ;;  %9684 = vmatprep.subr.mxu0 %v12702_v55 }
 0xc0f   :  { %9705 = vmatprep.subr.mxu1 %v12702_v55  ;;  %9685 = vmatpush3.msra.mxu0 %v11514_v1 }
 0xc10   :  { %9706 = vmatpush3.msra.mxu1 %v11546_v4  ;;  %9707 = vmatprep.mubr.msk.f32.mxu1 %vm10534_vm3, %v12702_v55 }
 0xc11   :  { %9686 = vmatprep.subr.mxu0 %v12702_v55  ;;  %9708 = vmatmul.mubr.f32.vlgmr.msra.gmra.mxu1 %v3537_v39 }
 0xc12   :  { %9687 = vmatpush3.msra.mxu0 %v11526_v54  ;;  %9694 = vmatprep.mubr.msk.f32.mxu0 %vm10534_vm3, %v12702_v55 }
 0xc13   :  { %9688 = vmatprep.subr.mxu0 %v12702_v55  ;;  %9723 = vmatprep.subr.mxu1 %v12702_v55 }
 0xc14   :  { %9689 = vmatpush3.msra.mxu0 %v11540_v57  ;;  %9724 = vmatpush3.msra.mxu1 %v11535_v29 }
 0xc15   :  { %9690 = vmatprep.subr.mxu0 %v12702_v55  ;;  %9725 = vmatprep.subr.mxu1 %v12702_v55 }
 0xc16   :  { %9691 = vmatpush3.msra.mxu0 %v11555_v21  ;;  %9726 = vmatpush3.msra.mxu1 %v11550_v8 }
 0xc17   :  { %9692 = vmatprep.subr.mxu0 %v12702_v55  ;;  %9727 = vmatprep.subr.mxu1 %v12702_v55 }
 0xc18   :  { %9693 = vmatpush3.msra.mxu0 %v11570_v35  ;;  %9728 = vmatpush3.msra.mxu1 %v11563_v5 }
 0xc19   :  { %9695 = vmatmul.mubr.f32.vlgmr.msra.gmra.mxu0 %v3537_v39  ;;  %9729 = vmatprep.subr.mxu1 %v12702_v55 }
 0xc1a   :  { %9730 = vmatpush3.msra.mxu1 %v11573_v34  ;;  %9710 = vmatprep.subr.mxu0 %v12702_v55 }
 0xc1b   :  { %9731 = vmatprep.subr.mxu1 %v12702_v55  ;;  %9711 = vmatpush3.msra.mxu0 %v11504_v31 }
 0xc1c   :  { %9732 = vmatpush3.msra.mxu1 %v11581_v61  ;;  %9712 = vmatprep.subr.mxu0 %v12702_v55 }
 0xc1d   :  { %9733 = vmatprep.mubr.msk.f32.mxu1 %vm10534_vm3, %v12702_v55  ;;  %9749 = vmatprep.subr.mxu1 %v12702_v55 }
 0xc1e   :  { %9713 = vmatpush3.msra.mxu0 %v11509_v50  ;;  %9720 = vmatprep.mubr.msk.f32.mxu0 %vm10534_vm3, %v12702_v55 }
 0xc1f   :  { %9714 = vmatprep.subr.mxu0 %v12702_v55 }
 0xc20   :  { %9715 = vmatpush3.msra.mxu0 %v11519_v28 }
 0xc21   :  { %9716 = vmatprep.subr.mxu0 %v12702_v55 }
 0xc22   :  { %9717 = vmatpush3.msra.mxu0 %v11531_v30 }
 0xc23   :  { %9718 = vmatprep.subr.mxu0 %v12702_v55 }
 0xc24   :  { %9719 = vmatpush3.msra.mxu0 %v11546_v4 }
 0xc25   :  { %9736 = vmatprep.subr.mxu0 %v12702_v55 }
 0xcbb   :  { %v3639_v62 = vpop.f32.mrf.mxu1 }
 0xcbd   :  { %v9657_v52 = vpop.f32.mrf.mxu1 }
 0xcc3   :  { %v3543_v56 = vpop.f32.mrf.mxu0 }
 0xcc4   :  { %v3640_v44 = vadd.f32 %v3639_v62, %v3543_v56 }
 0xcc5   :  { %v3799_v60 = vpop.f32.mrf.mxu1  ;;  %v9644_v49 = vpop.f32.mrf.mxu0 }
 0xcc7   :  { %v9683_v36 = vpop.f32.mrf.mxu1 }
 0xcce   :  { %v3721_v7 = vpop.f32.mrf.mxu0 }
 0xccf   :  { %v3722_v46 = vadd.f32 %v3721_v7, %v3640_v44 }
 0xcd0   :  { %v9670_v45 = vpop.f32.mrf.mxu0 }
 0xcd1   :  { %v3961_v42 = vpop.f32.mrf.mxu1  ;;  %v3800_v11 = vadd.f32 %v3799_v60, %v3722_v46 }
 0xcd3   :  { %v9709_v22 = vpop.f32.mrf.mxu1 }
 0xcd9   :  { %v3885_v23 = vpop.f32.mrf.mxu0 }
 0xcda   :  { %v3886_v6 = vadd.f32 %v3885_v23, %v3800_v11 }
 0xcdb   :  { %v9696_v48 = vpop.f32.mrf.mxu0 }
 0xcdc   :  { %v3962_v26 = vadd.f32 %v3961_v42, %v3886_v6 }
 0xcde   :  { %v3981_v53 = vadd.f32 %v3979_v63, %v3962_v26  ;;  %v3965_v14 = vadd.f32 %v3962_v26, %v3458_v10  ;;  %v4011_v63 = vld [vmem:[#allocation2 + $0x28] sm:$0xff] }
 0xce0   :  { %3983 = vrot.lane.b32.xlu1 %v3981_v53, %s10536_s3  ;;  %v8421_v2 = vmul.f32 -1.442695, %v3965_v14 }
 0xce2   :  { %10371 = vpow2.f32 %v8421_v2 }
 0xcef   :  { %v10372_v32 = vpop.eup %10371 }
 0xcf0   :  { %v3969_v41 = vadd.f32 1.0, %v10372_v32 }
 0xcf2   :  { %10373 = vrcp.f32 %v3969_v41 }
 0xcff   :  { %v10374_v0 = vpop.eup %10373 }
 0xd00   :  { %v3993_v12 = vsub.f32 1.0, %v10374_v0 }
 0xd52   :  { %v3984_v38 = vpop.permute.xlu1 %3983 }
 0xd53   :  { %v3986_v47 = vmul.f32 %v10374_v0, %v3984_v38 }
 0xd55   :  { %3988 = vrot.lane.b32.xlu0 %v3986_v47, %s10535_s21 }
 0xd59   :  { %3999 = vrot.lane.b32.xlu0 %v11680_v40, %s10537_s24 }
 0xd5d   :  { %4531 = vrot.lane.b32.xlu0 %v11590_v9, %s10535_s21 }
 0xdc7   :  { %v3989_v3 = vpop.permute.xlu0 %3988 }
 0xdc8   :  { %v3991_v33 = vadd.f32 %v3989_v3, %v3458_v10 }
 0xdca   :  { %10375 = vtanh.f32 %v3991_v33 }
 0xdcb   :  { %v4000_v18 = vpop.permute.xlu0 %3999 }
 0xdcc   :  { %v4002_v20 = vmul.f32 %v10374_v0, %v4000_v18 }
 0xdcf   :  { %v4532_v23 = vpop.permute.xlu0 %4531 }
 0xdd7   :  { %v10376_v25 = vpop.eup %10375 }
 0xdd8   :  { %3995 = vrot.lane.b32.xlu1 %v10376_v25, %s10538_s25 }
 0xe4a   :  { %v3996_v24 = vpop.permute.xlu1 %3995 }
 0xe4b   :  { %v3998_v13 = vmul.f32 %v3996_v24, %v3993_v12 }
 0xe4d   :  { %v4003_v17 = vadd.f32 %v4002_v20, %v3998_v13 }
 0xe4f   :  { %4005 = vrot.lane.b32.xlu1 %v4003_v17, %s10538_s25 }
 0xec1   :  { %v4006_v39 = vpop.permute.xlu1 %4005 }
 0xec2   :  { %4008 = vst.msk [vmem:[#allocation3] sm:$0xff] %vm1243_vm0, %v4006_v39 }
 0xec9   :  { %v11765_v40 = vld [vmem:[#allocation3] sm:$0xff] }
 0xeca   :  { %v4018_v16 = vsel %vm1243_vm0, %v11765_v40, 0 }
 0xecb   :  { %v4090_v43 = vand.u32 4294901760, %v4018_v16 }
 0xecd   :  { %v4091_v19 = vsub.f32 %v4018_v16, %v4090_v43  ;;  %9734 = vmatmul.mubr.f32.vlgmr.msra.gmra.mxu1 %v4090_v43 }
 0xece   :  { %9750 = vmatpush3.msra.mxu1 %v11504_v31  ;;  %9759 = vmatprep.mubr.msk.f32.mxu1 %vm10534_vm3, %v12702_v55 }
 0xecf   :  { %9751 = vmatprep.subr.mxu1 %v12702_v55  ;;  %v4092_v27 = vand.u32 4294901760, %v4091_v19 }
 0xed0   :  { %9752 = vmatpush3.msra.mxu1 %v11509_v50 }
 0xed1   :  { %9753 = vmatprep.subr.mxu1 %v12702_v55  ;;  %v4093_v62 = vsub.f32 %v4091_v19, %v4092_v27 }
 0xed2   :  { %9754 = vmatpush3.msra.mxu1 %v11519_v28 }
 0xed3   :  { %9755 = vmatprep.subr.mxu1 %v12702_v55  ;;  %v4094_v52 = vand.u32 4294901760, %v4093_v62 }
 0xed4   :  { %9756 = vmatpush3.msra.mxu1 %v11531_v30 }
 0xed5   :  { %9757 = vmatprep.subr.mxu1 %v12702_v55  ;;  %9721 = vmatmul.mubr.f32.vlgmr.msra.gmra.mxu0 %v4094_v52 }
 0xed6   :  { %9737 = vmatpush3.msra.mxu0 %v11507_v37  ;;  %9758 = vmatpush3.msra.mxu1 %v11546_v4 }
 0xed7   :  { %9738 = vmatprep.subr.mxu0 %v12702_v55  ;;  %9760 = vmatmul.mubr.f32.vlgmr.msra.gmra.mxu1 %v4092_v27 }
 0xed8   :  { %9775 = vmatprep.subr.mxu1 %v12702_v55  ;;  %9739 = vmatpush3.msra.mxu0 %v11517_v59 }
 0xed9   :  { %9776 = vmatpush3.msra.mxu1 %v11504_v31  ;;  %9740 = vmatprep.subr.mxu0 %v12702_v55 }
 0xeda   :  { %9777 = vmatprep.subr.mxu1 %v12702_v55  ;;  %9741 = vmatpush3.msra.mxu0 %v11529_v58 }
 0xedb   :  { %9778 = vmatpush3.msra.mxu1 %v11509_v50  ;;  %9742 = vmatprep.subr.mxu0 %v12702_v55 }
 0xedc   :  { %9779 = vmatprep.subr.mxu1 %v12702_v55  ;;  %9743 = vmatpush3.msra.mxu0 %v11543_v51 }
 0xedd   :  { %9780 = vmatpush3.msra.mxu1 %v11519_v28  ;;  %9744 = vmatprep.subr.mxu0 %v12702_v55 }
 0xede   :  { %9781 = vmatprep.subr.mxu1 %v12702_v55  ;;  %9745 = vmatpush3.msra.mxu0 %v11559_v15 }
 0xedf   :  { %9746 = vmatprep.mubr.msk.f32.mxu0 %vm10534_vm3, %v12702_v55  ;;  %9782 = vmatpush3.msra.mxu1 %v11531_v30 }
 0xee0   :  { %9747 = vmatmul.mubr.f32.vlgmr.msra.gmra.mxu0 %v4091_v19  ;;  %9762 = vmatprep.subr.mxu0 %v12702_v55 }
 0xee1   :  { %9783 = vmatprep.subr.mxu1 %v12702_v55  ;;  %9763 = vmatpush3.msra.mxu0 %v11514_v1 }
 0xee2   :  { %9784 = vmatpush3.msra.mxu1 %v11546_v4  ;;  %9785 = vmatprep.mubr.msk.f32.mxu1 %vm10534_vm3, %v12702_v55 }
 0xee3   :  { %9764 = vmatprep.subr.mxu0 %v12702_v55  ;;  %9786 = vmatmul.mubr.f32.vlgmr.msra.gmra.mxu1 %v4090_v43 }
 0xee4   :  { %9765 = vmatpush3.msra.mxu0 %v11526_v54  ;;  %9772 = vmatprep.mubr.msk.f32.mxu0 %vm10534_vm3, %v12702_v55 }
 0xee5   :  { %9766 = vmatprep.subr.mxu0 %v12702_v55  ;;  %9801 = vmatprep.subr.mxu1 %v12702_v55 }
 0xee6   :  { %9767 = vmatpush3.msra.mxu0 %v11540_v57  ;;  %9802 = vmatpush3.msra.mxu1 %v11535_v29 }
 0xee7   :  { %9768 = vmatprep.subr.mxu0 %v12702_v55  ;;  %9803 = vmatprep.subr.mxu1 %v12702_v55 }
 0xee8   :  { %9769 = vmatpush3.msra.mxu0 %v11555_v21  ;;  %9804 = vmatpush3.msra.mxu1 %v11550_v8 }
 0xee9   :  { %9770 = vmatprep.subr.mxu0 %v12702_v55  ;;  %9805 = vmatprep.subr.mxu1 %v12702_v55 }
 0xeea   :  { %9771 = vmatpush3.msra.mxu0 %v11570_v35  ;;  %9806 = vmatpush3.msra.mxu1 %v11563_v5 }
 0xeeb   :  { %9773 = vmatmul.mubr.f32.vlgmr.msra.gmra.mxu0 %v4090_v43  ;;  %9807 = vmatprep.subr.mxu1 %v12702_v55 }
 0xeec   :  { %9808 = vmatpush3.msra.mxu1 %v11573_v34  ;;  %9788 = vmatprep.subr.mxu0 %v12702_v55 }
 0xeed   :  { %9809 = vmatprep.subr.mxu1 %v12702_v55  ;;  %9789 = vmatpush3.msra.mxu0 %v11504_v31 }
 0xeee   :  { %9810 = vmatpush3.msra.mxu1 %v11581_v61  ;;  %9790 = vmatprep.subr.mxu0 %v12702_v55 }
 0xeef   :  { %9811 = vmatprep.mubr.msk.f32.mxu1 %vm10534_vm3, %v12702_v55  ;;  %9827 = vmatprep.subr.mxu1 %v12702_v55 }
 0xef0   :  { %9791 = vmatpush3.msra.mxu0 %v11509_v50  ;;  %9798 = vmatprep.mubr.msk.f32.mxu0 %vm10534_vm3, %v12702_v55 }
 0xef1   :  { %9792 = vmatprep.subr.mxu0 %v12702_v55 }
 0xef2   :  { %9793 = vmatpush3.msra.mxu0 %v11519_v28 }
 0xef3   :  { %9794 = vmatprep.subr.mxu0 %v12702_v55 }
 0xef4   :  { %9795 = vmatpush3.msra.mxu0 %v11531_v30 }
 0xef5   :  { %9796 = vmatprep.subr.mxu0 %v12702_v55 }
 0xef6   :  { %9797 = vmatpush3.msra.mxu0 %v11546_v4 }
 0xef7   :  { %9814 = vmatprep.subr.mxu0 %v12702_v55 }
 0xf8d   :  { %v4192_v29 = vpop.f32.mrf.mxu1 }
 0xf8f   :  { %v9735_v8 = vpop.f32.mrf.mxu1 }
 0xf95   :  { %v4096_v5 = vpop.f32.mrf.mxu0 }
 0xf96   :  { %v4193_v7 = vadd.f32 %v4192_v29, %v4096_v5  ;;  %v4564_v29 = vld [vmem:[#allocation2 + $0x30] sm:$0xff] }
 0xf97   :  { %v4352_v34 = vpop.f32.mrf.mxu1  ;;  %v9722_v61 = vpop.f32.mrf.mxu0 }
 0xf99   :  { %v9761_v56 = vpop.f32.mrf.mxu1 }
 0xfa0   :  { %v4274_v60 = vpop.f32.mrf.mxu0 }
 0xfa1   :  { %v4275_v42 = vadd.f32 %v4274_v60, %v4193_v7 }
 0xfa2   :  { %v9748_v49 = vpop.f32.mrf.mxu0 }
 0xfa3   :  { %v4514_v36 = vpop.f32.mrf.mxu1  ;;  %v4353_v44 = vadd.f32 %v4352_v34, %v4275_v42  ;;  %v5122_v42 = vld [vmem:[#allocation9 + $0x20] sm:$0xff] }
 0xfa5   :  { %v9787_v45 = vpop.f32.mrf.mxu1 }
 0xfab   :  { %v4438_v22 = vpop.f32.mrf.mxu0 }
 0xfac   :  { %v4439_v46 = vadd.f32 %v4438_v22, %v4353_v44  ;;  %v11914_v44 = vand.u32 4294901760, %v5122_v42  ;;  %v5121_v22 = vld [vmem:[#allocation9 + $0x18] sm:$0xff] }
 0xfad   :  { %v9774_v11 = vpop.f32.mrf.mxu0 }
 0xfae   :  { %v4515_v6 = vadd.f32 %v4514_v36, %v4439_v46  ;;  %v11917_v46 = vsub.f32 %v5122_v42, %v11914_v44  ;;  %v11919_v11 = vand.u32 4294901760, %v5121_v22 }
 0xfb0   :  { %v4534_v48 = vadd.f32 %v4532_v23, %v4515_v6  ;;  %v4518_v26 = vadd.f32 %v4515_v6, %v4011_v63  ;;  %v5120_v23 = vld [vmem:[#allocation9 + $0x10] sm:$0xff]  ;;  %v11924_v6 = vand.u32 4294901760, %v11917_v46 }
 0xfb2   :  { %4536 = vrot.lane.b32.xlu1 %v4534_v48, %s10536_s3  ;;  %v8423_v53 = vmul.f32 -1.442695, %v4518_v26  ;;  %v11927_v48 = vsub.f32 %v5121_v22, %v11919_v11  ;;  %v5119_v26 = vld [vmem:[#allocation9 + $0x8] sm:$0xff] }
 0xfb3   :  { %v5117_v22 = vld [vmem:[#allocation2 + $0x38] sm:$0xff] }
 0xfb4   :  { %10377 = vpow2.f32 %v8423_v53  ;;  %v5232_v53 = vsub.f32 %v11917_v46, %v11924_v6 }
 0xfc1   :  { %v10378_v10 = vpop.eup %10377 }
 0xfc2   :  { %v4522_v14 = vadd.f32 1.0, %v10378_v10  ;;  %v11936_v10 = vand.u32 4294901760, %v11927_v48 }
 0xfc4   :  { %10379 = vrcp.f32 %v4522_v14 }
 0xfd1   :  { %v10380_v2 = vpop.eup %10379 }
 0xfd2   :  { %v4546_v33 = vsub.f32 1.0, %v10380_v2 }
0x1024   :  { %v4537_v32 = vpop.permute.xlu1 %4536 }
0x1025   :  { %v4539_v41 = vmul.f32 %v10380_v2, %v4537_v32  ;;  %v5118_v32 = vld [vmem:[#allocation9] sm:$0xff] }
0x1027   :  { %4541 = vrot.lane.b32.xlu0 %v4539_v41, %s10535_s21  ;;  %v11945_v41 = vand.u32 4294901760, %v5232_v53 }
0x102b   :  { %4552 = vrot.lane.b32.xlu0 %v11765_v40, %s10537_s24 }
0x102f   :  { %5084 = vrot.lane.b32.xlu0 %v11590_v9, %s10535_s21 }
0x1099   :  { %v4542_v0 = vpop.permute.xlu0 %4541 }
0x109a   :  { %v4544_v38 = vadd.f32 %v4542_v0, %v4011_v63  ;;  %v11929_v63 = vand.u32 4294901760, %v5120_v23  ;;  %v5239_v0 = vsub.f32 %v11927_v48, %v11936_v10 }
0x109c   :  { %10381 = vtanh.f32 %v4544_v38  ;;  %v11939_v14 = vsub.f32 %v5120_v23, %v11929_v63 }
0x109d   :  { %v4553_v3 = vpop.permute.xlu0 %4552 }
0x109e   :  { %v4555_v18 = vmul.f32 %v10380_v2, %v4553_v3  ;;  %v11941_v2 = vand.u32 4294901760, %v5119_v26  ;;  %v11950_v38 = vand.u32 4294901760, %v11939_v14  ;;  %v11956_v3 = vand.u32 4294901760, %v5118_v32 }
0x10a1   :  { %v5085_v27 = vpop.permute.xlu0 %5084 }
0x10a9   :  { %v10382_v47 = vpop.eup %10381 }
0x10aa   :  { %4548 = vrot.lane.b32.xlu1 %v10382_v47, %s10538_s25  ;;  %v11953_v47 = vsub.f32 %v5119_v26, %v11941_v2 }
0x111c   :  { %v4549_v25 = vpop.permute.xlu1 %4548 }
0x111d   :  { %v4551_v12 = vmul.f32 %v4549_v25, %v4546_v33  ;;  %v11960_v33 = vand.u32 4294901760, %v5239_v0  ;;  %v5246_v25 = vsub.f32 %v11939_v14, %v11950_v38 }
0x111f   :  { %v4556_v24 = vadd.f32 %v4555_v18, %v4551_v12  ;;  %v11965_v18 = vand.u32 4294901760, %v11953_v47  ;;  %v11969_v12 = vsub.f32 %v5118_v32, %v11956_v3 }
0x1121   :  { %4558 = vrot.lane.b32.xlu1 %v4556_v24, %s10538_s25  ;;  %v11973_v24 = vand.u32 4294901760, %v5246_v25 }
0x1193   :  { %v4559_v20 = vpop.permute.xlu1 %4558 }
0x1194   :  { %4561 = vst.msk [vmem:[#allocation3] sm:$0xff] %vm1243_vm0, %v4559_v20  ;;  %v5253_v20 = vsub.f32 %v11953_v47, %v11965_v18 }
0x119b   :  { %v11850_v13 = vld [vmem:[#allocation3] sm:$0xff] }
0x119c   :  { %v4571_v9 = vsel %vm1243_vm0, %v11850_v13, 0 }
0x119d   :  { %v4643_v17 = vand.u32 4294901760, %v4571_v9 }
0x119f   :  { %v4644_v39 = vsub.f32 %v4571_v9, %v4643_v17  ;;  %9812 = vmatmul.mubr.f32.vlgmr.msra.gmra.mxu1 %v4643_v17  ;;  %v11983_v9 = vand.u32 4294901760, %v5253_v20 }
0x11a0   :  { %9828 = vmatpush3.msra.mxu1 %v11504_v31  ;;  %9837 = vmatprep.mubr.msk.f32.mxu1 %vm10534_vm3, %v12702_v55 }
0x11a1   :  { %9829 = vmatprep.subr.mxu1 %v12702_v55  ;;  %v4645_v40 = vand.u32 4294901760, %v4644_v39 }
0x11a2   :  { %9830 = vmatpush3.msra.mxu1 %v11509_v50 }
0x11a3   :  { %9831 = vmatprep.subr.mxu1 %v12702_v55  ;;  %v4646_v16 = vsub.f32 %v4644_v39, %v4645_v40 }
0x11a4   :  { %9832 = vmatpush3.msra.mxu1 %v11519_v28 }
0x11a5   :  { %9833 = vmatprep.subr.mxu1 %v12702_v55  ;;  %v4647_v43 = vand.u32 4294901760, %v4646_v16 }
0x11a6   :  { %9834 = vmatpush3.msra.mxu1 %v11531_v30 }
0x11a7   :  { %9835 = vmatprep.subr.mxu1 %v12702_v55  ;;  %9799 = vmatmul.mubr.f32.vlgmr.msra.gmra.mxu0 %v4647_v43 }
0x11a8   :  { %9815 = vmatpush3.msra.mxu0 %v11507_v37  ;;  %9836 = vmatpush3.msra.mxu1 %v11546_v4 }
0x11a9   :  { %9816 = vmatprep.subr.mxu0 %v12702_v55  ;;  %9838 = vmatmul.mubr.f32.vlgmr.msra.gmra.mxu1 %v4645_v40 }
0x11aa   :  { %9853 = vmatprep.subr.mxu1 %v12702_v55  ;;  %9817 = vmatpush3.msra.mxu0 %v11517_v59 }
0x11ab   :  { %9854 = vmatpush3.msra.mxu1 %v11504_v31  ;;  %9818 = vmatprep.subr.mxu0 %v12702_v55 }
0x11ac   :  { %9855 = vmatprep.subr.mxu1 %v12702_v55  ;;  %9819 = vmatpush3.msra.mxu0 %v11529_v58 }
0x11ad   :  { %9856 = vmatpush3.msra.mxu1 %v11509_v50  ;;  %9820 = vmatprep.subr.mxu0 %v12702_v55 }
0x11ae   :  { %9857 = vmatprep.subr.mxu1 %v12702_v55  ;;  %9821 = vmatpush3.msra.mxu0 %v11543_v51 }
0x11af   :  { %9858 = vmatpush3.msra.mxu1 %v11519_v28  ;;  %9822 = vmatprep.subr.mxu0 %v12702_v55 }
0x11b0   :  { %9859 = vmatprep.subr.mxu1 %v12702_v55  ;;  %9823 = vmatpush3.msra.mxu0 %v11559_v15 }
0x11b1   :  { %9824 = vmatprep.mubr.msk.f32.mxu0 %vm10534_vm3, %v12702_v55  ;;  %9860 = vmatpush3.msra.mxu1 %v11531_v30 }
0x11b2   :  { %9825 = vmatmul.mubr.f32.vlgmr.msra.gmra.mxu0 %v4644_v39  ;;  %9840 = vmatprep.subr.mxu0 %v12702_v55 }
0x11b3   :  { %9861 = vmatprep.subr.mxu1 %v12702_v55  ;;  %9841 = vmatpush3.msra.mxu0 %v11514_v1 }
0x11b4   :  { %9862 = vmatpush3.msra.mxu1 %v11546_v4  ;;  %9863 = vmatprep.mubr.msk.f32.mxu1 %vm10534_vm3, %v12702_v55 }
0x11b5   :  { %9842 = vmatprep.subr.mxu0 %v12702_v55  ;;  %9864 = vmatmul.mubr.f32.vlgmr.msra.gmra.mxu1 %v4643_v17 }
0x11b6   :  { %9843 = vmatpush3.msra.mxu0 %v11526_v54  ;;  %9850 = vmatprep.mubr.msk.f32.mxu0 %vm10534_vm3, %v12702_v55 }
0x11b7   :  { %9844 = vmatprep.subr.mxu0 %v12702_v55  ;;  %9879 = vmatprep.subr.mxu1 %v12702_v55 }
0x11b8   :  { %9845 = vmatpush3.msra.mxu0 %v11540_v57  ;;  %9889 = vmatprep.mubr.msk.f32.mxu1 %vm10534_vm3, %v12702_v55 }
0x11b9   :  { %9846 = vmatprep.subr.mxu0 %v12702_v55  ;;  %9880 = vmatpush3.msra.mxu1 %v11945_v41 }
0x11ba   :  { %9847 = vmatpush3.msra.mxu0 %v11555_v21  ;;  %9881 = vmatprep.subr.mxu1 %v12702_v55 }
0x11bb   :  { %9848 = vmatprep.subr.mxu0 %v12702_v55  ;;  %9882 = vmatpush3.msra.mxu1 %v11960_v33 }
0x11bc   :  { %9849 = vmatpush3.msra.mxu0 %v11570_v35  ;;  %9883 = vmatprep.subr.mxu1 %v12702_v55 }
0x11bd   :  { %9851 = vmatmul.mubr.f32.vlgmr.msra.gmra.mxu0 %v4643_v17  ;;  %9866 = vmatprep.subr.mxu0 %v12702_v55 }
0x11be   :  { %9876 = vmatprep.mubr.msk.f32.mxu0 %vm10534_vm3, %v12702_v55  ;;  %9867 = vmatpush3.msra.mxu0 %v11914_v44 }
0x11bf   :  { %9868 = vmatprep.subr.mxu0 %v12702_v55  ;;  %9884 = vmatpush3.msra.mxu1 %v11973_v24 }
0x11c0   :  { %9869 = vmatpush3.msra.mxu0 %v11919_v11  ;;  %9885 = vmatprep.subr.mxu1 %v12702_v55 }
0x11c1   :  { %9870 = vmatprep.subr.mxu0 %v12702_v55  ;;  %9886 = vmatpush3.msra.mxu1 %v11983_v9 }
0x11c2   :  { %9871 = vmatpush3.msra.mxu0 %v11929_v63  ;;  %9887 = vmatprep.subr.mxu1 %v12702_v55 }
0x11c3   :  { %9872 = vmatprep.subr.mxu0 %v12702_v55 }
0x11c4   :  { %9873 = vmatpush3.msra.mxu0 %v11941_v2 }
0x11c5   :  { %9874 = vmatprep.subr.mxu0 %v12702_v55 }
0x11c6   :  { %9875 = vmatpush3.msra.mxu0 %v11956_v3 }
0x11c7   :  { %9892 = vmatprep.subr.mxu0 %v12702_v55 }
0x125f   :  { %v4745_v31 = vpop.f32.mrf.mxu1 }
0x1261   :  { %v9813_v37 = vpop.f32.mrf.mxu1 }
0x1267   :  { %v4649_v50 = vpop.f32.mrf.mxu0 }
0x1268   :  { %v4746_v57 = vadd.f32 %v4745_v31, %v4649_v50 }
0x1269   :  { %v4905_v1 = vpop.f32.mrf.mxu1  ;;  %v9800_v59 = vpop.f32.mrf.mxu0 }
0x126b   :  { %v9839_v28 = vpop.f32.mrf.mxu1 }
0x1272   :  { %v4827_v54 = vpop.f32.mrf.mxu0 }
0x1273   :  { %v4828_v4 = vadd.f32 %v4827_v54, %v4746_v57 }
0x1274   :  { %v9826_v58 = vpop.f32.mrf.mxu0 }
0x1275   :  { %v5067_v30 = vpop.f32.mrf.mxu1  ;;  %v4906_v21 = vadd.f32 %v4905_v1, %v4828_v4  ;;  %v12000_v1 = vld [vmem:[%s12587_s4] ss:$0 sm:$0xff] }
0x1277   :  { %v9865_v51 = vpop.f32.mrf.mxu1 }
0x127d   :  { %v4991_v15 = vpop.f32.mrf.mxu0 }
0x127e   :  { %v4992_v35 = vadd.f32 %v4991_v15, %v4906_v21 }
0x127f   :  { %v9852_v19 = vpop.f32.mrf.mxu0 }
0x1280   :  { %v5068_v62 = vadd.f32 %v5067_v30, %v4992_v35 }
0x1282   :  { %v5087_v52 = vadd.f32 %v5085_v27, %v5068_v62  ;;  %v5071_v8 = vadd.f32 %v5068_v62, %v4564_v29 }
0x1284   :  { %5089 = vrot.lane.b32.xlu1 %v5087_v52, %s10536_s3  ;;  %v8425_v5 = vmul.f32 -1.442695, %v5071_v8 }
0x1286   :  { %10383 = vpow2.f32 %v8425_v5 }
0x1293   :  { %v10384_v34 = vpop.eup %10383 }
0x1294   :  { %v5075_v61 = vadd.f32 1.0, %v10384_v34 }
0x1296   :  { %10385 = vrcp.f32 %v5075_v61 }
0x12a3   :  { %v11907_v56 = vpop.eup %10385 }
0x12a4   :  { %v5099_v40 = vsub.f32 1.0, %v11907_v56 }
0x12f6   :  { %v5090_v60 = vpop.permute.xlu1 %5089 }
0x12f7   :  { %v5092_v49 = vmul.f32 %v11907_v56, %v5090_v60 }
0x12f9   :  { %5094 = vrot.lane.b32.xlu0 %v5092_v49, %s10535_s21 }
0x12fd   :  { %5105 = vrot.lane.b32.xlu0 %v11850_v13, %s10537_s24  ;;  %v11980_v13 = vand.u32 4294901760, %v11969_v12 }
0x12ff   :  { %v5260_v39 = vsub.f32 %v11969_v12, %v11980_v13 }
0x1301   :  { %v11991_v43 = vand.u32 4294901760, %v5260_v39  ;;  %5637 = vrot.lane.b32.xlu0 %v12000_v1, %s10535_s21 }
0x1303   :  { %9888 = vmatpush3.msra.mxu1 %v11991_v43 }
0x1304   :  { %9905 = vmatprep.subr.mxu1 %v12702_v55 }
0x136b   :  { %v5095_v36 = vpop.permute.xlu0 %5094 }
0x136c   :  { %v5097_v7 = vadd.f32 %v5095_v36, %v4564_v29 }
0x136e   :  { %10387 = vtanh.f32 %v5097_v7 }
0x136f   :  { %v5106_v17 = vpop.permute.xlu0 %5105 }
0x1370   :  { %v5108_v31 = vmul.f32 %v11907_v56, %v5106_v17 }
0x1373   :  { %v5638_v7 = vpop.permute.xlu0 %5637 }
0x137b   :  { %v10388_v45 = vpop.eup %10387 }
0x137c   :  { %5101 = vrot.lane.b32.xlu1 %v10388_v45, %s10538_s25 }
0x13ee   :  { %v5102_v16 = vpop.permute.xlu1 %5101 }
0x13ef   :  { %v5104_v37 = vmul.f32 %v5102_v16, %v5099_v40 }
0x13f1   :  { %v5109_v50 = vadd.f32 %v5108_v31, %v5104_v37 }
0x13f3   :  { %5111 = vrot.lane.b32.xlu1 %v5109_v50, %s10538_s25 }
0x1465   :  { %v5112_v59 = vpop.permute.xlu1 %5111 }
0x1466   :  { %5114 = vst.msk [vmem:[#allocation3] sm:$0xff] %vm1243_vm0, %v5112_v59 }
0x146d   :  { %v12005_v28 = vld [vmem:[#allocation3] sm:$0xff] }
0x146e   :  { %v5124_v54 = vsel %vm1243_vm0, %v12005_v28, 0 }
0x146f   :  { %v5196_v58 = vand.u32 4294901760, %v5124_v54 }
0x1471   :  { %v5197_v30 = vsub.f32 %v5124_v54, %v5196_v58  ;;  %9890 = vmatmul.mubr.f32.vlgmr.msra.gmra.mxu1 %v5196_v58 }
0x1472   :  { %9906 = vmatpush3.msra.mxu1 %v11914_v44  ;;  %9915 = vmatprep.mubr.msk.f32.mxu1 %vm10534_vm3, %v12702_v55 }
0x1473   :  { %9907 = vmatprep.subr.mxu1 %v12702_v55  ;;  %v5198_v57 = vand.u32 4294901760, %v5197_v30 }
0x1474   :  { %9908 = vmatpush3.msra.mxu1 %v11919_v11 }
0x1475   :  { %9909 = vmatprep.subr.mxu1 %v12702_v55  ;;  %v5199_v51 = vsub.f32 %v5197_v30, %v5198_v57 }
0x1476   :  { %9910 = vmatpush3.msra.mxu1 %v11929_v63 }
0x1477   :  { %9911 = vmatprep.subr.mxu1 %v12702_v55  ;;  %v5200_v4 = vand.u32 4294901760, %v5199_v51 }
0x1478   :  { %9912 = vmatpush3.msra.mxu1 %v11941_v2 }
0x1479   :  { %9913 = vmatprep.subr.mxu1 %v12702_v55  ;;  %9877 = vmatmul.mubr.f32.vlgmr.msra.gmra.mxu0 %v5200_v4 }
0x147a   :  { %9893 = vmatpush3.msra.mxu0 %v11917_v46  ;;  %9914 = vmatpush3.msra.mxu1 %v11956_v3 }
0x147b   :  { %9894 = vmatprep.subr.mxu0 %v12702_v55  ;;  %9916 = vmatmul.mubr.f32.vlgmr.msra.gmra.mxu1 %v5198_v57 }
0x147c   :  { %9931 = vmatprep.subr.mxu1 %v12702_v55  ;;  %9895 = vmatpush3.msra.mxu0 %v11927_v48 }
0x147d   :  { %9932 = vmatpush3.msra.mxu1 %v11914_v44  ;;  %9896 = vmatprep.subr.mxu0 %v12702_v55 }
0x147e   :  { %9933 = vmatprep.subr.mxu1 %v12702_v55  ;;  %9897 = vmatpush3.msra.mxu0 %v11939_v14 }
0x147f   :  { %9934 = vmatpush3.msra.mxu1 %v11919_v11  ;;  %9898 = vmatprep.subr.mxu0 %v12702_v55 }
0x1480   :  { %9935 = vmatprep.subr.mxu1 %v12702_v55  ;;  %9899 = vmatpush3.msra.mxu0 %v11953_v47 }
0x1481   :  { %9936 = vmatpush3.msra.mxu1 %v11929_v63  ;;  %9900 = vmatprep.subr.mxu0 %v12702_v55 }
0x1482   :  { %9937 = vmatprep.subr.mxu1 %v12702_v55  ;;  %9901 = vmatpush3.msra.mxu0 %v11969_v12 }
0x1483   :  { %9902 = vmatprep.mubr.msk.f32.mxu0 %vm10534_vm3, %v12702_v55  ;;  %9938 = vmatpush3.msra.mxu1 %v11941_v2 }
0x1484   :  { %9903 = vmatmul.mubr.f32.vlgmr.msra.gmra.mxu0 %v5197_v30  ;;  %9918 = vmatprep.subr.mxu0 %v12702_v55 }
0x1485   :  { %9939 = vmatprep.subr.mxu1 %v12702_v55  ;;  %9919 = vmatpush3.msra.mxu0 %v11924_v6 }
0x1486   :  { %9940 = vmatpush3.msra.mxu1 %v11956_v3  ;;  %9941 = vmatprep.mubr.msk.f32.mxu1 %vm10534_vm3, %v12702_v55 }
0x1487   :  { %9920 = vmatprep.subr.mxu0 %v12702_v55  ;;  %9942 = vmatmul.mubr.f32.vlgmr.msra.gmra.mxu1 %v5196_v58 }
0x1488   :  { %9921 = vmatpush3.msra.mxu0 %v11936_v10  ;;  %9928 = vmatprep.mubr.msk.f32.mxu0 %vm10534_vm3, %v12702_v55 }
0x1489   :  { %9922 = vmatprep.subr.mxu0 %v12702_v55  ;;  %9957 = vmatprep.subr.mxu1 %v12702_v55 }
0x148a   :  { %9923 = vmatpush3.msra.mxu0 %v11950_v38  ;;  %9958 = vmatpush3.msra.mxu1 %v11945_v41 }
0x148b   :  { %9924 = vmatprep.subr.mxu0 %v12702_v55  ;;  %9959 = vmatprep.subr.mxu1 %v12702_v55 }
0x148c   :  { %9925 = vmatpush3.msra.mxu0 %v11965_v18  ;;  %9960 = vmatpush3.msra.mxu1 %v11960_v33 }
0x148d   :  { %9926 = vmatprep.subr.mxu0 %v12702_v55  ;;  %9961 = vmatprep.subr.mxu1 %v12702_v55 }
0x148e   :  { %9927 = vmatpush3.msra.mxu0 %v11980_v13  ;;  %9962 = vmatpush3.msra.mxu1 %v11973_v24 }
0x148f   :  { %9929 = vmatmul.mubr.f32.vlgmr.msra.gmra.mxu0 %v5196_v58  ;;  %9963 = vmatprep.subr.mxu1 %v12702_v55 }
0x1490   :  { %9964 = vmatpush3.msra.mxu1 %v11983_v9  ;;  %9944 = vmatprep.subr.mxu0 %v12702_v55 }
0x1491   :  { %9965 = vmatprep.subr.mxu1 %v12702_v55  ;;  %9945 = vmatpush3.msra.mxu0 %v11914_v44 }
0x1492   :  { %9966 = vmatpush3.msra.mxu1 %v11991_v43  ;;  %9946 = vmatprep.subr.mxu0 %v12702_v55 }
0x1493   :  { %9967 = vmatprep.mubr.msk.f32.mxu1 %vm10534_vm3, %v12702_v55  ;;  %9983 = vmatprep.subr.mxu1 %v12702_v55 }
0x1494   :  { %9947 = vmatpush3.msra.mxu0 %v11919_v11  ;;  %9954 = vmatprep.mubr.msk.f32.mxu0 %vm10534_vm3, %v12702_v55 }
0x1495   :  { %9948 = vmatprep.subr.mxu0 %v12702_v55 }
0x1496   :  { %9949 = vmatpush3.msra.mxu0 %v11929_v63 }
0x1497   :  { %9950 = vmatprep.subr.mxu0 %v12702_v55 }
0x1498   :  { %9951 = vmatpush3.msra.mxu0 %v11941_v2 }
0x1499   :  { %9952 = vmatprep.subr.mxu0 %v12702_v55 }
0x149a   :  { %9953 = vmatpush3.msra.mxu0 %v11956_v3 }
0x149b   :  { %9970 = vmatprep.subr.mxu0 %v12702_v55 }
0x1531   :  { %v5298_v21 = vpop.f32.mrf.mxu1 }
0x1533   :  { %v9891_v15 = vpop.f32.mrf.mxu1 }
0x1539   :  { %v5202_v35 = vpop.f32.mrf.mxu0 }
0x153a   :  { %v5299_v5 = vadd.f32 %v5298_v21, %v5202_v35 }
0x153b   :  { %v5458_v19 = vpop.f32.mrf.mxu1  ;;  %v9878_v27 = vpop.f32.mrf.mxu0 }
0x153d   :  { %v9917_v62 = vpop.f32.mrf.mxu1 }
0x1544   :  { %v5380_v52 = vpop.f32.mrf.mxu0 }
0x1545   :  { %v5381_v61 = vadd.f32 %v5380_v52, %v5299_v5 }
0x1546   :  { %v9904_v29 = vpop.f32.mrf.mxu0 }
0x1547   :  { %v5620_v8 = vpop.f32.mrf.mxu1  ;;  %v5459_v56 = vadd.f32 %v5458_v19, %v5381_v61 }
0x1549   :  { %v9943_v34 = vpop.f32.mrf.mxu1 }
0x154f   :  { %v5544_v60 = vpop.f32.mrf.mxu0 }
0x1550   :  { %v5545_v49 = vadd.f32 %v5544_v60, %v5459_v56 }
0x1551   :  { %v9930_v36 = vpop.f32.mrf.mxu0 }
0x1552   :  { %v5621_v45 = vadd.f32 %v5620_v8, %v5545_v49 }
0x1554   :  { %v5640_v42 = vadd.f32 %v5638_v7, %v5621_v45  ;;  %v5624_v23 = vadd.f32 %v5621_v45, %v5117_v22 }
0x1556   :  { %5642 = vrot.lane.b32.xlu1 %v5640_v42, %s10536_s3  ;;  %v8427_v26 = vmul.f32 -1.442695, %v5624_v23 }
0x1558   :  { %10389 = vpow2.f32 %v8427_v26  ;;  %v5670_v26 = vld [vmem:[#allocation2 + $0x40] sm:$0xff] }
0x1565   :  { %v10390_v53 = vpop.eup %10389 }
0x1566   :  { %v5628_v32 = vadd.f32 1.0, %v10390_v53 }
0x1568   :  { %10391 = vrcp.f32 %v5628_v32 }
0x1575   :  { %v10392_v0 = vpop.eup %10391 }
0x1576   :  { %v5652_v31 = vsub.f32 1.0, %v10392_v0 }
0x15c8   :  { %v5643_v25 = vpop.permute.xlu1 %5642 }
0x15c9   :  { %v5645_v20 = vmul.f32 %v10392_v0, %v5643_v25 }
0x15cb   :  { %5647 = vrot.lane.b32.xlu0 %v5645_v20, %s10535_s21 }
0x15cf   :  { %5658 = vrot.lane.b32.xlu0 %v12005_v28, %s10537_s24 }
0x15d3   :  { %6190 = vrot.lane.b32.xlu0 %v12000_v1, %s10535_s21 }
0x163d   :  { %v5648_v17 = vpop.permute.xlu0 %5647 }
0x163e   :  { %v5650_v39 = vadd.f32 %v5648_v17, %v5117_v22 }
0x1640   :  { %10393 = vtanh.f32 %v5650_v39 }
0x1641   :  { %v5659_v16 = vpop.permute.xlu0 %5658 }
0x1642   :  { %v5661_v50 = vmul.f32 %v10392_v0, %v5659_v16 }
0x1645   :  { %v6191_v42 = vpop.permute.xlu0 %6190 }
0x164d   :  { %v10394_v40 = vpop.eup %10393 }
0x164e   :  { %5654 = vrot.lane.b32.xlu1 %v10394_v40, %s10538_s25 }
0x16c0   :  { %v5655_v37 = vpop.permute.xlu1 %5654 }
0x16c1   :  { %v5657_v59 = vmul.f32 %v5655_v37, %v5652_v31 }
0x16c3   :  { %v5662_v54 = vadd.f32 %v5661_v50, %v5657_v59 }
0x16c5   :  { %5664 = vrot.lane.b32.xlu1 %v5662_v54, %s10538_s25 }
0x1737   :  { %v5665_v58 = vpop.permute.xlu1 %5664 }
0x1738   :  { %5667 = vst.msk [vmem:[#allocation3] sm:$0xff] %vm1243_vm0, %v5665_v58 }
0x173f   :  { %v12090_v28 = vld [vmem:[#allocation3] sm:$0xff] }
0x1740   :  { %v5677_v30 = vsel %vm1243_vm0, %v12090_v28, 0 }
0x1741   :  { %v5749_v57 = vand.u32 4294901760, %v5677_v30 }
0x1743   :  { %v5750_v51 = vsub.f32 %v5677_v30, %v5749_v57  ;;  %9968 = vmatmul.mubr.f32.vlgmr.msra.gmra.mxu1 %v5749_v57 }
0x1744   :  { %9984 = vmatpush3.msra.mxu1 %v11914_v44  ;;  %9993 = vmatprep.mubr.msk.f32.mxu1 %vm10534_vm3, %v12702_v55 }
0x1745   :  { %9985 = vmatprep.subr.mxu1 %v12702_v55  ;;  %v5751_v4 = vand.u32 4294901760, %v5750_v51 }
0x1746   :  { %9986 = vmatpush3.msra.mxu1 %v11919_v11 }
0x1747   :  { %9987 = vmatprep.subr.mxu1 %v12702_v55  ;;  %v5752_v21 = vsub.f32 %v5750_v51, %v5751_v4 }
0x1748   :  { %9988 = vmatpush3.msra.mxu1 %v11929_v63 }
0x1749   :  { %9989 = vmatprep.subr.mxu1 %v12702_v55  ;;  %v5753_v15 = vand.u32 4294901760, %v5752_v21 }
0x174a   :  { %9990 = vmatpush3.msra.mxu1 %v11941_v2 }
0x174b   :  { %9991 = vmatprep.subr.mxu1 %v12702_v55  ;;  %9955 = vmatmul.mubr.f32.vlgmr.msra.gmra.mxu0 %v5753_v15 }
0x174c   :  { %9971 = vmatpush3.msra.mxu0 %v11917_v46  ;;  %9992 = vmatpush3.msra.mxu1 %v11956_v3 }
0x174d   :  { %9972 = vmatprep.subr.mxu0 %v12702_v55  ;;  %9994 = vmatmul.mubr.f32.vlgmr.msra.gmra.mxu1 %v5751_v4 }
0x174e   :  { %10009 = vmatprep.subr.mxu1 %v12702_v55  ;;  %9973 = vmatpush3.msra.mxu0 %v11927_v48 }
0x174f   :  { %10010 = vmatpush3.msra.mxu1 %v11914_v44  ;;  %9974 = vmatprep.subr.mxu0 %v12702_v55 }
0x1750   :  { %10011 = vmatprep.subr.mxu1 %v12702_v55  ;;  %9975 = vmatpush3.msra.mxu0 %v11939_v14 }
0x1751   :  { %10012 = vmatpush3.msra.mxu1 %v11919_v11  ;;  %9976 = vmatprep.subr.mxu0 %v12702_v55 }
0x1752   :  { %10013 = vmatprep.subr.mxu1 %v12702_v55  ;;  %9977 = vmatpush3.msra.mxu0 %v11953_v47 }
0x1753   :  { %10014 = vmatpush3.msra.mxu1 %v11929_v63  ;;  %9978 = vmatprep.subr.mxu0 %v12702_v55 }
0x1754   :  { %10015 = vmatprep.subr.mxu1 %v12702_v55  ;;  %9979 = vmatpush3.msra.mxu0 %v11969_v12 }
0x1755   :  { %9980 = vmatprep.mubr.msk.f32.mxu0 %vm10534_vm3, %v12702_v55  ;;  %10016 = vmatpush3.msra.mxu1 %v11941_v2 }
0x1756   :  { %9981 = vmatmul.mubr.f32.vlgmr.msra.gmra.mxu0 %v5750_v51  ;;  %9996 = vmatprep.subr.mxu0 %v12702_v55 }
0x1757   :  { %10017 = vmatprep.subr.mxu1 %v12702_v55  ;;  %9997 = vmatpush3.msra.mxu0 %v11924_v6 }
0x1758   :  { %10018 = vmatpush3.msra.mxu1 %v11956_v3  ;;  %10019 = vmatprep.mubr.msk.f32.mxu1 %vm10534_vm3, %v12702_v55 }
0x1759   :  { %9998 = vmatprep.subr.mxu0 %v12702_v55  ;;  %10020 = vmatmul.mubr.f32.vlgmr.msra.gmra.mxu1 %v5749_v57 }
0x175a   :  { %9999 = vmatpush3.msra.mxu0 %v11936_v10  ;;  %10006 = vmatprep.mubr.msk.f32.mxu0 %vm10534_vm3, %v12702_v55 }
0x175b   :  { %10000 = vmatprep.subr.mxu0 %v12702_v55  ;;  %10035 = vmatprep.subr.mxu1 %v12702_v55 }
0x175c   :  { %10001 = vmatpush3.msra.mxu0 %v11950_v38  ;;  %10036 = vmatpush3.msra.mxu1 %v11945_v41 }
0x175d   :  { %10002 = vmatprep.subr.mxu0 %v12702_v55  ;;  %10037 = vmatprep.subr.mxu1 %v12702_v55 }
0x175e   :  { %10003 = vmatpush3.msra.mxu0 %v11965_v18  ;;  %10038 = vmatpush3.msra.mxu1 %v11960_v33 }
0x175f   :  { %10004 = vmatprep.subr.mxu0 %v12702_v55  ;;  %10039 = vmatprep.subr.mxu1 %v12702_v55 }
0x1760   :  { %10005 = vmatpush3.msra.mxu0 %v11980_v13  ;;  %10040 = vmatpush3.msra.mxu1 %v11973_v24 }
0x1761   :  { %10007 = vmatmul.mubr.f32.vlgmr.msra.gmra.mxu0 %v5749_v57  ;;  %10041 = vmatprep.subr.mxu1 %v12702_v55 }
0x1762   :  { %10042 = vmatpush3.msra.mxu1 %v11983_v9  ;;  %10022 = vmatprep.subr.mxu0 %v12702_v55 }
0x1763   :  { %10043 = vmatprep.subr.mxu1 %v12702_v55  ;;  %10023 = vmatpush3.msra.mxu0 %v11914_v44 }
0x1764   :  { %10044 = vmatpush3.msra.mxu1 %v11991_v43  ;;  %10024 = vmatprep.subr.mxu0 %v12702_v55 }
0x1765   :  { %10045 = vmatprep.mubr.msk.f32.mxu1 %vm10534_vm3, %v12702_v55  ;;  %10061 = vmatprep.subr.mxu1 %v12702_v55 }
0x1766   :  { %10025 = vmatpush3.msra.mxu0 %v11919_v11  ;;  %10032 = vmatprep.mubr.msk.f32.mxu0 %vm10534_vm3, %v12702_v55 }
0x1767   :  { %10026 = vmatprep.subr.mxu0 %v12702_v55 }
0x1768   :  { %10027 = vmatpush3.msra.mxu0 %v11929_v63 }
0x1769   :  { %10028 = vmatprep.subr.mxu0 %v12702_v55 }
0x176a   :  { %10029 = vmatpush3.msra.mxu0 %v11941_v2 }
0x176b   :  { %10030 = vmatprep.subr.mxu0 %v12702_v55 }
0x176c   :  { %10031 = vmatpush3.msra.mxu0 %v11956_v3 }
0x176d   :  { %10048 = vmatprep.subr.mxu0 %v12702_v55 }
0x1803   :  { %v5851_v35 = vpop.f32.mrf.mxu1 }
0x1805   :  { %v9969_v19 = vpop.f32.mrf.mxu1 }
0x180b   :  { %v5755_v27 = vpop.f32.mrf.mxu0 }
0x180c   :  { %v5852_v61 = vadd.f32 %v5851_v35, %v5755_v27 }
0x180d   :  { %v6011_v62 = vpop.f32.mrf.mxu1  ;;  %v9956_v52 = vpop.f32.mrf.mxu0 }
0x180f   :  { %v9995_v29 = vpop.f32.mrf.mxu1 }
0x1816   :  { %v5933_v8 = vpop.f32.mrf.mxu0 }
0x1817   :  { %v5934_v60 = vadd.f32 %v5933_v8, %v5852_v61 }
0x1818   :  { %v9982_v5 = vpop.f32.mrf.mxu0 }
0x1819   :  { %v6173_v34 = vpop.f32.mrf.mxu1  ;;  %v6012_v49 = vadd.f32 %v6011_v62, %v5934_v60 }
0x181b   :  { %v10021_v56 = vpop.f32.mrf.mxu1 }
0x1821   :  { %v6097_v36 = vpop.f32.mrf.mxu0 }
0x1822   :  { %v6098_v7 = vadd.f32 %v6097_v36, %v6012_v49 }
0x1823   :  { %v10008_v45 = vpop.f32.mrf.mxu0 }
0x1824   :  { %v6174_v22 = vadd.f32 %v6173_v34, %v6098_v7 }
0x1826   :  { %v6193_v23 = vadd.f32 %v6191_v42, %v6174_v22  ;;  %v6177_v53 = vadd.f32 %v6174_v22, %v5670_v26  ;;  %v6223_v42 = vld [vmem:[#allocation2 + $0x48] sm:$0xff] }
0x1828   :  { %6195 = vrot.lane.b32.xlu1 %v6193_v23, %s10536_s3  ;;  %v8429_v32 = vmul.f32 -1.442695, %v6177_v53 }
0x182a   :  { %10395 = vpow2.f32 %v8429_v32 }
0x1837   :  { %v10396_v0 = vpop.eup %10395 }
0x1838   :  { %v6181_v25 = vadd.f32 1.0, %v10396_v0 }
0x183a   :  { %10397 = vrcp.f32 %v6181_v25 }
0x1847   :  { %v10398_v20 = vpop.eup %10397 }
0x1848   :  { %v6205_v50 = vsub.f32 1.0, %v10398_v20 }
0x189a   :  { %v6196_v17 = vpop.permute.xlu1 %6195 }
0x189b   :  { %v6198_v39 = vmul.f32 %v10398_v20, %v6196_v17 }
0x189d   :  { %6200 = vrot.lane.b32.xlu0 %v6198_v39, %s10535_s21 }
0x18a1   :  { %6211 = vrot.lane.b32.xlu0 %v12090_v28, %s10537_s24 }
0x18a5   :  { %6743 = vrot.lane.b32.xlu0 %v12000_v1, %s10535_s21 }
0x190f   :  { %v6201_v40 = vpop.permute.xlu0 %6200 }
0x1910   :  { %v6203_v16 = vadd.f32 %v6201_v40, %v5670_v26 }
0x1912   :  { %10399 = vtanh.f32 %v6203_v16 }
0x1913   :  { %v6212_v37 = vpop.permute.xlu0 %6211 }
0x1914   :  { %v6214_v54 = vmul.f32 %v10398_v20, %v6212_v37 }
0x1917   :  { %v6744_v36 = vpop.permute.xlu0 %6743 }
0x191f   :  { %v10400_v31 = vpop.eup %10399 }
0x1920   :  { %6207 = vrot.lane.b32.xlu1 %v10400_v31, %s10538_s25 }
0x1992   :  { %v6208_v59 = vpop.permute.xlu1 %6207 }
0x1993   :  { %v6210_v58 = vmul.f32 %v6208_v59, %v6205_v50 }
0x1995   :  { %v6215_v30 = vadd.f32 %v6214_v54, %v6210_v58 }
0x1997   :  { %6217 = vrot.lane.b32.xlu1 %v6215_v30, %s10538_s25 }
0x1a09   :  { %v6218_v57 = vpop.permute.xlu1 %6217 }
0x1a0a   :  { %6220 = vst.msk [vmem:[#allocation3] sm:$0xff] %vm1243_vm0, %v6218_v57 }
0x1a11   :  { %v12175_v28 = vld [vmem:[#allocation3] sm:$0xff] }
0x1a12   :  { %v6230_v51 = vsel %vm1243_vm0, %v12175_v28, 0 }
0x1a13   :  { %v6302_v4 = vand.u32 4294901760, %v6230_v51 }
0x1a15   :  { %v6303_v21 = vsub.f32 %v6230_v51, %v6302_v4  ;;  %10046 = vmatmul.mubr.f32.vlgmr.msra.gmra.mxu1 %v6302_v4 }
0x1a16   :  { %10062 = vmatpush3.msra.mxu1 %v11914_v44  ;;  %10071 = vmatprep.mubr.msk.f32.mxu1 %vm10534_vm3, %v12702_v55 }
0x1a17   :  { %10063 = vmatprep.subr.mxu1 %v12702_v55  ;;  %v6304_v15 = vand.u32 4294901760, %v6303_v21 }
0x1a18   :  { %10064 = vmatpush3.msra.mxu1 %v11919_v11 }
0x1a19   :  { %10065 = vmatprep.subr.mxu1 %v12702_v55  ;;  %v6305_v35 = vsub.f32 %v6303_v21, %v6304_v15 }
0x1a1a   :  { %10066 = vmatpush3.msra.mxu1 %v11929_v63 }
0x1a1b   :  { %10067 = vmatprep.subr.mxu1 %v12702_v55  ;;  %v6306_v19 = vand.u32 4294901760, %v6305_v35 }
0x1a1c   :  { %10068 = vmatpush3.msra.mxu1 %v11941_v2 }
0x1a1d   :  { %10069 = vmatprep.subr.mxu1 %v12702_v55  ;;  %10033 = vmatmul.mubr.f32.vlgmr.msra.gmra.mxu0 %v6306_v19 }
0x1a1e   :  { %10049 = vmatpush3.msra.mxu0 %v11917_v46  ;;  %10070 = vmatpush3.msra.mxu1 %v11956_v3 }
0x1a1f   :  { %10050 = vmatprep.subr.mxu0 %v12702_v55  ;;  %10072 = vmatmul.mubr.f32.vlgmr.msra.gmra.mxu1 %v6304_v15 }
0x1a20   :  { %10087 = vmatprep.subr.mxu1 %v12702_v55  ;;  %10051 = vmatpush3.msra.mxu0 %v11927_v48 }
0x1a21   :  { %10088 = vmatpush3.msra.mxu1 %v11914_v44  ;;  %10052 = vmatprep.subr.mxu0 %v12702_v55 }
0x1a22   :  { %10089 = vmatprep.subr.mxu1 %v12702_v55  ;;  %10053 = vmatpush3.msra.mxu0 %v11939_v14 }
0x1a23   :  { %10090 = vmatpush3.msra.mxu1 %v11919_v11  ;;  %10054 = vmatprep.subr.mxu0 %v12702_v55 }
0x1a24   :  { %10091 = vmatprep.subr.mxu1 %v12702_v55  ;;  %10055 = vmatpush3.msra.mxu0 %v11953_v47 }
0x1a25   :  { %10092 = vmatpush3.msra.mxu1 %v11929_v63  ;;  %10056 = vmatprep.subr.mxu0 %v12702_v55 }
0x1a26   :  { %10093 = vmatprep.subr.mxu1 %v12702_v55  ;;  %10057 = vmatpush3.msra.mxu0 %v11969_v12 }
0x1a27   :  { %10058 = vmatprep.mubr.msk.f32.mxu0 %vm10534_vm3, %v12702_v55  ;;  %10094 = vmatpush3.msra.mxu1 %v11941_v2 }
0x1a28   :  { %10059 = vmatmul.mubr.f32.vlgmr.msra.gmra.mxu0 %v6303_v21  ;;  %10074 = vmatprep.subr.mxu0 %v12702_v55 }
0x1a29   :  { %10095 = vmatprep.subr.mxu1 %v12702_v55  ;;  %10075 = vmatpush3.msra.mxu0 %v11924_v6 }
0x1a2a   :  { %10096 = vmatpush3.msra.mxu1 %v11956_v3  ;;  %10097 = vmatprep.mubr.msk.f32.mxu1 %vm10534_vm3, %v12702_v55 }
0x1a2b   :  { %10076 = vmatprep.subr.mxu0 %v12702_v55  ;;  %10098 = vmatmul.mubr.f32.vlgmr.msra.gmra.mxu1 %v6302_v4 }
0x1a2c   :  { %10077 = vmatpush3.msra.mxu0 %v11936_v10  ;;  %10084 = vmatprep.mubr.msk.f32.mxu0 %vm10534_vm3, %v12702_v55 }
0x1a2d   :  { %10078 = vmatprep.subr.mxu0 %v12702_v55  ;;  %10113 = vmatprep.subr.mxu1 %v12702_v55 }
0x1a2e   :  { %10079 = vmatpush3.msra.mxu0 %v11950_v38  ;;  %10114 = vmatpush3.msra.mxu1 %v11945_v41 }
0x1a2f   :  { %10080 = vmatprep.subr.mxu0 %v12702_v55  ;;  %10115 = vmatprep.subr.mxu1 %v12702_v55 }
0x1a30   :  { %10081 = vmatpush3.msra.mxu0 %v11965_v18  ;;  %10116 = vmatpush3.msra.mxu1 %v11960_v33 }
0x1a31   :  { %10082 = vmatprep.subr.mxu0 %v12702_v55  ;;  %10117 = vmatprep.subr.mxu1 %v12702_v55 }
0x1a32   :  { %10083 = vmatpush3.msra.mxu0 %v11980_v13  ;;  %10118 = vmatpush3.msra.mxu1 %v11973_v24 }
0x1a33   :  { %10085 = vmatmul.mubr.f32.vlgmr.msra.gmra.mxu0 %v6302_v4  ;;  %10119 = vmatprep.subr.mxu1 %v12702_v55 }
0x1a34   :  { %10120 = vmatpush3.msra.mxu1 %v11983_v9  ;;  %10100 = vmatprep.subr.mxu0 %v12702_v55 }
0x1a35   :  { %10121 = vmatprep.subr.mxu1 %v12702_v55  ;;  %10101 = vmatpush3.msra.mxu0 %v11914_v44 }
0x1a36   :  { %10122 = vmatpush3.msra.mxu1 %v11991_v43  ;;  %10102 = vmatprep.subr.mxu0 %v12702_v55 }
0x1a37   :  { %10123 = vmatprep.mubr.msk.f32.mxu1 %vm10534_vm3, %v12702_v55  ;;  %10139 = vmatprep.subr.mxu1 %v12702_v55 }
0x1a38   :  { %10103 = vmatpush3.msra.mxu0 %v11919_v11  ;;  %10110 = vmatprep.mubr.msk.f32.mxu0 %vm10534_vm3, %v12702_v55 }
0x1a39   :  { %10104 = vmatprep.subr.mxu0 %v12702_v55 }
0x1a3a   :  { %10105 = vmatpush3.msra.mxu0 %v11929_v63 }
0x1a3b   :  { %10106 = vmatprep.subr.mxu0 %v12702_v55 }
0x1a3c   :  { %10107 = vmatpush3.msra.mxu0 %v11941_v2 }
0x1a3d   :  { %10108 = vmatprep.subr.mxu0 %v12702_v55 }
0x1a3e   :  { %10109 = vmatpush3.msra.mxu0 %v11956_v3 }
0x1a3f   :  { %10126 = vmatprep.subr.mxu0 %v12702_v55 }
0x1ad5   :  { %v6404_v41 = vpop.f32.mrf.mxu1 }
0x1ad7   :  { %v10047_v33 = vpop.f32.mrf.mxu1 }
0x1add   :  { %v6308_v24 = vpop.f32.mrf.mxu0 }
0x1ade   :  { %v6405_v8 = vadd.f32 %v6404_v41, %v6308_v24  ;;  %v6776_v41 = vld [vmem:[#allocation2 + $0x50] sm:$0xff] }
0x1adf   :  { %v6564_v9 = vpop.f32.mrf.mxu1  ;;  %v10034_v43 = vpop.f32.mrf.mxu0 }
0x1ae1   :  { %v10073_v27 = vpop.f32.mrf.mxu1 }
0x1ae8   :  { %v6486_v62 = vpop.f32.mrf.mxu0 }
0x1ae9   :  { %v6487_v34 = vadd.f32 %v6486_v62, %v6405_v8 }
0x1aea   :  { %v10060_v52 = vpop.f32.mrf.mxu0 }
0x1aeb   :  { %v6726_v29 = vpop.f32.mrf.mxu1  ;;  %v6565_v61 = vadd.f32 %v6564_v9, %v6487_v34  ;;  %v7334_v34 = vld [vmem:[#allocation9 + $0x20] sm:$0xff] }
0x1aed   :  { %v10099_v5 = vpop.f32.mrf.mxu1 }
0x1af3   :  { %v6650_v56 = vpop.f32.mrf.mxu0 }
0x1af4   :  { %v6651_v60 = vadd.f32 %v6650_v56, %v6565_v61  ;;  %v12324_v61 = vand.u32 4294901760, %v7334_v34  ;;  %v7333_v56 = vld [vmem:[#allocation9 + $0x18] sm:$0xff] }
0x1af5   :  { %v10086_v49 = vpop.f32.mrf.mxu0 }
0x1af6   :  { %v6727_v7 = vadd.f32 %v6726_v29, %v6651_v60  ;;  %v12327_v60 = vsub.f32 %v7334_v34, %v12324_v61  ;;  %v12329_v49 = vand.u32 4294901760, %v7333_v56 }
0x1af8   :  { %v6746_v45 = vadd.f32 %v6744_v36, %v6727_v7  ;;  %v6730_v22 = vadd.f32 %v6727_v7, %v6223_v42  ;;  %v7332_v36 = vld [vmem:[#allocation9 + $0x10] sm:$0xff]  ;;  %v7443_v7 = vand.u32 4294901760, %v12327_v60 }
0x1afa   :  { %6748 = vrot.lane.b32.xlu1 %v6746_v45, %s10536_s3  ;;  %v8431_v23 = vmul.f32 -1.442695, %v6730_v22  ;;  %v12335_v45 = vsub.f32 %v7333_v56, %v12329_v49  ;;  %v7331_v22 = vld [vmem:[#allocation9 + $0x8] sm:$0xff] }
0x1afc   :  { %10401 = vpow2.f32 %v8431_v23  ;;  %v7444_v23 = vsub.f32 %v12327_v60, %v7443_v7 }
0x1b09   :  { %v10402_v26 = vpop.eup %10401 }
0x1b0a   :  { %v6734_v53 = vadd.f32 1.0, %v10402_v26  ;;  %v7450_v26 = vand.u32 4294901760, %v12335_v45 }
0x1b0c   :  { %10403 = vrcp.f32 %v6734_v53 }
0x1b19   :  { %v10404_v32 = vpop.eup %10403 }
0x1b1a   :  { %v6758_v16 = vsub.f32 1.0, %v10404_v32 }
0x1b6c   :  { %v6749_v0 = vpop.permute.xlu1 %6748 }
0x1b6d   :  { %v6751_v25 = vmul.f32 %v10404_v32, %v6749_v0  ;;  %v7330_v0 = vld [vmem:[#allocation9] sm:$0xff] }
0x1b6f   :  { %6753 = vrot.lane.b32.xlu0 %v6751_v25, %s10535_s21  ;;  %v7445_v25 = vand.u32 4294901760, %v7444_v23 }
0x1b73   :  { %6764 = vrot.lane.b32.xlu0 %v12175_v28, %s10537_s24 }
0x1b77   :  { %7296 = vrot.lane.b32.xlu0 %v12000_v1, %s10535_s21 }
0x1be1   :  { %v6754_v20 = vpop.permute.xlu0 %6753 }
0x1be2   :  { %v6756_v17 = vadd.f32 %v6754_v20, %v6223_v42  ;;  %v12337_v42 = vand.u32 4294901760, %v7332_v36  ;;  %v7451_v20 = vsub.f32 %v12335_v45, %v7450_v26 }
0x1be4   :  { %10405 = vtanh.f32 %v6756_v17  ;;  %v12346_v53 = vsub.f32 %v7332_v36, %v12337_v42 }
0x1be5   :  { %v6765_v40 = vpop.permute.xlu0 %6764 }
0x1be6   :  { %v6767_v37 = vmul.f32 %v10404_v32, %v6765_v40  ;;  %v12348_v32 = vand.u32 4294901760, %v7331_v22  ;;  %v7457_v17 = vand.u32 4294901760, %v12346_v53  ;;  %v12360_v40 = vand.u32 4294901760, %v7330_v0 }
0x1be9   :  { %v7297_v15 = vpop.permute.xlu0 %7296 }
0x1bf1   :  { %v10406_v39 = vpop.eup %10405 }
0x1bf2   :  { %6760 = vrot.lane.b32.xlu1 %v10406_v39, %s10538_s25  ;;  %v12357_v39 = vsub.f32 %v7331_v22, %v12348_v32 }
0x1c64   :  { %v6761_v31 = vpop.permute.xlu1 %6760 }
0x1c65   :  { %v6763_v50 = vmul.f32 %v6761_v31, %v6758_v16  ;;  %v7452_v16 = vand.u32 4294901760, %v7451_v20  ;;  %v7458_v31 = vsub.f32 %v12346_v53, %v7457_v17 }
0x1c67   :  { %v6768_v59 = vadd.f32 %v6767_v37, %v6763_v50  ;;  %v7464_v37 = vand.u32 4294901760, %v12357_v39  ;;  %v12369_v50 = vsub.f32 %v7330_v0, %v12360_v40  ;;  %v7884_v0 = vld [vmem:[#allocation10 + $0x18] sm:$0xff] }
0x1c68   :  { %v12466_v20 = vand.u32 4294901760, %v7884_v0 }
0x1c69   :  { %6770 = vrot.lane.b32.xlu1 %v6768_v59, %s10538_s25  ;;  %v7459_v59 = vand.u32 4294901760, %v7458_v31  ;;  %v7882_v31 = vld [vmem:[#allocation10 + $0x8] sm:$0xff] }
0x1cdb   :  { %v6771_v54 = vpop.permute.xlu1 %6770 }
0x1cdc   :  { %6773 = vst.msk [vmem:[#allocation3] sm:$0xff] %vm1243_vm0, %v6771_v54  ;;  %v7465_v54 = vsub.f32 %v12357_v39, %v7464_v37 }
0x1ce3   :  { %v12260_v58 = vld [vmem:[#allocation3] sm:$0xff] }
0x1ce4   :  { %v6783_v1 = vsel %vm1243_vm0, %v12260_v58, 0 }
0x1ce5   :  { %v6855_v30 = vand.u32 4294901760, %v6783_v1 }
0x1ce7   :  { %v6856_v57 = vsub.f32 %v6783_v1, %v6855_v30  ;;  %10124 = vmatmul.mubr.f32.vlgmr.msra.gmra.mxu1 %v6855_v30  ;;  %v7466_v1 = vand.u32 4294901760, %v7465_v54  ;;  %v12485_v54 = vand.u32 4294901760, %v7882_v31 }
0x1ce8   :  { %10140 = vmatpush3.msra.mxu1 %v11914_v44  ;;  %10149 = vmatprep.mubr.msk.f32.mxu1 %vm10534_vm3, %v12702_v55 }
0x1ce9   :  { %10141 = vmatprep.subr.mxu1 %v12702_v55  ;;  %v6857_v28 = vand.u32 4294901760, %v6856_v57 }
0x1cea   :  { %10142 = vmatpush3.msra.mxu1 %v11919_v11 }
0x1ceb   :  { %10143 = vmatprep.subr.mxu1 %v12702_v55  ;;  %v6858_v51 = vsub.f32 %v6856_v57, %v6857_v28 }
0x1cec   :  { %10144 = vmatpush3.msra.mxu1 %v11929_v63 }
0x1ced   :  { %10145 = vmatprep.subr.mxu1 %v12702_v55  ;;  %v6859_v4 = vand.u32 4294901760, %v6858_v51 }
0x1cee   :  { %10146 = vmatpush3.msra.mxu1 %v11941_v2 }
0x1cef   :  { %10147 = vmatprep.subr.mxu1 %v12702_v55  ;;  %10111 = vmatmul.mubr.f32.vlgmr.msra.gmra.mxu0 %v6859_v4 }
0x1cf0   :  { %10127 = vmatpush3.msra.mxu0 %v11917_v46  ;;  %10148 = vmatpush3.msra.mxu1 %v11956_v3 }
0x1cf1   :  { %10128 = vmatprep.subr.mxu0 %v12702_v55  ;;  %10150 = vmatmul.mubr.f32.vlgmr.msra.gmra.mxu1 %v6857_v28 }
0x1cf2   :  { %10165 = vmatprep.subr.mxu1 %v12702_v55  ;;  %10129 = vmatpush3.msra.mxu0 %v11927_v48 }
0x1cf3   :  { %10166 = vmatpush3.msra.mxu1 %v11914_v44  ;;  %10130 = vmatprep.subr.mxu0 %v12702_v55 }
0x1cf4   :  { %10167 = vmatprep.subr.mxu1 %v12702_v55  ;;  %10131 = vmatpush3.msra.mxu0 %v11939_v14 }
0x1cf5   :  { %10168 = vmatpush3.msra.mxu1 %v11919_v11  ;;  %10132 = vmatprep.subr.mxu0 %v12702_v55 }
0x1cf6   :  { %10169 = vmatprep.subr.mxu1 %v12702_v55  ;;  %10133 = vmatpush3.msra.mxu0 %v11953_v47 }
0x1cf7   :  { %10170 = vmatpush3.msra.mxu1 %v11929_v63  ;;  %10134 = vmatprep.subr.mxu0 %v12702_v55 }
0x1cf8   :  { %10171 = vmatprep.subr.mxu1 %v12702_v55  ;;  %10135 = vmatpush3.msra.mxu0 %v11969_v12 }
0x1cf9   :  { %10136 = vmatprep.mubr.msk.f32.mxu0 %vm10534_vm3, %v12702_v55  ;;  %10172 = vmatpush3.msra.mxu1 %v11941_v2 }
0x1cfa   :  { %10137 = vmatmul.mubr.f32.vlgmr.msra.gmra.mxu0 %v6856_v57  ;;  %10152 = vmatprep.subr.mxu0 %v12702_v55 }
0x1cfb   :  { %10173 = vmatprep.subr.mxu1 %v12702_v55  ;;  %10153 = vmatpush3.msra.mxu0 %v11924_v6 }
0x1cfc   :  { %10174 = vmatpush3.msra.mxu1 %v11956_v3  ;;  %10175 = vmatprep.mubr.msk.f32.mxu1 %vm10534_vm3, %v12702_v55 }
0x1cfd   :  { %10154 = vmatprep.subr.mxu0 %v12702_v55  ;;  %10176 = vmatmul.mubr.f32.vlgmr.msra.gmra.mxu1 %v6855_v30 }
0x1cfe   :  { %10155 = vmatpush3.msra.mxu0 %v11936_v10  ;;  %10162 = vmatprep.mubr.msk.f32.mxu0 %vm10534_vm3, %v12702_v55 }
0x1cff   :  { %10156 = vmatprep.subr.mxu0 %v12702_v55  ;;  %10191 = vmatprep.subr.mxu1 %v12702_v55 }
0x1d00   :  { %10157 = vmatpush3.msra.mxu0 %v11950_v38  ;;  %10201 = vmatprep.mubr.msk.f32.mxu1 %vm10534_vm3, %v12702_v55 }
0x1d01   :  { %10158 = vmatprep.subr.mxu0 %v12702_v55  ;;  %10192 = vmatpush3.msra.mxu1 %v7445_v25 }
0x1d02   :  { %10159 = vmatpush3.msra.mxu0 %v11965_v18  ;;  %10193 = vmatprep.subr.mxu1 %v12702_v55 }
0x1d03   :  { %10160 = vmatprep.subr.mxu0 %v12702_v55  ;;  %10194 = vmatpush3.msra.mxu1 %v7452_v16 }
0x1d04   :  { %10161 = vmatpush3.msra.mxu0 %v11980_v13  ;;  %10195 = vmatprep.subr.mxu1 %v12702_v55 }
0x1d05   :  { %10163 = vmatmul.mubr.f32.vlgmr.msra.gmra.mxu0 %v6855_v30  ;;  %10178 = vmatprep.subr.mxu0 %v12702_v55 }
0x1d06   :  { %10188 = vmatprep.mubr.msk.f32.mxu0 %vm10534_vm3, %v12702_v55  ;;  %10179 = vmatpush3.msra.mxu0 %v12324_v61 }
0x1d07   :  { %10180 = vmatprep.subr.mxu0 %v12702_v55  ;;  %10196 = vmatpush3.msra.mxu1 %v7459_v59 }
0x1d08   :  { %10181 = vmatpush3.msra.mxu0 %v12329_v49  ;;  %10197 = vmatprep.subr.mxu1 %v12702_v55 }
0x1d09   :  { %10182 = vmatprep.subr.mxu0 %v12702_v55  ;;  %10198 = vmatpush3.msra.mxu1 %v7466_v1 }
0x1d0a   :  { %10183 = vmatpush3.msra.mxu0 %v12337_v42  ;;  %10199 = vmatprep.subr.mxu1 %v12702_v55 }
0x1d0b   :  { %10184 = vmatprep.subr.mxu0 %v12702_v55 }
0x1d0c   :  { %10185 = vmatpush3.msra.mxu0 %v12348_v32 }
0x1d0d   :  { %10186 = vmatprep.subr.mxu0 %v12702_v55 }
0x1d0e   :  { %10187 = vmatpush3.msra.mxu0 %v12360_v40 }
0x1d0f   :  { %10204 = vmatprep.subr.mxu0 %v12702_v55 }
0x1da7   :  { %v6957_v44 = vpop.f32.mrf.mxu1 }
0x1da9   :  { %v10125_v46 = vpop.f32.mrf.mxu1 }
0x1daf   :  { %v6861_v11 = vpop.f32.mrf.mxu0 }
0x1db0   :  { %v6958_v38 = vadd.f32 %v6957_v44, %v6861_v11 }
0x1db1   :  { %v7117_v6 = vpop.f32.mrf.mxu1  ;;  %v10112_v48 = vpop.f32.mrf.mxu0 }
0x1db3   :  { %v10151_v63 = vpop.f32.mrf.mxu1 }
0x1dba   :  { %v7039_v10 = vpop.f32.mrf.mxu0 }
0x1dbb   :  { %v7040_v3 = vadd.f32 %v7039_v10, %v6958_v38 }
0x1dbc   :  { %v10138_v14 = vpop.f32.mrf.mxu0 }
0x1dbd   :  { %v7279_v2 = vpop.f32.mrf.mxu1  ;;  %v7118_v18 = vadd.f32 %v7117_v6, %v7040_v3  ;;  %v8436_v6 = vld [vmem:[%s12587_s4] ss:$0 sm:$0xff] }
0x1dbf   :  { %v10177_v47 = vpop.f32.mrf.mxu1 }
0x1dc5   :  { %v7203_v12 = vpop.f32.mrf.mxu0 }
0x1dc6   :  { %v7204_v13 = vadd.f32 %v7203_v12, %v7118_v18 }
0x1dc7   :  { %v10164_v21 = vpop.f32.mrf.mxu0 }
0x1dc8   :  { %v7280_v35 = vadd.f32 %v7279_v2, %v7204_v13 }
0x1dca   :  { %v7299_v19 = vadd.f32 %v7297_v15, %v7280_v35  ;;  %v7283_v33 = vadd.f32 %v7280_v35, %v6776_v41 }
0x1dcc   :  { %7301 = vrot.lane.b32.xlu1 %v7299_v19, %s10536_s3  ;;  %v8433_v24 = vmul.f32 -1.442695, %v7283_v33 }
0x1dce   :  { %10407 = vpow2.f32 %v8433_v24 }
0x1ddb   :  { %v10408_v9 = vpop.eup %10407 }
0x1ddc   :  { %v7287_v43 = vadd.f32 1.0, %v10408_v9 }
0x1dde   :  { %10409 = vrcp.f32 %v7287_v43 }
0x1deb   :  { %v12317_v27 = vpop.eup %10409 }
0x1dec   :  { %v7311_v28 = vsub.f32 1.0, %v12317_v27 }
0x1e3e   :  { %v7302_v62 = vpop.permute.xlu1 %7301 }
0x1e3f   :  { %v7304_v52 = vmul.f32 %v12317_v27, %v7302_v62 }
0x1e41   :  { %7306 = vrot.lane.b32.xlu0 %v7304_v52, %s10535_s21 }
0x1e45   :  { %7317 = vrot.lane.b32.xlu0 %v12260_v58, %s10537_s24  ;;  %v7471_v58 = vand.u32 4294901760, %v12369_v50 }
0x1e47   :  { %v7472_v57 = vsub.f32 %v12369_v50, %v7471_v58 }
0x1e49   :  { %v7473_v4 = vand.u32 4294901760, %v7472_v57  ;;  %7849 = vrot.lane.b32.xlu0 %v8436_v6, %s10535_s21 }
0x1e4b   :  { %10200 = vmatpush3.msra.mxu1 %v7473_v4 }
0x1e4c   :  { %10217 = vmatprep.subr.mxu1 %v12702_v55 }
0x1eb3   :  { %v7307_v29 = vpop.permute.xlu0 %7306 }
0x1eb4   :  { %v7309_v8 = vadd.f32 %v7307_v29, %v6776_v41 }
0x1eb6   :  { %10411 = vtanh.f32 %v7309_v8 }
0x1eb7   :  { %v7318_v30 = vpop.permute.xlu0 %7317 }
0x1eb8   :  { %v7320_v44 = vmul.f32 %v12317_v27, %v7318_v30 }
0x1ebb   :  { %v7850_v8 = vpop.permute.xlu0 %7849 }
0x1ec3   :  { %v10412_v5 = vpop.eup %10411 }
0x1ec4   :  { %7313 = vrot.lane.b32.xlu1 %v10412_v5, %s10538_s25 }
0x1f36   :  { %v7314_v51 = vpop.permute.xlu1 %7313 }
0x1f37   :  { %v7316_v46 = vmul.f32 %v7314_v51, %v7311_v28  ;;  %v12494_v28 = vsub.f32 %v7882_v31, %v12485_v54 }
0x1f39   :  { %v7321_v11 = vadd.f32 %v7320_v44, %v7316_v46  ;;  %v8022_v46 = vand.u32 4294901760, %v12494_v28 }
0x1f3b   :  { %7323 = vrot.lane.b32.xlu1 %v7321_v11, %s10538_s25 }
0x1fad   :  { %v7324_v48 = vpop.permute.xlu1 %7323 }
0x1fae   :  { %7326 = vst.msk [vmem:[#allocation3] sm:$0xff] %vm1243_vm0, %v7324_v48  ;;  %v8023_v48 = vsub.f32 %v12494_v28, %v8022_v46 }
0x1fb5   :  { %v12392_v63 = vld [vmem:[#allocation3] sm:$0xff] }
0x1fb6   :  { %v7336_v10 = vsel %vm1243_vm0, %v12392_v63, 0 }
0x1fb7   :  { %v7408_v14 = vand.u32 4294901760, %v7336_v10 }
0x1fb9   :  { %v7409_v2 = vsub.f32 %v7336_v10, %v7408_v14  ;;  %10202 = vmatmul.mubr.f32.vlgmr.msra.gmra.mxu1 %v7408_v14  ;;  %v8024_v10 = vand.u32 4294901760, %v8023_v48 }
0x1fba   :  { %10218 = vmatpush3.msra.mxu1 %v12324_v61  ;;  %10227 = vmatprep.mubr.msk.f32.mxu1 %vm10534_vm3, %v12702_v55 }
0x1fbb   :  { %10219 = vmatprep.subr.mxu1 %v12702_v55  ;;  %v7410_v38 = vand.u32 4294901760, %v7409_v2 }
0x1fbc   :  { %10220 = vmatpush3.msra.mxu1 %v12329_v49 }
0x1fbd   :  { %10221 = vmatprep.subr.mxu1 %v12702_v55  ;;  %v7411_v47 = vsub.f32 %v7409_v2, %v7410_v38 }
0x1fbe   :  { %10222 = vmatpush3.msra.mxu1 %v12337_v42 }
0x1fbf   :  { %10223 = vmatprep.subr.mxu1 %v12702_v55  ;;  %v7412_v3 = vand.u32 4294901760, %v7411_v47 }
0x1fc0   :  { %10224 = vmatpush3.msra.mxu1 %v12348_v32 }
0x1fc1   :  { %10225 = vmatprep.subr.mxu1 %v12702_v55  ;;  %10189 = vmatmul.mubr.f32.vlgmr.msra.gmra.mxu0 %v7412_v3 }
0x1fc2   :  { %10205 = vmatpush3.msra.mxu0 %v12327_v60  ;;  %10226 = vmatpush3.msra.mxu1 %v12360_v40 }
0x1fc3   :  { %10206 = vmatprep.subr.mxu0 %v12702_v55  ;;  %10228 = vmatmul.mubr.f32.vlgmr.msra.gmra.mxu1 %v7410_v38 }
0x1fc4   :  { %10243 = vmatprep.subr.mxu1 %v12702_v55  ;;  %10207 = vmatpush3.msra.mxu0 %v12335_v45 }
0x1fc5   :  { %10244 = vmatpush3.msra.mxu1 %v12324_v61  ;;  %10208 = vmatprep.subr.mxu0 %v12702_v55  ;;  %v7329_v61 = vld [vmem:[#allocation2 + $0x58] sm:$0xff] }
0x1fc6   :  { %10245 = vmatprep.subr.mxu1 %v12702_v55  ;;  %10209 = vmatpush3.msra.mxu0 %v12346_v53  ;;  %v7885_v53 = vld [vmem:[#allocation10 + $0x20] sm:$0xff] }
0x1fc7   :  { %10246 = vmatpush3.msra.mxu1 %v12329_v49  ;;  %10210 = vmatprep.subr.mxu0 %v12702_v55 }
0x1fc8   :  { %10247 = vmatprep.subr.mxu1 %v12702_v55  ;;  %10211 = vmatpush3.msra.mxu0 %v12357_v39 }
0x1fc9   :  { %10248 = vmatpush3.msra.mxu1 %v12337_v42  ;;  %10212 = vmatprep.subr.mxu0 %v12702_v55 }
0x1fca   :  { %10249 = vmatprep.subr.mxu1 %v12702_v55  ;;  %10213 = vmatpush3.msra.mxu0 %v12369_v50 }
0x1fcb   :  { %10214 = vmatprep.mubr.msk.f32.mxu0 %vm10534_vm3, %v12702_v55  ;;  %10250 = vmatpush3.msra.mxu1 %v12348_v32  ;;  %v12461_v32 = vand.u32 4294901760, %v7885_v53 }
0x1fcc   :  { %10215 = vmatmul.mubr.f32.vlgmr.msra.gmra.mxu0 %v7409_v2  ;;  %10230 = vmatprep.subr.mxu0 %v12702_v55 }
0x1fcd   :  { %10251 = vmatprep.subr.mxu1 %v12702_v55  ;;  %10231 = vmatpush3.msra.mxu0 %v7443_v7  ;;  %v12464_v25 = vsub.f32 %v7885_v53, %v12461_v32 }
0x1fce   :  { %10252 = vmatpush3.msra.mxu1 %v12360_v40  ;;  %10253 = vmatprep.mubr.msk.f32.mxu1 %vm10534_vm3, %v12702_v55  ;;  %v12472_v40 = vsub.f32 %v7884_v0, %v12466_v20 }
0x1fcf   :  { %10232 = vmatprep.subr.mxu0 %v12702_v55  ;;  %10254 = vmatmul.mubr.f32.vlgmr.msra.gmra.mxu1 %v7408_v14  ;;  %v8001_v39 = vand.u32 4294901760, %v12464_v25 }
0x1fd0   :  { %10233 = vmatpush3.msra.mxu0 %v7450_v26  ;;  %10240 = vmatprep.mubr.msk.f32.mxu0 %vm10534_vm3, %v12702_v55  ;;  %v8008_v50 = vand.u32 4294901760, %v12472_v40 }
0x1fd1   :  { %10234 = vmatprep.subr.mxu0 %v12702_v55  ;;  %10269 = vmatprep.subr.mxu1 %v12702_v55 }
0x1fd2   :  { %10235 = vmatpush3.msra.mxu0 %v7457_v17  ;;  %10279 = vmatprep.mubr.msk.f32.mxu1 %vm10534_vm3, %v12702_v55  ;;  %v7883_v17 = vld [vmem:[#allocation10 + $0x10] sm:$0xff]  ;;  %v8009_v30 = vsub.f32 %v12472_v40, %v8008_v50 }
0x1fd3   :  { %10236 = vmatprep.subr.mxu0 %v12702_v55  ;;  %v12474_v16 = vand.u32 4294901760, %v7883_v17 }
0x1fd4   :  { %10237 = vmatpush3.msra.mxu0 %v7464_v37  ;;  %v8002_v37 = vsub.f32 %v12464_v25, %v8001_v39  ;;  %v8010_v4 = vand.u32 4294901760, %v8009_v30 }
0x1fd5   :  { %10238 = vmatprep.subr.mxu0 %v12702_v55  ;;  %v12483_v59 = vsub.f32 %v7883_v17, %v12474_v16 }
0x1fd6   :  { %10239 = vmatpush3.msra.mxu0 %v7471_v58  ;;  %v7881_v58 = vld [vmem:[#allocation10] sm:$0xff]  ;;  %v8003_v1 = vand.u32 4294901760, %v8002_v37 }
0x1fd7   :  { %10241 = vmatmul.mubr.f32.vlgmr.msra.gmra.mxu0 %v7408_v14  ;;  %10256 = vmatprep.subr.mxu0 %v12702_v55  ;;  %v8015_v57 = vand.u32 4294901760, %v12483_v59  ;;  %v12497_v51 = vand.u32 4294901760, %v7881_v58 }
0x1fd8   :  { %10266 = vmatprep.mubr.msk.f32.mxu0 %vm10534_vm3, %v12702_v55  ;;  %10257 = vmatpush3.msra.mxu0 %v12461_v32 }
0x1fd9   :  { %10258 = vmatprep.subr.mxu0 %v12702_v55  ;;  %10270 = vmatpush3.msra.mxu1 %v8003_v1  ;;  %v8016_v44 = vsub.f32 %v12483_v59, %v8015_v57  ;;  %v12506_v11 = vsub.f32 %v7881_v58, %v12497_v51 }
0x1fda   :  { %10259 = vmatpush3.msra.mxu0 %v12466_v20  ;;  %10271 = vmatprep.subr.mxu1 %v12702_v55 }
0x1fdb   :  { %10260 = vmatprep.subr.mxu0 %v12702_v55  ;;  %10272 = vmatpush3.msra.mxu1 %v8010_v4  ;;  %v8017_v6 = vand.u32 4294901760, %v8016_v44 }
0x1fdc   :  { %10261 = vmatpush3.msra.mxu0 %v12474_v16  ;;  %10273 = vmatprep.subr.mxu1 %v12702_v55 }
0x1fdd   :  { %10262 = vmatprep.subr.mxu0 %v12702_v55  ;;  %10274 = vmatpush3.msra.mxu1 %v8017_v6 }
0x1fde   :  { %10263 = vmatpush3.msra.mxu0 %v12485_v54  ;;  %10275 = vmatprep.subr.mxu1 %v12702_v55 }
0x1fdf   :  { %10264 = vmatprep.subr.mxu0 %v12702_v55  ;;  %10276 = vmatpush3.msra.mxu1 %v8024_v10 }
0x1fe0   :  { %10265 = vmatpush3.msra.mxu0 %v12497_v51  ;;  %10277 = vmatprep.subr.mxu1 %v12702_v55 }
0x1fe1   :  { %10282 = vmatprep.subr.mxu0 %v12702_v55 }
0x2079   :  { %v7510_v18 = vpop.f32.mrf.mxu1 }
0x207b   :  { %v10203_v12 = vpop.f32.mrf.mxu1 }
0x2081   :  { %v7414_v13 = vpop.f32.mrf.mxu0 }
0x2082   :  { %v7511_v24 = vadd.f32 %v7510_v18, %v7414_v13 }
0x2083   :  { %v7670_v21 = vpop.f32.mrf.mxu1  ;;  %v10190_v15 = vpop.f32.mrf.mxu0 }
0x2085   :  { %v10229_v35 = vpop.f32.mrf.mxu1 }
0x208c   :  { %v7592_v19 = vpop.f32.mrf.mxu0 }
0x208d   :  { %v7593_v43 = vadd.f32 %v7592_v19, %v7511_v24 }
0x208e   :  { %v10216_v41 = vpop.f32.mrf.mxu0 }
0x208f   :  { %v7832_v33 = vpop.f32.mrf.mxu1  ;;  %v7671_v27 = vadd.f32 %v7670_v21, %v7593_v43 }
0x2091   :  { %v10255_v9 = vpop.f32.mrf.mxu1 }
0x2097   :  { %v7756_v62 = vpop.f32.mrf.mxu0 }
0x2098   :  { %v7757_v52 = vadd.f32 %v7756_v62, %v7671_v27 }
0x2099   :  { %v10242_v29 = vpop.f32.mrf.mxu0 }
0x209a   :  { %v7833_v5 = vadd.f32 %v7832_v33, %v7757_v52 }
0x209c   :  { %v7852_v34 = vadd.f32 %v7850_v8, %v7833_v5  ;;  %v7836_v56 = vadd.f32 %v7833_v5, %v7329_v61  ;;  %v8437_v5 = vld [vmem:[%s12589_s6] ss:$0 sm:$0xff] }
0x209e   :  { %7854 = vrot.lane.b32.xlu1 %v7852_v34, %s10536_s3  ;;  %v8435_v60 = vmul.f32 -1.442695, %v7836_v56 }
0x20a0   :  { %10413 = vpow2.f32 %v8435_v60 }
0x20ad   :  { %v10414_v49 = vpop.eup %10413 }
0x20ae   :  { %v7840_v36 = vadd.f32 1.0, %v10414_v49 }
0x20b0   :  { %10415 = vrcp.f32 %v7840_v36 }
0x20bd   :  { %v12454_v7 = vpop.eup %10415 }
0x20be   :  { %v7864_v38 = vsub.f32 1.0, %v12454_v7 }
0x2110   :  { %v7855_v45 = vpop.permute.xlu1 %7854 }
0x2111   :  { %v7857_v42 = vmul.f32 %v12454_v7, %v7855_v45 }
0x2113   :  { %7859 = vrot.lane.b32.xlu0 %v7857_v42, %s10535_s21 }
0x2117   :  { %7870 = vrot.lane.b32.xlu0 %v12392_v63, %s10537_s24  ;;  %v8029_v63 = vand.u32 4294901760, %v12506_v11 }
0x2119   :  { %v8030_v2 = vsub.f32 %v12506_v11, %v8029_v63 }
0x211b   :  { %v8031_v3 = vand.u32 4294901760, %v8030_v2 }
0x211d   :  { %10278 = vmatpush3.msra.mxu1 %v8031_v3 }
0x211e   :  { %10295 = vmatprep.subr.mxu1 %v12702_v55 }
0x2185   :  { %v7860_v22 = vpop.permute.xlu0 %7859 }
0x2186   :  { %v7862_v23 = vadd.f32 %v7860_v22, %v7329_v61 }
0x2188   :  { %10417 = vtanh.f32 %v7862_v23 }
0x2189   :  { %v7871_v14 = vpop.permute.xlu0 %7870 }
0x218a   :  { %v7873_v18 = vmul.f32 %v12454_v7, %v7871_v14 }
0x2195   :  { %v10418_v26 = vpop.eup %10417 }
0x2196   :  { %7866 = vrot.lane.b32.xlu1 %v10418_v26, %s10538_s25 }
0x2208   :  { %v7867_v47 = vpop.permute.xlu1 %7866 }
0x2209   :  { %v7869_v12 = vmul.f32 %v7867_v47, %v7864_v38 }
0x220b   :  { %v7874_v13 = vadd.f32 %v7873_v18, %v7869_v12 }
0x220d   :  { %7876 = vrot.lane.b32.xlu1 %v7874_v13, %s10538_s25 }
0x227f   :  { %v7877_v21 = vpop.permute.xlu1 %7876 }
0x2280   :  { %7879 = vst.msk [vmem:[#allocation3] sm:$0xff] %vm1243_vm0, %v7877_v21 }
0x2287   :  { %v7880_v15 = vld [vmem:[#allocation3] sm:$0xff] }
0x2288   :  { %v7894_v35 = vsel %vm1243_vm0, %v7880_v15, 0 }
0x2289   :  { %v7966_v19 = vand.u32 4294901760, %v7894_v35 }
0x228b   :  { %v7967_v41 = vsub.f32 %v7894_v35, %v7966_v19  ;;  %10280 = vmatmul.mubr.f32.vlgmr.msra.gmra.mxu1 %v7966_v19 }
0x228c   :  { %10296 = vmatpush3.msra.mxu1 %v12461_v32  ;;  %10305 = vmatprep.mubr.msk.f32.mxu1 %vm10534_vm3, %v12702_v55 }
0x228d   :  { %10297 = vmatprep.subr.mxu1 %v12702_v55  ;;  %v7968_v33 = vand.u32 4294901760, %v7967_v41 }
0x228e   :  { %10298 = vmatpush3.msra.mxu1 %v12466_v20 }
0x228f   :  { %10299 = vmatprep.subr.mxu1 %v12702_v55  ;;  %v7969_v24 = vsub.f32 %v7967_v41, %v7968_v33 }
0x2290   :  { %10300 = vmatpush3.msra.mxu1 %v12474_v16 }
0x2291   :  { %10301 = vmatprep.subr.mxu1 %v12702_v55  ;;  %v7970_v9 = vand.u32 4294901760, %v7969_v24 }
0x2292   :  { %10302 = vmatpush3.msra.mxu1 %v12485_v54 }
0x2293   :  { %10303 = vmatprep.subr.mxu1 %v12702_v55  ;;  %10267 = vmatmul.mubr.f32.vlgmr.msra.gmra.mxu0 %v7970_v9 }
0x2294   :  { %10283 = vmatpush3.msra.mxu0 %v12464_v25  ;;  %10304 = vmatpush3.msra.mxu1 %v12497_v51 }
0x2295   :  { %10284 = vmatprep.subr.mxu0 %v12702_v55  ;;  %10306 = vmatmul.mubr.f32.vlgmr.msra.gmra.mxu1 %v7968_v33 }
0x2296   :  { %10321 = vmatprep.subr.mxu1 %v12702_v55  ;;  %10285 = vmatpush3.msra.mxu0 %v12472_v40 }
0x2297   :  { %10322 = vmatpush3.msra.mxu1 %v12461_v32  ;;  %10286 = vmatprep.subr.mxu0 %v12702_v55 }
0x2298   :  { %10323 = vmatprep.subr.mxu1 %v12702_v55  ;;  %10287 = vmatpush3.msra.mxu0 %v12483_v59 }
0x2299   :  { %10324 = vmatpush3.msra.mxu1 %v12466_v20  ;;  %10288 = vmatprep.subr.mxu0 %v12702_v55 }
0x229a   :  { %10325 = vmatprep.subr.mxu1 %v12702_v55  ;;  %10289 = vmatpush3.msra.mxu0 %v12494_v28 }
0x229b   :  { %10326 = vmatpush3.msra.mxu1 %v12474_v16  ;;  %10290 = vmatprep.subr.mxu0 %v12702_v55 }
0x229c   :  { %10327 = vmatprep.subr.mxu1 %v12702_v55  ;;  %10291 = vmatpush3.msra.mxu0 %v12506_v11 }
0x229d   :  { %10292 = vmatprep.mubr.msk.f32.mxu0 %vm10534_vm3, %v12702_v55  ;;  %10328 = vmatpush3.msra.mxu1 %v12485_v54 }
0x229e   :  { %10293 = vmatmul.mubr.f32.vlgmr.msra.gmra.mxu0 %v7967_v41  ;;  %10308 = vmatprep.subr.mxu0 %v12702_v55 }
0x229f   :  { %10329 = vmatprep.subr.mxu1 %v12702_v55  ;;  %10309 = vmatpush3.msra.mxu0 %v8001_v39 }
0x22a0   :  { %10330 = vmatpush3.msra.mxu1 %v12497_v51  ;;  %10331 = vmatprep.mubr.msk.f32.mxu1 %vm10534_vm3, %v12702_v55 }
0x22a1   :  { %10310 = vmatprep.subr.mxu0 %v12702_v55  ;;  %10332 = vmatmul.mubr.f32.vlgmr.msra.gmra.mxu1 %v7966_v19 }
0x22a2   :  { %10311 = vmatpush3.msra.mxu0 %v8008_v50  ;;  %10318 = vmatprep.mubr.msk.f32.mxu0 %vm10534_vm3, %v12702_v55 }
0x22a3   :  { %10312 = vmatprep.subr.mxu0 %v12702_v55 }
0x22a4   :  { %10313 = vmatpush3.msra.mxu0 %v8015_v57 }
0x22a5   :  { %10314 = vmatprep.subr.mxu0 %v12702_v55 }
0x22a6   :  { %10315 = vmatpush3.msra.mxu0 %v8022_v46 }
0x22a7   :  { %10316 = vmatprep.subr.mxu0 %v12702_v55 }
0x22a8   :  { %10317 = vmatpush3.msra.mxu0 %v8029_v63 }
0x22a9   :  { %10319 = vmatmul.mubr.f32.vlgmr.msra.gmra.mxu0 %v7966_v19 }
0x234b   :  { %v8068_v43 = vpop.f32.mrf.mxu1 }
0x234d   :  { %v10281_v27 = vpop.f32.mrf.mxu1 }
0x2353   :  { %v7972_v62 = vpop.f32.mrf.mxu0 }
0x2354   :  { %v7973_v34 = vadd.f32 %v8437_v5, %v7972_v62 }
0x2355   :  { %v8228_v52 = vpop.f32.mrf.mxu1  ;;  %v10268_v29 = vpop.f32.mrf.mxu0 }
0x2356   :  { %v8069_v49 = vadd.f32 %v8068_v43, %v7973_v34 }
0x2357   :  { %v10307_v8 = vpop.f32.mrf.mxu1 }
0x235e   :  { %v8150_v61 = vpop.f32.mrf.mxu0 }
0x235f   :  { %v8151_v36 = vadd.f32 %v8150_v61, %v8069_v49 }
0x2360   :  { %v10294_v56 = vpop.f32.mrf.mxu0 }
0x2361   :  { %v8390_v60 = vpop.f32.mrf.mxu1  ;;  %v8229_v7 = vadd.f32 %v8228_v52, %v8151_v36 }
0x2363   :  { %v10333_v55 = vpop.f32.mrf.mxu1 }
0x2369   :  { %v8314_v45 = vpop.f32.mrf.mxu0 }
0x236a   :  { %v8315_v42 = vadd.f32 %v8314_v45, %v8229_v7 }
0x236b   :  { %v10320_v22 = vpop.f32.mrf.mxu0 }
0x236c   :  { %v8391_v23 = vadd.f32 %v8390_v60, %v8315_v42 }
0x236e   :  { %8394 = vst [vmem:[#allocation12] sm:$0xff] %v8391_v23 }
0x236f   :  { %10510 = shalt.err (!%p10507_p10)
}
0x2370   :  { %8404 = dma.vmem_to_hbm [thread:$0]  %s8402_s11, 128, %s12590_s7, [#allocation6]  }
0x2371   :  { %10525 = dma.done.wait [#allocation6], 128  }
0x2372   :  { %10526 = vsyncadd [#allocation6], 4294967168 }
0x2373   :  { %8408 = vsyncpa [#allocation5], 1 }
0x2374   :  { %8409 = vsyncpa [#allocation8], 1 }
0x2375   :  { %8410 = vsyncpa [#allocation11], 1 }
0x2376   :  { %8411 = vsyncpa [#allocation6], 1 }

</bundles_post_ra>
